<compile_context>
chip_gen: v5e
topology: v5e:2x2
jax: 0.10.0
libtpu: 0.0.40
codegen_flags: <defaults>
</compile_context>

<pallas_src>
import math

import jax
import jax.numpy as jnp
from jax.experimental import pallas as pl
from jax.experimental.pallas import tpu as pltpu

_INV_LN2 = 1.0 / math.log(2.0)


# ---------------------------------------------------------------------------
# helpers
# ---------------------------------------------------------------------------
def _round_up(v, m):
    return ((v + m - 1) // m) * m


def _pick_tile(dim, unit_bytes, budget_bytes, align=1):
    """cdiv-friendly tile: the whole dim if its block fits the budget, else the
    largest multiple of `align` that does (>= align). Boundary blocks are masked
    by Pallas, so the tile never has to divide `dim`."""
    if dim * unit_bytes <= budget_bytes or dim <= align:
        return dim
    tile = (budget_bytes // max(unit_bytes, 1) // align) * align
    return int(max(align, min(dim, tile)))


def _vmem_budgets():
    """(vmem_limit_bytes, per-block byte budget), generation-aware."""
    try:
        cap = int(pltpu.get_tpu_info().vmem_capacity_bytes)
    except Exception:
        cap = 0
    if cap >= 100 * 1024 * 1024:                  # v5e / v6e: 128 MiB VMEM
        return 64 * 1024 * 1024, 8 * 1024 * 1024
    return 32 * 1024 * 1024, 4 * 1024 * 1024      # v7x (64 MiB) or unknown


# ---------------------------------------------------------------------------
# SpatialEBAM forward
# ---------------------------------------------------------------------------
def spatial_ebam(x, conv_w, conv_b):
    N, C, H, W = x.shape
    HW = H * W
    xi = jnp.dtype(x.dtype).itemsize
    vmem_limit, budget = _vmem_budgets()

    # ------------------ pass 1: entropy map + per-block maxima ------------------
    row_bytes = C * W * xi + W * 4                      # x row in + ent row out
    th = _pick_tile(H, row_bytes, budget, 8)            # multiple of 8 or == H
    nb1 = _pick_tile(N, th * row_bytes, budget, 1)
    if N >= 2:
        nb1 = min(nb1, pl.cdiv(N, 2))                   # >=2 parallel blocks for v7x's 2 TCs
    gb1, gh1 = pl.cdiv(N, nb1), pl.cdiv(H, th)
    exact1 = (N % nb1 == 0) and (H % th == 0)           # no boundary padding to mask

    def entropy_kernel(x_ref, ent_ref, bmax_ref):
        xb = x_ref[...].astype(jnp.float32)             # (nb1, C, th, W), f32 math
        m = jnp.max(xb, axis=-1, keepdims=True)
        e = jnp.exp(xb - m)
        s = jnp.sum(e, axis=-1, keepdims=True)
        p = e / s                                       # exact divide: parity with reference
        logp = (xb - m) - jnp.log(s)                    # log-softmax form: no 0*log2(0) NaN
        ent = -jnp.sum(p * logp, axis=1) * _INV_LN2     # (nb1, th, W), bits
        ent_ref[...] = ent
        if exact1:
            blk_max = jnp.max(ent)
        else:
            # mask boundary padding (entropy >= 0, so 0 is a safe neutral value)
            rb = jax.lax.broadcasted_iota(jnp.int32, ent.shape, 0) + pl.program_id(0) * nb1
            rh = jax.lax.broadcasted_iota(jnp.int32, ent.shape, 1) + pl.program_id(1) * th
            blk_max = jnp.max(jnp.where((rb < N) & (rh < H), ent, 0.0))
        bmax_ref[...] = jnp.full(bmax_ref.shape, blk_max, jnp.float32)

    ent, bmax = pl.pallas_call(
        entropy_kernel,
        out_shape=(jax.ShapeDtypeStruct((N, H, W), jnp.float32),
                   jax.ShapeDtypeStruct((gb1, gh1, 8, 128), jnp.float32)),
        grid=(gb1, gh1),
        in_specs=[pl.BlockSpec((nb1, C, th, W), lambda b, h: (b, 0, h, 0))],
        out_specs=(pl.BlockSpec((nb1, th, W), lambda b, h: (b, h, 0)),
                   pl.BlockSpec((1, 1, 8, 128), lambda b, h: (b, h, 0, 0))),
        compiler_params=pltpu.CompilerParams(
            dimension_semantics=("parallel", "parallel"),
            vmem_limit_bytes=vmem_limit),
    )(x)

    # global 1/max(entropy) from the tiny per-block maxima (no HBM re-read of ent).
    # Unguarded division matches the reference semantics.
    inv_max = (1.0 / jnp.max(bmax)).astype(jnp.float32).reshape(1)

    # -------- pass 2+3 fused: normalize -> 7x7 conv -> sigmoid -> gate --------
    L = _round_up((H + 3) * W, 128)        # flat plane + >=3*W zero tail (handles dy wrap)
    col_ids = (jnp.arange(L, dtype=jnp.int32) % W).reshape(1, L)   # column index per lane

    chan_bytes = 2 * HW * xi                           # x in + out per (batch, channel)
    tc = _pick_tile(C, chan_bytes, budget, 8)          # multiple of 8 or == C
    nb2 = _pick_tile(N, tc * chan_bytes + HW * 4 + L * 4, budget, 1)
    if N >= 2:
        nb2 = min(nb2, pl.cdiv(N, 2))
    gb2, gc = pl.cdiv(N, nb2), pl.cdiv(C, tc)

    def fused_kernel(col_ref, ent_ref, inv_ref, w_ref, b_ref, x_ref, o_ref, plane_ref):
        c = pl.program_id(1)

        @pl.when(c == 0)                                # attention plane: once per batch block
        def _():
            nb = plane_ref.shape[0]
            # zero only the tail pad; the interior is overwritten right after
            plane_ref[:, HW:] = jnp.zeros((nb, L - HW), jnp.float32)
            plane_ref[:, :HW] = 1.0 - ent_ref[:, 0, :] * inv_ref[0]
            plane = plane_ref[...]                      # (nb, L) flat normalized entropy
            col = col_ref[...]                          # (1, L) int32

            # 7x7 cross-correlation with zero padding, entirely with lane rolls:
            #   tap(dy,dx)[i] = plane[i + dy*W + dx]  (wrap lands in the zero tail),
            #   masked where the column index would leave [0, W).
            acc = jnp.full((nb, L), b_ref[0], jnp.float32)
            for dy in range(-3, 4):
                for dx in range(-3, 4):
                    shift = (-(dy * W + dx)) % L
                    rolled = plane if shift == 0 else pltpu.roll(plane, shift, axis=1)
                    tap = w_ref[dy + 3, dx + 3] * rolled
                    if dx > 0:
                        tap = jnp.where(col < (W - dx), tap, 0.0)
                    elif dx < 0:
                        tap = jnp.where(col >= (-dx), tap, 0.0)
                    acc = acc + tap
            plane_ref[...] = 1.0 / (1.0 + jnp.exp(-acc))   # sigmoid; att stays in VMEM

        att = plane_ref[:, :HW][:, None, :]             # (nb2, 1, HW)
        xv = x_ref[...].astype(jnp.float32)              # f32 math (v5e-safe), cast at store
        o_ref[...] = (xv * att).astype(o_ref.dtype)

    out2 = pl.pallas_call(
        fused_kernel,
        out_shape=jax.ShapeDtypeStruct((N, C, HW), x.dtype),
        grid=(gb2, gc),
        in_specs=[
            pl.BlockSpec((1, L), lambda b, c: (0, 0)),              # column ids (constant)
            pl.BlockSpec((nb2, 1, HW), lambda b, c: (b, 0, 0)),     # entropy (flat, lane-dense)
            pl.BlockSpec(memory_space=pltpu.MemorySpace.SMEM),      # 1/max entropy (1,)
            pl.BlockSpec(memory_space=pltpu.MemorySpace.SMEM),      # conv weight (7,7)
            pl.BlockSpec(memory_space=pltpu.MemorySpace.SMEM),      # conv bias (1,)
            pl.BlockSpec((nb2, tc, HW), lambda b, c: (b, c, 0)),    # x (lane-dense)
        ],
        out_specs=pl.BlockSpec((nb2, tc, HW), lambda b, c: (b, c, 0)),
        scratch_shapes=[pltpu.VMEM((nb2, L), jnp.float32)],         # pad plane, then att
        compiler_params=pltpu.CompilerParams(
            dimension_semantics=("parallel", "arbitrary"),          # att scratch persists over C
            vmem_limit_bytes=vmem_limit),
    )(col_ids, ent.reshape(N, 1, HW), inv_max,
      conv_w.astype(jnp.float32), conv_b.astype(jnp.float32), x.reshape(N, C, HW))

    return out2.reshape(N, C, H, W)


# ---------------------------------------------------------------------------
# pure-JAX reference mirroring the PyTorch module
# ---------------------------------------------------------------------------
def ref_forward(x, conv_w, conv_b):
    p = jax.nn.softmax(x, axis=-1)
    ent = -(p * jnp.log2(p)).sum(axis=1, keepdims=True)
    ent = 1.0 - ent / jnp.max(ent)
    conv = jax.lax.conv_general_dilated(
        ent, conv_w.reshape(1, 1, 7, 7), window_strides=(1, 1),
        padding=((3, 3), (3, 3)),
        dimension_numbers=("NCHW", "OIHW", "NCHW")) + conv_b[0]
    att = 1.0 / (1.0 + jnp.exp(-conv))
    return x * att


if __name__ == "__main__":
    key = jax.random.PRNGKey(0)
    kx, kw, kb = jax.random.split(key, 3)

    N, C, H, W = 2, 4, 16, 16
    x = jax.random.normal(kx, (N, C, H, W), jnp.float32)

    # Conv2d(1, 1, kernel_size=7) params, deterministic init (fan_in = 49)
    bound = 1.0 / 7.0
    conv_w = jax.random.uniform(kw, (7, 7), jnp.float32, -bound, bound)
    conv_b = jax.random.uniform(kb, (1,), jnp.float32, -bound, bound)

    out = jax.jit(spatial_ebam)(x, conv_w, conv_b)
    out = jax.block_until_ready(out)

    ref = ref_forward(x, conv_w, conv_b)
    assert out.shape == (N, C, H, W)
    err = float(jnp.max(jnp.abs(out - ref)))
    assert jnp.allclose(out, ref, atol=2e-3, rtol=2e-3), f"max abs err {err}"

    print("KERNEL_OK")
</pallas_src>

<mosaic_0001>
module attributes {stable_mosaic.version = 11 : i64} {
  func.func @entropy_kernel(%arg0: i32, %arg1: i32, %arg2: memref<1x4x16x16xf32, #tpu.memory_space<vmem>>, %arg3: memref<1x16x16xf32, #tpu.memory_space<vmem>>, %arg4: memref<1x1x8x128xf32, #tpu.memory_space<vmem>>) attributes {dimension_semantics = [#tpu.dimension_semantics<parallel>, #tpu.dimension_semantics<parallel>], iteration_bounds = array<i64: 2, 1>, scalar_prefetch = 0 : i64, scratch_operands = 0 : i64, tpu.core_type = #tpu.core_type<tc>, window_params = [{transform_indices = @transform_0, window_bounds = array<i64: 1, 4, 16, 16>}, {transform_indices = @transform_1, window_bounds = array<i64: 1, 16, 16>}, {transform_indices = @transform_2, window_bounds = array<i64: 1, 1, 8, 128>}]} {
    %c0 = arith.constant 0 : index
    %c0_0 = arith.constant 0 : index
    %c0_1 = arith.constant 0 : index
    %c0_2 = arith.constant 0 : index
    %0 = vector.load %arg2[%c0, %c0_0, %c0_1, %c0_2] : memref<1x4x16x16xf32, #tpu.memory_space<vmem>>, vector<1x4x16x16xf32>
    %cst = arith.constant dense<0xFF800000> : vector<1x4x16xf32>
    %1 = vector.multi_reduction <maximumf>, %0, %cst [3] : vector<1x4x16x16xf32> to vector<1x4x16xf32>
    %2 = vector.shape_cast %1 : vector<1x4x16xf32> to vector<1x4x16x1xf32>
    %3 = vector.broadcast %2 : vector<1x4x16x1xf32> to vector<1x4x16x16xf32>
    %4 = arith.subf %0, %3 : vector<1x4x16x16xf32>
    %5 = math.exp %4 : vector<1x4x16x16xf32>
    %cst_3 = arith.constant dense<0.000000e+00> : vector<1x4x16xf32>
    %6 = vector.multi_reduction <add>, %5, %cst_3 [3] : vector<1x4x16x16xf32> to vector<1x4x16xf32>
    %7 = vector.shape_cast %6 : vector<1x4x16xf32> to vector<1x4x16x1xf32>
    %8 = vector.broadcast %7 : vector<1x4x16x1xf32> to vector<1x4x16x16xf32>
    %9 = arith.divf %5, %8 : vector<1x4x16x16xf32>
    %10 = vector.broadcast %2 : vector<1x4x16x1xf32> to vector<1x4x16x16xf32>
    %11 = arith.subf %0, %10 : vector<1x4x16x16xf32>
    %12 = math.log %7 : vector<1x4x16x1xf32>
    %13 = vector.broadcast %12 : vector<1x4x16x1xf32> to vector<1x4x16x16xf32>
    %14 = arith.subf %11, %13 : vector<1x4x16x16xf32>
    %15 = arith.mulf %9, %14 : vector<1x4x16x16xf32>
    %cst_4 = arith.constant dense<0.000000e+00> : vector<1x16x16xf32>
    %16 = vector.multi_reduction <add>, %15, %cst_4 [1] : vector<1x4x16x16xf32> to vector<1x16x16xf32>
    %cst_5 = arith.constant 0.000000e+00 : f32
    %17 = vector.broadcast %cst_5 : f32 to vector<1x16x16xf32>
    %18 = arith.subf %17, %16 : vector<1x16x16xf32>
    %cst_6 = arith.constant 1.44269502 : f32
    %19 = vector.broadcast %cst_6 : f32 to vector<1x16x16xf32>
    %20 = arith.mulf %18, %19 : vector<1x16x16xf32>
    %c0_7 = arith.constant 0 : index
    %c0_8 = arith.constant 0 : index
    %c0_9 = arith.constant 0 : index
    %21 = vector.load %arg3[%c0_7, %c0_8, %c0_9] : memref<1x16x16xf32, #tpu.memory_space<vmem>>, vector<1x16x16xf32>
    tpu.vector_store %arg3[%c0_7, %c0_8, %c0_9], %20 {strides = array<i32>} : memref<1x16x16xf32, #tpu.memory_space<vmem>>, vector<1x16x16xf32>,
    %22 = vector.shape_cast %20 : vector<1x16x16xf32> to vector<1x1x16x16xf32>
    %cst_10 = arith.constant dense<0xFF800000> : vector<1xf32>
    %23 = vector.multi_reduction <maximumf>, %22, %cst_10 [1, 2, 3] : vector<1x1x16x16xf32> to vector<1xf32>
    %24 = vector.shape_cast %23 : vector<1xf32> to vector<1x1x1x1xf32>
    %25 = vector.extract %24[0, 0, 0, 0] : f32 from vector<1x1x1x1xf32>
    %26 = vector.broadcast %25 : f32 to vector<1x1x8x128xf32>
    %c0_11 = arith.constant 0 : index
    %c0_12 = arith.constant 0 : index
    %c0_13 = arith.constant 0 : index
    %c0_14 = arith.constant 0 : index
    %27 = vector.load %arg4[%c0_11, %c0_12, %c0_13, %c0_14] : memref<1x1x8x128xf32, #tpu.memory_space<vmem>>, vector<1x1x8x128xf32>
    tpu.vector_store %arg4[%c0_11, %c0_12, %c0_13, %c0_14], %26 {strides = array<i32>} : memref<1x1x8x128xf32, #tpu.memory_space<vmem>>, vector<1x1x8x128xf32>,
    return
  }
  func.func @transform_0(%arg0: i32, %arg1: i32) -> (i32, i32, i32, i32) {
    %c0_i32 = arith.constant 0 : i32
    %c0_i32_0 = arith.constant 0 : i32
    %c0_i32_1 = arith.constant 0 : i32
    return %arg0, %c0_i32, %arg1, %c0_i32_0 : i32, i32, i32, i32
  }
  func.func @transform_1(%arg0: i32, %arg1: i32) -> (i32, i32, i32) {
    %c0_i32 = arith.constant 0 : i32
    %c0_i32_0 = arith.constant 0 : i32
    return %arg0, %arg1, %c0_i32 : i32, i32, i32
  }
  func.func @transform_2(%arg0: i32, %arg1: i32) -> (i32, i32, i32, i32) {
    %c0_i32 = arith.constant 0 : i32
    %c0_i32_0 = arith.constant 0 : i32
    %c0_i32_1 = arith.constant 0 : i32
    return %arg0, %arg1, %c0_i32, %c0_i32_0 : i32, i32, i32, i32
  }
}

module attributes {stable_mosaic.version = 11 : i64} {
  func.func @fused_kernel(%arg0: i32, %arg1: i32, %arg2: memref<1x384xi32, #tpu.memory_space<vmem>>, %arg3: memref<1x1x256xf32, #tpu.memory_space<vmem>>, %arg4: memref<1xf32, #tpu.memory_space<smem>>, %arg5: memref<7x7xf32, #tpu.memory_space<smem>>, %arg6: memref<1xf32, #tpu.memory_space<smem>>, %arg7: memref<1x4x256xf32, #tpu.memory_space<vmem>>, %arg8: memref<1x4x256xf32, #tpu.memory_space<vmem>>, %arg9: memref<1x384xf32, #tpu.memory_space<vmem>>) attributes {dimension_semantics = [#tpu.dimension_semantics<parallel>, #tpu.dimension_semantics<arbitrary>], iteration_bounds = array<i64: 2, 1>, scalar_prefetch = 0 : i64, scratch_operands = 1 : i64, tpu.core_type = #tpu.core_type<tc>, window_params = [{pipeline_mode = #tpu.pipeline_mode<synchronous>, transform_indices = @transform_0, window_bounds = array<i64: 1, 384>}, {transform_indices = @transform_1, window_bounds = array<i64: 1, 1, 256>}, {transform_indices = @transform_2, window_bounds = array<i64: 1>}, {transform_indices = @transform_3, window_bounds = array<i64: 7, 7>}, {transform_indices = @transform_4, window_bounds = array<i64: 1>}, {transform_indices = @transform_5, window_bounds = array<i64: 1, 4, 256>}, {transform_indices = @transform_6, window_bounds = array<i64: 1, 4, 256>}]} {
    %c0_i32 = arith.constant 0 : i32
    %0 = arith.cmpi eq, %arg1, %c0_i32 : i32
    %1 = arith.extui %0 : i1 to i32
    %c0_i32_0 = arith.constant 0 : i32
    %2 = arith.cmpi ne, %1, %c0_i32_0 : i32
    scf.if %2 {
      %cst = arith.constant 0.000000e+00 : f32
      %9 = vector.broadcast %cst : f32 to vector<1x128xf32>
      %c0_8 = arith.constant 0 : index
      %c256 = arith.constant 256 : index
      %10 = vector.load %arg9[%c0_8, %c256] : memref<1x384xf32, #tpu.memory_space<vmem>>, vector<1x128xf32>
      tpu.vector_store %arg9[%c0_8, %c256], %9 {strides = array<i32>} : memref<1x384xf32, #tpu.memory_space<vmem>>, vector<1x128xf32>,
      %c0_9 = arith.constant 0 : index
      %c0_10 = arith.constant 0 : index
      %c0_11 = arith.constant 0 : index
      %11 = vector.load %arg3[%c0_9, %c0_10, %c0_11] : memref<1x1x256xf32, #tpu.memory_space<vmem>>, vector<1x1x256xf32>
      %12 = vector.shape_cast %11 : vector<1x1x256xf32> to vector<1x256xf32>
      %c0_12 = arith.constant 0 : index
      %13 = memref.load %arg4[%c0_12] : memref<1xf32, #tpu.memory_space<smem>>
      %14 = vector.broadcast %13 : f32 to vector<1x256xf32>
      %15 = arith.mulf %12, %14 : vector<1x256xf32>
      %cst_13 = arith.constant 1.000000e+00 : f32
      %16 = vector.broadcast %cst_13 : f32 to vector<1x256xf32>
      %17 = arith.subf %16, %15 : vector<1x256xf32>
      %c0_14 = arith.constant 0 : index
      %c0_15 = arith.constant 0 : index
      %18 = vector.load %arg9[%c0_14, %c0_15] : memref<1x384xf32, #tpu.memory_space<vmem>>, vector<1x256xf32>
      tpu.vector_store %arg9[%c0_14, %c0_15], %17 {strides = array<i32>} : memref<1x384xf32, #tpu.memory_space<vmem>>, vector<1x256xf32>,
      %c0_16 = arith.constant 0 : index
      %c0_17 = arith.constant 0 : index
      %19 = vector.load %arg9[%c0_16, %c0_17] : memref<1x384xf32, #tpu.memory_space<vmem>>, vector<1x384xf32>
      %c0_18 = arith.constant 0 : index
      %c0_19 = arith.constant 0 : index
      %20 = vector.load %arg2[%c0_18, %c0_19] : memref<1x384xi32, #tpu.memory_space<vmem>>, vector<1x384xi32>
      %c0_20 = arith.constant 0 : index
      %21 = memref.load %arg6[%c0_20] : memref<1xf32, #tpu.memory_space<smem>>
      %22 = vector.broadcast %21 : f32 to vector<1x384xf32>
      %c51_i32 = arith.constant 51 : i32
      %23 = tpu.dynamic_rotate %19 by %c51_i32 dim 1 : vector<1x384xf32>, i32 -> vector<1x384xf32>
      %c0_21 = arith.constant 0 : index
      %c0_22 = arith.constant 0 : index
      %24 = memref.load %arg5[%c0_21, %c0_22] : memref<7x7xf32, #tpu.memory_space<smem>>
      %25 = vector.broadcast %24 : f32 to vector<1x384xf32>
      %26 = arith.mulf %25, %23 : vector<1x384xf32>
      %c3_i32 = arith.constant 3 : i32
      %27 = vector.broadcast %c3_i32 : i32 to vector<1x384xi32>
      %28 = arith.cmpi sge, %20, %27 : vector<1x384xi32>
      %cst_23 = arith.constant 0.000000e+00 : f32
      %29 = vector.broadcast %cst_23 : f32 to vector<1x384xf32>
      %30 = arith.select %28, %26, %29 : vector<1x384xi1>, vector<1x384xf32>
      %31 = arith.addf %22, %30 : vector<1x384xf32>
      %c50_i32 = arith.constant 50 : i32
      %32 = tpu.dynamic_rotate %19 by %c50_i32 dim 1 : vector<1x384xf32>, i32 -> vector<1x384xf32>
      %c0_24 = arith.constant 0 : index
      %c1 = arith.constant 1 : index
      %33 = memref.load %arg5[%c0_24, %c1] : memref<7x7xf32, #tpu.memory_space<smem>>
      %34 = vector.broadcast %33 : f32 to vector<1x384xf32>
      %35 = arith.mulf %34, %32 : vector<1x384xf32>
      %c2_i32 = arith.constant 2 : i32
      %36 = vector.broadcast %c2_i32 : i32 to vector<1x384xi32>
      %37 = arith.cmpi sge, %20, %36 : vector<1x384xi32>
      %cst_25 = arith.constant 0.000000e+00 : f32
      %38 = vector.broadcast %cst_25 : f32 to vector<1x384xf32>
      %39 = arith.select %37, %35, %38 : vector<1x384xi1>, vector<1x384xf32>
      %40 = arith.addf %31, %39 : vector<1x384xf32>
      %c49_i32 = arith.constant 49 : i32
      %41 = tpu.dynamic_rotate %19 by %c49_i32 dim 1 : vector<1x384xf32>, i32 -> vector<1x384xf32>
      %c0_26 = arith.constant 0 : index
      %c2 = arith.constant 2 : index
      %42 = memref.load %arg5[%c0_26, %c2] : memref<7x7xf32, #tpu.memory_space<smem>>
      %43 = vector.broadcast %42 : f32 to vector<1x384xf32>
      %44 = arith.mulf %43, %41 : vector<1x384xf32>
      %c1_i32 = arith.constant 1 : i32
      %45 = vector.broadcast %c1_i32 : i32 to vector<1x384xi32>
      %46 = arith.cmpi sge, %20, %45 : vector<1x384xi32>
      %cst_27 = arith.constant 0.000000e+00 : f32
      %47 = vector.broadcast %cst_27 : f32 to vector<1x384xf32>
      %48 = arith.select %46, %44, %47 : vector<1x384xi1>, vector<1x384xf32>
      %49 = arith.addf %40, %48 : vector<1x384xf32>
      %c48_i32 = arith.constant 48 : i32
      %50 = tpu.dynamic_rotate %19 by %c48_i32 dim 1 : vector<1x384xf32>, i32 -> vector<1x384xf32>
      %c0_28 = arith.constant 0 : index
      %c3 = arith.constant 3 : index
      %51 = memref.load %arg5[%c0_28, %c3] : memref<7x7xf32, #tpu.memory_space<smem>>
      %52 = vector.broadcast %51 : f32 to vector<1x384xf32>
      %53 = arith.mulf %52, %50 : vector<1x384xf32>
      %54 = arith.addf %49, %53 : vector<1x384xf32>
      %c47_i32 = arith.constant 47 : i32
      %55 = tpu.dynamic_rotate %19 by %c47_i32 dim 1 : vector<1x384xf32>, i32 -> vector<1x384xf32>
      %c0_29 = arith.constant 0 : index
      %c4 = arith.constant 4 : index
      %56 = memref.load %arg5[%c0_29, %c4] : memref<7x7xf32, #tpu.memory_space<smem>>
      %57 = vector.broadcast %56 : f32 to vector<1x384xf32>
      %58 = arith.mulf %57, %55 : vector<1x384xf32>
      %c15_i32 = arith.constant 15 : i32
      %59 = vector.broadcast %c15_i32 : i32 to vector<1x384xi32>
      %60 = arith.cmpi slt, %20, %59 : vector<1x384xi32>
      %cst_30 = arith.constant 0.000000e+00 : f32
      %61 = vector.broadcast %cst_30 : f32 to vector<1x384xf32>
      %62 = arith.select %60, %58, %61 : vector<1x384xi1>, vector<1x384xf32>
      %63 = arith.addf %54, %62 : vector<1x384xf32>
      %c46_i32 = arith.constant 46 : i32
      %64 = tpu.dynamic_rotate %19 by %c46_i32 dim 1 : vector<1x384xf32>, i32 -> vector<1x384xf32>
      %c0_31 = arith.constant 0 : index
      %c5 = arith.constant 5 : index
      %65 = memref.load %arg5[%c0_31, %c5] : memref<7x7xf32, #tpu.memory_space<smem>>
      %66 = vector.broadcast %65 : f32 to vector<1x384xf32>
      %67 = arith.mulf %66, %64 : vector<1x384xf32>
      %c14_i32 = arith.constant 14 : i32
      %68 = vector.broadcast %c14_i32 : i32 to vector<1x384xi32>
      %69 = arith.cmpi slt, %20, %68 : vector<1x384xi32>
      %cst_32 = arith.constant 0.000000e+00 : f32
      %70 = vector.broadcast %cst_32 : f32 to vector<1x384xf32>
      %71 = arith.select %69, %67, %70 : vector<1x384xi1>, vector<1x384xf32>
      %72 = arith.addf %63, %71 : vector<1x384xf32>
      %c45_i32 = arith.constant 45 : i32
      %73 = tpu.dynamic_rotate %19 by %c45_i32 dim 1 : vector<1x384xf32>, i32 -> vector<1x384xf32>
      %c0_33 = arith.constant 0 : index
      %c6 = arith.constant 6 : index
      %74 = memref.load %arg5[%c0_33, %c6] : memref<7x7xf32, #tpu.memory_space<smem>>
      %75 = vector.broadcast %74 : f32 to vector<1x384xf32>
      %76 = arith.mulf %75, %73 : vector<1x384xf32>
      %c13_i32 = arith.constant 13 : i32
      %77 = vector.broadcast %c13_i32 : i32 to vector<1x384xi32>
      %78 = arith.cmpi slt, %20, %77 : vector<1x384xi32>
      %cst_34 = arith.constant 0.000000e+00 : f32
      %79 = vector.broadcast %cst_34 : f32 to vector<1x384xf32>
      %80 = arith.select %78, %76, %79 : vector<1x384xi1>, vector<1x384xf32>
      %81 = arith.addf %72, %80 : vector<1x384xf32>
      %c35_i32 = arith.constant 35 : i32
      %82 = tpu.dynamic_rotate %19 by %c35_i32 dim 1 : vector<1x384xf32>, i32 -> vector<1x384xf32>
      %c1_35 = arith.constant 1 : index
      %c0_36 = arith.constant 0 : index
      %83 = memref.load %arg5[%c1_35, %c0_36] : memref<7x7xf32, #tpu.memory_space<smem>>
      %84 = vector.broadcast %83 : f32 to vector<1x384xf32>
      %85 = arith.mulf %84, %82 : vector<1x384xf32>
      %c3_i32_37 = arith.constant 3 : i32
      %86 = vector.broadcast %c3_i32_37 : i32 to vector<1x384xi32>
      %87 = arith.cmpi sge, %20, %86 : vector<1x384xi32>
      %cst_38 = arith.constant 0.000000e+00 : f32
      %88 = vector.broadcast %cst_38 : f32 to vector<1x384xf32>
      %89 = arith.select %87, %85, %88 : vector<1x384xi1>, vector<1x384xf32>
      %90 = arith.addf %81, %89 : vector<1x384xf32>
      %c34_i32 = arith.constant 34 : i32
      %91 = tpu.dynamic_rotate %19 by %c34_i32 dim 1 : vector<1x384xf32>, i32 -> vector<1x384xf32>
      %c1_39 = arith.constant 1 : index
      %c1_40 = arith.constant 1 : index
      %92 = memref.load %arg5[%c1_39, %c1_40] : memref<7x7xf32, #tpu.memory_space<smem>>
      %93 = vector.broadcast %92 : f32 to vector<1x384xf32>
      %94 = arith.mulf %93, %91 : vector<1x384xf32>
      %c2_i32_41 = arith.constant 2 : i32
      %95 = vector.broadcast %c2_i32_41 : i32 to vector<1x384xi32>
      %96 = arith.cmpi sge, %20, %95 : vector<1x384xi32>
      %cst_42 = arith.constant 0.000000e+00 : f32
      %97 = vector.broadcast %cst_42 : f32 to vector<1x384xf32>
      %98 = arith.select %96, %94, %97 : vector<1x384xi1>, vector<1x384xf32>
      %99 = arith.addf %90, %98 : vector<1x384xf32>
      %c33_i32 = arith.constant 33 : i32
      %100 = tpu.dynamic_rotate %19 by %c33_i32 dim 1 : vector<1x384xf32>, i32 -> vector<1x384xf32>
      %c1_43 = arith.constant 1 : index
      %c2_44 = arith.constant 2 : index
      %101 = memref.load %arg5[%c1_43, %c2_44] : memref<7x7xf32, #tpu.memory_space<smem>>
      %102 = vector.broadcast %101 : f32 to vector<1x384xf32>
      %103 = arith.mulf %102, %100 : vector<1x384xf32>
      %c1_i32_45 = arith.constant 1 : i32
      %104 = vector.broadcast %c1_i32_45 : i32 to vector<1x384xi32>
      %105 = arith.cmpi sge, %20, %104 : vector<1x384xi32>
      %cst_46 = arith.constant 0.000000e+00 : f32
      %106 = vector.broadcast %cst_46 : f32 to vector<1x384xf32>
      %107 = arith.select %105, %103, %106 : vector<1x384xi1>, vector<1x384xf32>
      %108 = arith.addf %99, %107 : vector<1x384xf32>
      %c32_i32 = arith.constant 32 : i32
      %109 = tpu.dynamic_rotate %19 by %c32_i32 dim 1 : vector<1x384xf32>, i32 -> vector<1x384xf32>
      %c1_47 = arith.constant 1 : index
      %c3_48 = arith.constant 3 : index
      %110 = memref.load %arg5[%c1_47, %c3_48] : memref<7x7xf32, #tpu.memory_space<smem>>
      %111 = vector.broadcast %110 : f32 to vector<1x384xf32>
      %112 = arith.mulf %111, %109 : vector<1x384xf32>
      %113 = arith.addf %108, %112 : vector<1x384xf32>
      %c31_i32 = arith.constant 31 : i32
      %114 = tpu.dynamic_rotate %19 by %c31_i32 dim 1 : vector<1x384xf32>, i32 -> vector<1x384xf32>
      %c1_49 = arith.constant 1 : index
      %c4_50 = arith.constant 4 : index
      %115 = memref.load %arg5[%c1_49, %c4_50] : memref<7x7xf32, #tpu.memory_space<smem>>
      %116 = vector.broadcast %115 : f32 to vector<1x384xf32>
      %117 = arith.mulf %116, %114 : vector<1x384xf32>
      %c15_i32_51 = arith.constant 15 : i32
      %118 = vector.broadcast %c15_i32_51 : i32 to vector<1x384xi32>
      %119 = arith.cmpi slt, %20, %118 : vector<1x384xi32>
      %cst_52 = arith.constant 0.000000e+00 : f32
      %120 = vector.broadcast %cst_52 : f32 to vector<1x384xf32>
      %121 = arith.select %119, %117, %120 : vector<1x384xi1>, vector<1x384xf32>
      %122 = arith.addf %113, %121 : vector<1x384xf32>
      %c30_i32 = arith.constant 30 : i32
      %123 = tpu.dynamic_rotate %19 by %c30_i32 dim 1 : vector<1x384xf32>, i32 -> vector<1x384xf32>
      %c1_53 = arith.constant 1 : index
      %c5_54 = arith.constant 5 : index
      %124 = memref.load %arg5[%c1_53, %c5_54] : memref<7x7xf32, #tpu.memory_space<smem>>
      %125 = vector.broadcast %124 : f32 to vector<1x384xf32>
      %126 = arith.mulf %125, %123 : vector<1x384xf32>
      %c14_i32_55 = arith.constant 14 : i32
      %127 = vector.broadcast %c14_i32_55 : i32 to vector<1x384xi32>
      %128 = arith.cmpi slt, %20, %127 : vector<1x384xi32>
      %cst_56 = arith.constant 0.000000e+00 : f32
      %129 = vector.broadcast %cst_56 : f32 to vector<1x384xf32>
      %130 = arith.select %128, %126, %129 : vector<1x384xi1>, vector<1x384xf32>
      %131 = arith.addf %122, %130 : vector<1x384xf32>
      %c29_i32 = arith.constant 29 : i32
      %132 = tpu.dynamic_rotate %19 by %c29_i32 dim 1 : vector<1x384xf32>, i32 -> vector<1x384xf32>
      %c1_57 = arith.constant 1 : index
      %c6_58 = arith.constant 6 : index
      %133 = memref.load %arg5[%c1_57, %c6_58] : memref<7x7xf32, #tpu.memory_space<smem>>
      %134 = vector.broadcast %133 : f32 to vector<1x384xf32>
      %135 = arith.mulf %134, %132 : vector<1x384xf32>
      %c13_i32_59 = arith.constant 13 : i32
      %136 = vector.broadcast %c13_i32_59 : i32 to vector<1x384xi32>
      %137 = arith.cmpi slt, %20, %136 : vector<1x384xi32>
      %cst_60 = arith.constant 0.000000e+00 : f32
      %138 = vector.broadcast %cst_60 : f32 to vector<1x384xf32>
      %139 = arith.select %137, %135, %138 : vector<1x384xi1>, vector<1x384xf32>
      %140 = arith.addf %131, %139 : vector<1x384xf32>
      %c19_i32 = arith.constant 19 : i32
      %141 = tpu.dynamic_rotate %19 by %c19_i32 dim 1 : vector<1x384xf32>, i32 -> vector<1x384xf32>
      %c2_61 = arith.constant 2 : index
      %c0_62 = arith.constant 0 : index
      %142 = memref.load %arg5[%c2_61, %c0_62] : memref<7x7xf32, #tpu.memory_space<smem>>
      %143 = vector.broadcast %142 : f32 to vector<1x384xf32>
      %144 = arith.mulf %143, %141 : vector<1x384xf32>
      %c3_i32_63 = arith.constant 3 : i32
      %145 = vector.broadcast %c3_i32_63 : i32 to vector<1x384xi32>
      %146 = arith.cmpi sge, %20, %145 : vector<1x384xi32>
      %cst_64 = arith.constant 0.000000e+00 : f32
      %147 = vector.broadcast %cst_64 : f32 to vector<1x384xf32>
      %148 = arith.select %146, %144, %147 : vector<1x384xi1>, vector<1x384xf32>
      %149 = arith.addf %140, %148 : vector<1x384xf32>
      %c18_i32 = arith.constant 18 : i32
      %150 = tpu.dynamic_rotate %19 by %c18_i32 dim 1 : vector<1x384xf32>, i32 -> vector<1x384xf32>
      %c2_65 = arith.constant 2 : index
      %c1_66 = arith.constant 1 : index
      %151 = memref.load %arg5[%c2_65, %c1_66] : memref<7x7xf32, #tpu.memory_space<smem>>
      %152 = vector.broadcast %151 : f32 to vector<1x384xf32>
      %153 = arith.mulf %152, %150 : vector<1x384xf32>
      %c2_i32_67 = arith.constant 2 : i32
      %154 = vector.broadcast %c2_i32_67 : i32 to vector<1x384xi32>
      %155 = arith.cmpi sge, %20, %154 : vector<1x384xi32>
      %cst_68 = arith.constant 0.000000e+00 : f32
      %156 = vector.broadcast %cst_68 : f32 to vector<1x384xf32>
      %157 = arith.select %155, %153, %156 : vector<1x384xi1>, vector<1x384xf32>
      %158 = arith.addf %149, %157 : vector<1x384xf32>
      %c17_i32 = arith.constant 17 : i32
      %159 = tpu.dynamic_rotate %19 by %c17_i32 dim 1 : vector<1x384xf32>, i32 -> vector<1x384xf32>
      %c2_69 = arith.constant 2 : index
      %c2_70 = arith.constant 2 : index
      %160 = memref.load %arg5[%c2_69, %c2_70] : memref<7x7xf32, #tpu.memory_space<smem>>
      %161 = vector.broadcast %160 : f32 to vector<1x384xf32>
      %162 = arith.mulf %161, %159 : vector<1x384xf32>
      %c1_i32_71 = arith.constant 1 : i32
      %163 = vector.broadcast %c1_i32_71 : i32 to vector<1x384xi32>
      %164 = arith.cmpi sge, %20, %163 : vector<1x384xi32>
      %cst_72 = arith.constant 0.000000e+00 : f32
      %165 = vector.broadcast %cst_72 : f32 to vector<1x384xf32>
      %166 = arith.select %164, %162, %165 : vector<1x384xi1>, vector<1x384xf32>
      %167 = arith.addf %158, %166 : vector<1x384xf32>
      %c16_i32 = arith.constant 16 : i32
      %168 = tpu.dynamic_rotate %19 by %c16_i32 dim 1 : vector<1x384xf32>, i32 -> vector<1x384xf32>
      %c2_73 = arith.constant 2 : index
      %c3_74 = arith.constant 3 : index
      %169 = memref.load %arg5[%c2_73, %c3_74] : memref<7x7xf32, #tpu.memory_space<smem>>
      %170 = vector.broadcast %169 : f32 to vector<1x384xf32>
      %171 = arith.mulf %170, %168 : vector<1x384xf32>
      %172 = arith.addf %167, %171 : vector<1x384xf32>
      %c15_i32_75 = arith.constant 15 : i32
      %173 = tpu.dynamic_rotate %19 by %c15_i32_75 dim 1 : vector<1x384xf32>, i32 -> vector<1x384xf32>
      %c2_76 = arith.constant 2 : index
      %c4_77 = arith.constant 4 : index
      %174 = memref.load %arg5[%c2_76, %c4_77] : memref<7x7xf32, #tpu.memory_space<smem>>
      %175 = vector.broadcast %174 : f32 to vector<1x384xf32>
      %176 = arith.mulf %175, %173 : vector<1x384xf32>
      %c15_i32_78 = arith.constant 15 : i32
      %177 = vector.broadcast %c15_i32_78 : i32 to vector<1x384xi32>
      %178 = arith.cmpi slt, %20, %177 : vector<1x384xi32>
      %cst_79 = arith.constant 0.000000e+00 : f32
      %179 = vector.broadcast %cst_79 : f32 to vector<1x384xf32>
      %180 = arith.select %178, %176, %179 : vector<1x384xi1>, vector<1x384xf32>
      %181 = arith.addf %172, %180 : vector<1x384xf32>
      %c14_i32_80 = arith.constant 14 : i32
      %182 = tpu.dynamic_rotate %19 by %c14_i32_80 dim 1 : vector<1x384xf32>, i32 -> vector<1x384xf32>
      %c2_81 = arith.constant 2 : index
      %c5_82 = arith.constant 5 : index
      %183 = memref.load %arg5[%c2_81, %c5_82] : memref<7x7xf32, #tpu.memory_space<smem>>
      %184 = vector.broadcast %183 : f32 to vector<1x384xf32>
      %185 = arith.mulf %184, %182 : vector<1x384xf32>
      %c14_i32_83 = arith.constant 14 : i32
      %186 = vector.broadcast %c14_i32_83 : i32 to vector<1x384xi32>
      %187 = arith.cmpi slt, %20, %186 : vector<1x384xi32>
      %cst_84 = arith.constant 0.000000e+00 : f32
      %188 = vector.broadcast %cst_84 : f32 to vector<1x384xf32>
      %189 = arith.select %187, %185, %188 : vector<1x384xi1>, vector<1x384xf32>
      %190 = arith.addf %181, %189 : vector<1x384xf32>
      %c13_i32_85 = arith.constant 13 : i32
      %191 = tpu.dynamic_rotate %19 by %c13_i32_85 dim 1 : vector<1x384xf32>, i32 -> vector<1x384xf32>
      %c2_86 = arith.constant 2 : index
      %c6_87 = arith.constant 6 : index
      %192 = memref.load %arg5[%c2_86, %c6_87] : memref<7x7xf32, #tpu.memory_space<smem>>
      %193 = vector.broadcast %192 : f32 to vector<1x384xf32>
      %194 = arith.mulf %193, %191 : vector<1x384xf32>
      %c13_i32_88 = arith.constant 13 : i32
      %195 = vector.broadcast %c13_i32_88 : i32 to vector<1x384xi32>
      %196 = arith.cmpi slt, %20, %195 : vector<1x384xi32>
      %cst_89 = arith.constant 0.000000e+00 : f32
      %197 = vector.broadcast %cst_89 : f32 to vector<1x384xf32>
      %198 = arith.select %196, %194, %197 : vector<1x384xi1>, vector<1x384xf32>
      %199 = arith.addf %190, %198 : vector<1x384xf32>
      %c3_i32_90 = arith.constant 3 : i32
      %200 = tpu.dynamic_rotate %19 by %c3_i32_90 dim 1 : vector<1x384xf32>, i32 -> vector<1x384xf32>
      %c3_91 = arith.constant 3 : index
      %c0_92 = arith.constant 0 : index
      %201 = memref.load %arg5[%c3_91, %c0_92] : memref<7x7xf32, #tpu.memory_space<smem>>
      %202 = vector.broadcast %201 : f32 to vector<1x384xf32>
      %203 = arith.mulf %202, %200 : vector<1x384xf32>
      %c3_i32_93 = arith.constant 3 : i32
      %204 = vector.broadcast %c3_i32_93 : i32 to vector<1x384xi32>
      %205 = arith.cmpi sge, %20, %204 : vector<1x384xi32>
      %cst_94 = arith.constant 0.000000e+00 : f32
      %206 = vector.broadcast %cst_94 : f32 to vector<1x384xf32>
      %207 = arith.select %205, %203, %206 : vector<1x384xi1>, vector<1x384xf32>
      %208 = arith.addf %199, %207 : vector<1x384xf32>
      %c2_i32_95 = arith.constant 2 : i32
      %209 = tpu.dynamic_rotate %19 by %c2_i32_95 dim 1 : vector<1x384xf32>, i32 -> vector<1x384xf32>
      %c3_96 = arith.constant 3 : index
      %c1_97 = arith.constant 1 : index
      %210 = memref.load %arg5[%c3_96, %c1_97] : memref<7x7xf32, #tpu.memory_space<smem>>
      %211 = vector.broadcast %210 : f32 to vector<1x384xf32>
      %212 = arith.mulf %211, %209 : vector<1x384xf32>
      %c2_i32_98 = arith.constant 2 : i32
      %213 = vector.broadcast %c2_i32_98 : i32 to vector<1x384xi32>
      %214 = arith.cmpi sge, %20, %213 : vector<1x384xi32>
      %cst_99 = arith.constant 0.000000e+00 : f32
      %215 = vector.broadcast %cst_99 : f32 to vector<1x384xf32>
      %216 = arith.select %214, %212, %215 : vector<1x384xi1>, vector<1x384xf32>
      %217 = arith.addf %208, %216 : vector<1x384xf32>
      %c1_i32_100 = arith.constant 1 : i32
      %218 = tpu.dynamic_rotate %19 by %c1_i32_100 dim 1 : vector<1x384xf32>, i32 -> vector<1x384xf32>
      %c3_101 = arith.constant 3 : index
      %c2_102 = arith.constant 2 : index
      %219 = memref.load %arg5[%c3_101, %c2_102] : memref<7x7xf32, #tpu.memory_space<smem>>
      %220 = vector.broadcast %219 : f32 to vector<1x384xf32>
      %221 = arith.mulf %220, %218 : vector<1x384xf32>
      %c1_i32_103 = arith.constant 1 : i32
      %222 = vector.broadcast %c1_i32_103 : i32 to vector<1x384xi32>
      %223 = arith.cmpi sge, %20, %222 : vector<1x384xi32>
      %cst_104 = arith.constant 0.000000e+00 : f32
      %224 = vector.broadcast %cst_104 : f32 to vector<1x384xf32>
      %225 = arith.select %223, %221, %224 : vector<1x384xi1>, vector<1x384xf32>
      %226 = arith.addf %217, %225 : vector<1x384xf32>
      %c3_105 = arith.constant 3 : index
      %c3_106 = arith.constant 3 : index
      %227 = memref.load %arg5[%c3_105, %c3_106] : memref<7x7xf32, #tpu.memory_space<smem>>
      %228 = vector.broadcast %227 : f32 to vector<1x384xf32>
      %229 = arith.mulf %228, %19 : vector<1x384xf32>
      %230 = arith.addf %226, %229 : vector<1x384xf32>
      %c383_i32 = arith.constant 383 : i32
      %231 = tpu.dynamic_rotate %19 by %c383_i32 dim 1 : vector<1x384xf32>, i32 -> vector<1x384xf32>
      %c3_107 = arith.constant 3 : index
      %c4_108 = arith.constant 4 : index
      %232 = memref.load %arg5[%c3_107, %c4_108] : memref<7x7xf32, #tpu.memory_space<smem>>
      %233 = vector.broadcast %232 : f32 to vector<1x384xf32>
      %234 = arith.mulf %233, %231 : vector<1x384xf32>
      %c15_i32_109 = arith.constant 15 : i32
      %235 = vector.broadcast %c15_i32_109 : i32 to vector<1x384xi32>
      %236 = arith.cmpi slt, %20, %235 : vector<1x384xi32>
      %cst_110 = arith.constant 0.000000e+00 : f32
      %237 = vector.broadcast %cst_110 : f32 to vector<1x384xf32>
      %238 = arith.select %236, %234, %237 : vector<1x384xi1>, vector<1x384xf32>
      %239 = arith.addf %230, %238 : vector<1x384xf32>
      %c382_i32 = arith.constant 382 : i32
      %240 = tpu.dynamic_rotate %19 by %c382_i32 dim 1 : vector<1x384xf32>, i32 -> vector<1x384xf32>
      %c3_111 = arith.constant 3 : index
      %c5_112 = arith.constant 5 : index
      %241 = memref.load %arg5[%c3_111, %c5_112] : memref<7x7xf32, #tpu.memory_space<smem>>
      %242 = vector.broadcast %241 : f32 to vector<1x384xf32>
      %243 = arith.mulf %242, %240 : vector<1x384xf32>
      %c14_i32_113 = arith.constant 14 : i32
      %244 = vector.broadcast %c14_i32_113 : i32 to vector<1x384xi32>
      %245 = arith.cmpi slt, %20, %244 : vector<1x384xi32>
      %cst_114 = arith.constant 0.000000e+00 : f32
      %246 = vector.broadcast %cst_114 : f32 to vector<1x384xf32>
      %247 = arith.select %245, %243, %246 : vector<1x384xi1>, vector<1x384xf32>
      %248 = arith.addf %239, %247 : vector<1x384xf32>
      %c381_i32 = arith.constant 381 : i32
      %249 = tpu.dynamic_rotate %19 by %c381_i32 dim 1 : vector<1x384xf32>, i32 -> vector<1x384xf32>
      %c3_115 = arith.constant 3 : index
      %c6_116 = arith.constant 6 : index
      %250 = memref.load %arg5[%c3_115, %c6_116] : memref<7x7xf32, #tpu.memory_space<smem>>
      %251 = vector.broadcast %250 : f32 to vector<1x384xf32>
      %252 = arith.mulf %251, %249 : vector<1x384xf32>
      %c13_i32_117 = arith.constant 13 : i32
      %253 = vector.broadcast %c13_i32_117 : i32 to vector<1x384xi32>
      %254 = arith.cmpi slt, %20, %253 : vector<1x384xi32>
      %cst_118 = arith.constant 0.000000e+00 : f32
      %255 = vector.broadcast %cst_118 : f32 to vector<1x384xf32>
      %256 = arith.select %254, %252, %255 : vector<1x384xi1>, vector<1x384xf32>
      %257 = arith.addf %248, %256 : vector<1x384xf32>
      %c371_i32 = arith.constant 371 : i32
      %258 = tpu.dynamic_rotate %19 by %c371_i32 dim 1 : vector<1x384xf32>, i32 -> vector<1x384xf32>
      %c4_119 = arith.constant 4 : index
      %c0_120 = arith.constant 0 : index
      %259 = memref.load %arg5[%c4_119, %c0_120] : memref<7x7xf32, #tpu.memory_space<smem>>
      %260 = vector.broadcast %259 : f32 to vector<1x384xf32>
      %261 = arith.mulf %260, %258 : vector<1x384xf32>
      %c3_i32_121 = arith.constant 3 : i32
      %262 = vector.broadcast %c3_i32_121 : i32 to vector<1x384xi32>
      %263 = arith.cmpi sge, %20, %262 : vector<1x384xi32>
      %cst_122 = arith.constant 0.000000e+00 : f32
      %264 = vector.broadcast %cst_122 : f32 to vector<1x384xf32>
      %265 = arith.select %263, %261, %264 : vector<1x384xi1>, vector<1x384xf32>
      %266 = arith.addf %257, %265 : vector<1x384xf32>
      %c370_i32 = arith.constant 370 : i32
      %267 = tpu.dynamic_rotate %19 by %c370_i32 dim 1 : vector<1x384xf32>, i32 -> vector<1x384xf32>
      %c4_123 = arith.constant 4 : index
      %c1_124 = arith.constant 1 : index
      %268 = memref.load %arg5[%c4_123, %c1_124] : memref<7x7xf32, #tpu.memory_space<smem>>
      %269 = vector.broadcast %268 : f32 to vector<1x384xf32>
      %270 = arith.mulf %269, %267 : vector<1x384xf32>
      %c2_i32_125 = arith.constant 2 : i32
      %271 = vector.broadcast %c2_i32_125 : i32 to vector<1x384xi32>
      %272 = arith.cmpi sge, %20, %271 : vector<1x384xi32>
      %cst_126 = arith.constant 0.000000e+00 : f32
      %273 = vector.broadcast %cst_126 : f32 to vector<1x384xf32>
      %274 = arith.select %272, %270, %273 : vector<1x384xi1>, vector<1x384xf32>
      %275 = arith.addf %266, %274 : vector<1x384xf32>
      %c369_i32 = arith.constant 369 : i32
      %276 = tpu.dynamic_rotate %19 by %c369_i32 dim 1 : vector<1x384xf32>, i32 -> vector<1x384xf32>
      %c4_127 = arith.constant 4 : index
      %c2_128 = arith.constant 2 : index
      %277 = memref.load %arg5[%c4_127, %c2_128] : memref<7x7xf32, #tpu.memory_space<smem>>
      %278 = vector.broadcast %277 : f32 to vector<1x384xf32>
      %279 = arith.mulf %278, %276 : vector<1x384xf32>
      %c1_i32_129 = arith.constant 1 : i32
      %280 = vector.broadcast %c1_i32_129 : i32 to vector<1x384xi32>
      %281 = arith.cmpi sge, %20, %280 : vector<1x384xi32>
      %cst_130 = arith.constant 0.000000e+00 : f32
      %282 = vector.broadcast %cst_130 : f32 to vector<1x384xf32>
      %283 = arith.select %281, %279, %282 : vector<1x384xi1>, vector<1x384xf32>
      %284 = arith.addf %275, %283 : vector<1x384xf32>
      %c368_i32 = arith.constant 368 : i32
      %285 = tpu.dynamic_rotate %19 by %c368_i32 dim 1 : vector<1x384xf32>, i32 -> vector<1x384xf32>
      %c4_131 = arith.constant 4 : index
      %c3_132 = arith.constant 3 : index
      %286 = memref.load %arg5[%c4_131, %c3_132] : memref<7x7xf32, #tpu.memory_space<smem>>
      %287 = vector.broadcast %286 : f32 to vector<1x384xf32>
      %288 = arith.mulf %287, %285 : vector<1x384xf32>
      %289 = arith.addf %284, %288 : vector<1x384xf32>
      %c367_i32 = arith.constant 367 : i32
      %290 = tpu.dynamic_rotate %19 by %c367_i32 dim 1 : vector<1x384xf32>, i32 -> vector<1x384xf32>
      %c4_133 = arith.constant 4 : index
      %c4_134 = arith.constant 4 : index
      %291 = memref.load %arg5[%c4_133, %c4_134] : memref<7x7xf32, #tpu.memory_space<smem>>
      %292 = vector.broadcast %291 : f32 to vector<1x384xf32>
      %293 = arith.mulf %292, %290 : vector<1x384xf32>
      %c15_i32_135 = arith.constant 15 : i32
      %294 = vector.broadcast %c15_i32_135 : i32 to vector<1x384xi32>
      %295 = arith.cmpi slt, %20, %294 : vector<1x384xi32>
      %cst_136 = arith.constant 0.000000e+00 : f32
      %296 = vector.broadcast %cst_136 : f32 to vector<1x384xf32>
      %297 = arith.select %295, %293, %296 : vector<1x384xi1>, vector<1x384xf32>
      %298 = arith.addf %289, %297 : vector<1x384xf32>
      %c366_i32 = arith.constant 366 : i32
      %299 = tpu.dynamic_rotate %19 by %c366_i32 dim 1 : vector<1x384xf32>, i32 -> vector<1x384xf32>
      %c4_137 = arith.constant 4 : index
      %c5_138 = arith.constant 5 : index
      %300 = memref.load %arg5[%c4_137, %c5_138] : memref<7x7xf32, #tpu.memory_space<smem>>
      %301 = vector.broadcast %300 : f32 to vector<1x384xf32>
      %302 = arith.mulf %301, %299 : vector<1x384xf32>
      %c14_i32_139 = arith.constant 14 : i32
      %303 = vector.broadcast %c14_i32_139 : i32 to vector<1x384xi32>
      %304 = arith.cmpi slt, %20, %303 : vector<1x384xi32>
      %cst_140 = arith.constant 0.000000e+00 : f32
      %305 = vector.broadcast %cst_140 : f32 to vector<1x384xf32>
      %306 = arith.select %304, %302, %305 : vector<1x384xi1>, vector<1x384xf32>
      %307 = arith.addf %298, %306 : vector<1x384xf32>
      %c365_i32 = arith.constant 365 : i32
      %308 = tpu.dynamic_rotate %19 by %c365_i32 dim 1 : vector<1x384xf32>, i32 -> vector<1x384xf32>
      %c4_141 = arith.constant 4 : index
      %c6_142 = arith.constant 6 : index
      %309 = memref.load %arg5[%c4_141, %c6_142] : memref<7x7xf32, #tpu.memory_space<smem>>
      %310 = vector.broadcast %309 : f32 to vector<1x384xf32>
      %311 = arith.mulf %310, %308 : vector<1x384xf32>
      %c13_i32_143 = arith.constant 13 : i32
      %312 = vector.broadcast %c13_i32_143 : i32 to vector<1x384xi32>
      %313 = arith.cmpi slt, %20, %312 : vector<1x384xi32>
      %cst_144 = arith.constant 0.000000e+00 : f32
      %314 = vector.broadcast %cst_144 : f32 to vector<1x384xf32>
      %315 = arith.select %313, %311, %314 : vector<1x384xi1>, vector<1x384xf32>
      %316 = arith.addf %307, %315 : vector<1x384xf32>
      %c355_i32 = arith.constant 355 : i32
      %317 = tpu.dynamic_rotate %19 by %c355_i32 dim 1 : vector<1x384xf32>, i32 -> vector<1x384xf32>
      %c5_145 = arith.constant 5 : index
      %c0_146 = arith.constant 0 : index
      %318 = memref.load %arg5[%c5_145, %c0_146] : memref<7x7xf32, #tpu.memory_space<smem>>
      %319 = vector.broadcast %318 : f32 to vector<1x384xf32>
      %320 = arith.mulf %319, %317 : vector<1x384xf32>
      %c3_i32_147 = arith.constant 3 : i32
      %321 = vector.broadcast %c3_i32_147 : i32 to vector<1x384xi32>
      %322 = arith.cmpi sge, %20, %321 : vector<1x384xi32>
      %cst_148 = arith.constant 0.000000e+00 : f32
      %323 = vector.broadcast %cst_148 : f32 to vector<1x384xf32>
      %324 = arith.select %322, %320, %323 : vector<1x384xi1>, vector<1x384xf32>
      %325 = arith.addf %316, %324 : vector<1x384xf32>
      %c354_i32 = arith.constant 354 : i32
      %326 = tpu.dynamic_rotate %19 by %c354_i32 dim 1 : vector<1x384xf32>, i32 -> vector<1x384xf32>
      %c5_149 = arith.constant 5 : index
      %c1_150 = arith.constant 1 : index
      %327 = memref.load %arg5[%c5_149, %c1_150] : memref<7x7xf32, #tpu.memory_space<smem>>
      %328 = vector.broadcast %327 : f32 to vector<1x384xf32>
      %329 = arith.mulf %328, %326 : vector<1x384xf32>
      %c2_i32_151 = arith.constant 2 : i32
      %330 = vector.broadcast %c2_i32_151 : i32 to vector<1x384xi32>
      %331 = arith.cmpi sge, %20, %330 : vector<1x384xi32>
      %cst_152 = arith.constant 0.000000e+00 : f32
      %332 = vector.broadcast %cst_152 : f32 to vector<1x384xf32>
      %333 = arith.select %331, %329, %332 : vector<1x384xi1>, vector<1x384xf32>
      %334 = arith.addf %325, %333 : vector<1x384xf32>
      %c353_i32 = arith.constant 353 : i32
      %335 = tpu.dynamic_rotate %19 by %c353_i32 dim 1 : vector<1x384xf32>, i32 -> vector<1x384xf32>
      %c5_153 = arith.constant 5 : index
      %c2_154 = arith.constant 2 : index
      %336 = memref.load %arg5[%c5_153, %c2_154] : memref<7x7xf32, #tpu.memory_space<smem>>
      %337 = vector.broadcast %336 : f32 to vector<1x384xf32>
      %338 = arith.mulf %337, %335 : vector<1x384xf32>
      %c1_i32_155 = arith.constant 1 : i32
      %339 = vector.broadcast %c1_i32_155 : i32 to vector<1x384xi32>
      %340 = arith.cmpi sge, %20, %339 : vector<1x384xi32>
      %cst_156 = arith.constant 0.000000e+00 : f32
      %341 = vector.broadcast %cst_156 : f32 to vector<1x384xf32>
      %342 = arith.select %340, %338, %341 : vector<1x384xi1>, vector<1x384xf32>
      %343 = arith.addf %334, %342 : vector<1x384xf32>
      %c352_i32 = arith.constant 352 : i32
      %344 = tpu.dynamic_rotate %19 by %c352_i32 dim 1 : vector<1x384xf32>, i32 -> vector<1x384xf32>
      %c5_157 = arith.constant 5 : index
      %c3_158 = arith.constant 3 : index
      %345 = memref.load %arg5[%c5_157, %c3_158] : memref<7x7xf32, #tpu.memory_space<smem>>
      %346 = vector.broadcast %345 : f32 to vector<1x384xf32>
      %347 = arith.mulf %346, %344 : vector<1x384xf32>
      %348 = arith.addf %343, %347 : vector<1x384xf32>
      %c351_i32 = arith.constant 351 : i32
      %349 = tpu.dynamic_rotate %19 by %c351_i32 dim 1 : vector<1x384xf32>, i32 -> vector<1x384xf32>
      %c5_159 = arith.constant 5 : index
      %c4_160 = arith.constant 4 : index
      %350 = memref.load %arg5[%c5_159, %c4_160] : memref<7x7xf32, #tpu.memory_space<smem>>
      %351 = vector.broadcast %350 : f32 to vector<1x384xf32>
      %352 = arith.mulf %351, %349 : vector<1x384xf32>
      %c15_i32_161 = arith.constant 15 : i32
      %353 = vector.broadcast %c15_i32_161 : i32 to vector<1x384xi32>
      %354 = arith.cmpi slt, %20, %353 : vector<1x384xi32>
      %cst_162 = arith.constant 0.000000e+00 : f32
      %355 = vector.broadcast %cst_162 : f32 to vector<1x384xf32>
      %356 = arith.select %354, %352, %355 : vector<1x384xi1>, vector<1x384xf32>
      %357 = arith.addf %348, %356 : vector<1x384xf32>
      %c350_i32 = arith.constant 350 : i32
      %358 = tpu.dynamic_rotate %19 by %c350_i32 dim 1 : vector<1x384xf32>, i32 -> vector<1x384xf32>
      %c5_163 = arith.constant 5 : index
      %c5_164 = arith.constant 5 : index
      %359 = memref.load %arg5[%c5_163, %c5_164] : memref<7x7xf32, #tpu.memory_space<smem>>
      %360 = vector.broadcast %359 : f32 to vector<1x384xf32>
      %361 = arith.mulf %360, %358 : vector<1x384xf32>
      %c14_i32_165 = arith.constant 14 : i32
      %362 = vector.broadcast %c14_i32_165 : i32 to vector<1x384xi32>
      %363 = arith.cmpi slt, %20, %362 : vector<1x384xi32>
      %cst_166 = arith.constant 0.000000e+00 : f32
      %364 = vector.broadcast %cst_166 : f32 to vector<1x384xf32>
      %365 = arith.select %363, %361, %364 : vector<1x384xi1>, vector<1x384xf32>
      %366 = arith.addf %357, %365 : vector<1x384xf32>
      %c349_i32 = arith.constant 349 : i32
      %367 = tpu.dynamic_rotate %19 by %c349_i32 dim 1 : vector<1x384xf32>, i32 -> vector<1x384xf32>
      %c5_167 = arith.constant 5 : index
      %c6_168 = arith.constant 6 : index
      %368 = memref.load %arg5[%c5_167, %c6_168] : memref<7x7xf32, #tpu.memory_space<smem>>
      %369 = vector.broadcast %368 : f32 to vector<1x384xf32>
      %370 = arith.mulf %369, %367 : vector<1x384xf32>
      %c13_i32_169 = arith.constant 13 : i32
      %371 = vector.broadcast %c13_i32_169 : i32 to vector<1x384xi32>
      %372 = arith.cmpi slt, %20, %371 : vector<1x384xi32>
      %cst_170 = arith.constant 0.000000e+00 : f32
      %373 = vector.broadcast %cst_170 : f32 to vector<1x384xf32>
      %374 = arith.select %372, %370, %373 : vector<1x384xi1>, vector<1x384xf32>
      %375 = arith.addf %366, %374 : vector<1x384xf32>
      %c339_i32 = arith.constant 339 : i32
      %376 = tpu.dynamic_rotate %19 by %c339_i32 dim 1 : vector<1x384xf32>, i32 -> vector<1x384xf32>
      %c6_171 = arith.constant 6 : index
      %c0_172 = arith.constant 0 : index
      %377 = memref.load %arg5[%c6_171, %c0_172] : memref<7x7xf32, #tpu.memory_space<smem>>
      %378 = vector.broadcast %377 : f32 to vector<1x384xf32>
      %379 = arith.mulf %378, %376 : vector<1x384xf32>
      %c3_i32_173 = arith.constant 3 : i32
      %380 = vector.broadcast %c3_i32_173 : i32 to vector<1x384xi32>
      %381 = arith.cmpi sge, %20, %380 : vector<1x384xi32>
      %cst_174 = arith.constant 0.000000e+00 : f32
      %382 = vector.broadcast %cst_174 : f32 to vector<1x384xf32>
      %383 = arith.select %381, %379, %382 : vector<1x384xi1>, vector<1x384xf32>
      %384 = arith.addf %375, %383 : vector<1x384xf32>
      %c338_i32 = arith.constant 338 : i32
      %385 = tpu.dynamic_rotate %19 by %c338_i32 dim 1 : vector<1x384xf32>, i32 -> vector<1x384xf32>
      %c6_175 = arith.constant 6 : index
      %c1_176 = arith.constant 1 : index
      %386 = memref.load %arg5[%c6_175, %c1_176] : memref<7x7xf32, #tpu.memory_space<smem>>
      %387 = vector.broadcast %386 : f32 to vector<1x384xf32>
      %388 = arith.mulf %387, %385 : vector<1x384xf32>
      %c2_i32_177 = arith.constant 2 : i32
      %389 = vector.broadcast %c2_i32_177 : i32 to vector<1x384xi32>
      %390 = arith.cmpi sge, %20, %389 : vector<1x384xi32>
      %cst_178 = arith.constant 0.000000e+00 : f32
      %391 = vector.broadcast %cst_178 : f32 to vector<1x384xf32>
      %392 = arith.select %390, %388, %391 : vector<1x384xi1>, vector<1x384xf32>
      %393 = arith.addf %384, %392 : vector<1x384xf32>
      %c337_i32 = arith.constant 337 : i32
      %394 = tpu.dynamic_rotate %19 by %c337_i32 dim 1 : vector<1x384xf32>, i32 -> vector<1x384xf32>
      %c6_179 = arith.constant 6 : index
      %c2_180 = arith.constant 2 : index
      %395 = memref.load %arg5[%c6_179, %c2_180] : memref<7x7xf32, #tpu.memory_space<smem>>
      %396 = vector.broadcast %395 : f32 to vector<1x384xf32>
      %397 = arith.mulf %396, %394 : vector<1x384xf32>
      %c1_i32_181 = arith.constant 1 : i32
      %398 = vector.broadcast %c1_i32_181 : i32 to vector<1x384xi32>
      %399 = arith.cmpi sge, %20, %398 : vector<1x384xi32>
      %cst_182 = arith.constant 0.000000e+00 : f32
      %400 = vector.broadcast %cst_182 : f32 to vector<1x384xf32>
      %401 = arith.select %399, %397, %400 : vector<1x384xi1>, vector<1x384xf32>
      %402 = arith.addf %393, %401 : vector<1x384xf32>
      %c336_i32 = arith.constant 336 : i32
      %403 = tpu.dynamic_rotate %19 by %c336_i32 dim 1 : vector<1x384xf32>, i32 -> vector<1x384xf32>
      %c6_183 = arith.constant 6 : index
      %c3_184 = arith.constant 3 : index
      %404 = memref.load %arg5[%c6_183, %c3_184] : memref<7x7xf32, #tpu.memory_space<smem>>
      %405 = vector.broadcast %404 : f32 to vector<1x384xf32>
      %406 = arith.mulf %405, %403 : vector<1x384xf32>
      %407 = arith.addf %402, %406 : vector<1x384xf32>
      %c335_i32 = arith.constant 335 : i32
      %408 = tpu.dynamic_rotate %19 by %c335_i32 dim 1 : vector<1x384xf32>, i32 -> vector<1x384xf32>
      %c6_185 = arith.constant 6 : index
      %c4_186 = arith.constant 4 : index
      %409 = memref.load %arg5[%c6_185, %c4_186] : memref<7x7xf32, #tpu.memory_space<smem>>
      %410 = vector.broadcast %409 : f32 to vector<1x384xf32>
      %411 = arith.mulf %410, %408 : vector<1x384xf32>
      %c15_i32_187 = arith.constant 15 : i32
      %412 = vector.broadcast %c15_i32_187 : i32 to vector<1x384xi32>
      %413 = arith.cmpi slt, %20, %412 : vector<1x384xi32>
      %cst_188 = arith.constant 0.000000e+00 : f32
      %414 = vector.broadcast %cst_188 : f32 to vector<1x384xf32>
      %415 = arith.select %413, %411, %414 : vector<1x384xi1>, vector<1x384xf32>
      %416 = arith.addf %407, %415 : vector<1x384xf32>
      %c334_i32 = arith.constant 334 : i32
      %417 = tpu.dynamic_rotate %19 by %c334_i32 dim 1 : vector<1x384xf32>, i32 -> vector<1x384xf32>
      %c6_189 = arith.constant 6 : index
      %c5_190 = arith.constant 5 : index
      %418 = memref.load %arg5[%c6_189, %c5_190] : memref<7x7xf32, #tpu.memory_space<smem>>
      %419 = vector.broadcast %418 : f32 to vector<1x384xf32>
      %420 = arith.mulf %419, %417 : vector<1x384xf32>
      %c14_i32_191 = arith.constant 14 : i32
      %421 = vector.broadcast %c14_i32_191 : i32 to vector<1x384xi32>
      %422 = arith.cmpi slt, %20, %421 : vector<1x384xi32>
      %cst_192 = arith.constant 0.000000e+00 : f32
      %423 = vector.broadcast %cst_192 : f32 to vector<1x384xf32>
      %424 = arith.select %422, %420, %423 : vector<1x384xi1>, vector<1x384xf32>
      %425 = arith.addf %416, %424 : vector<1x384xf32>
      %c333_i32 = arith.constant 333 : i32
      %426 = tpu.dynamic_rotate %19 by %c333_i32 dim 1 : vector<1x384xf32>, i32 -> vector<1x384xf32>
      %c6_193 = arith.constant 6 : index
      %c6_194 = arith.constant 6 : index
      %427 = memref.load %arg5[%c6_193, %c6_194] : memref<7x7xf32, #tpu.memory_space<smem>>
      %428 = vector.broadcast %427 : f32 to vector<1x384xf32>
      %429 = arith.mulf %428, %426 : vector<1x384xf32>
      %c13_i32_195 = arith.constant 13 : i32
      %430 = vector.broadcast %c13_i32_195 : i32 to vector<1x384xi32>
      %431 = arith.cmpi slt, %20, %430 : vector<1x384xi32>
      %cst_196 = arith.constant 0.000000e+00 : f32
      %432 = vector.broadcast %cst_196 : f32 to vector<1x384xf32>
      %433 = arith.select %431, %429, %432 : vector<1x384xi1>, vector<1x384xf32>
      %434 = arith.addf %425, %433 : vector<1x384xf32>
      %cst_197 = arith.constant 0.000000e+00 : f32
      %435 = vector.broadcast %cst_197 : f32 to vector<1x384xf32>
      %436 = arith.subf %435, %434 : vector<1x384xf32>
      %437 = math.exp %436 : vector<1x384xf32>
      %cst_198 = arith.constant 1.000000e+00 : f32
      %438 = vector.broadcast %cst_198 : f32 to vector<1x384xf32>
      %439 = arith.addf %438, %437 : vector<1x384xf32>
      %cst_199 = arith.constant 1.000000e+00 : f32
      %440 = vector.broadcast %cst_199 : f32 to vector<1x384xf32>
      %441 = arith.divf %440, %439 : vector<1x384xf32>
      %c0_200 = arith.constant 0 : index
      %c0_201 = arith.constant 0 : index
      %442 = vector.load %arg9[%c0_200, %c0_201] : memref<1x384xf32, #tpu.memory_space<vmem>>, vector<1x384xf32>
      tpu.vector_store %arg9[%c0_200, %c0_201], %441 {strides = array<i32>} : memref<1x384xf32, #tpu.memory_space<vmem>>, vector<1x384xf32>,
    } else {
    }
    %c0 = arith.constant 0 : index
    %c0_1 = arith.constant 0 : index
    %3 = vector.load %arg9[%c0, %c0_1] : memref<1x384xf32, #tpu.memory_space<vmem>>, vector<1x256xf32>
    %4 = vector.shape_cast %3 : vector<1x256xf32> to vector<1x1x256xf32>
    %c0_2 = arith.constant 0 : index
    %c0_3 = arith.constant 0 : index
    %c0_4 = arith.constant 0 : index
    %5 = vector.load %arg7[%c0_2, %c0_3, %c0_4] : memref<1x4x256xf32, #tpu.memory_space<vmem>>, vector<1x4x256xf32>
    %6 = vector.broadcast %4 : vector<1x1x256xf32> to vector<1x4x256xf32>
    %7 = arith.mulf %5, %6 : vector<1x4x256xf32>
    %c0_5 = arith.constant 0 : index
    %c0_6 = arith.constant 0 : index
    %c0_7 = arith.constant 0 : index
    %8 = vector.load %arg8[%c0_5, %c0_6, %c0_7] : memref<1x4x256xf32, #tpu.memory_space<vmem>>, vector<1x4x256xf32>
    tpu.vector_store %arg8[%c0_5, %c0_6, %c0_7], %7 {strides = array<i32>} : memref<1x4x256xf32, #tpu.memory_space<vmem>>, vector<1x4x256xf32>,
    return
  }
  func.func @transform_0(%arg0: i32, %arg1: i32) -> (i32, i32) {
    %c0_i32 = arith.constant 0 : i32
    %c0_i32_0 = arith.constant 0 : i32
    %c0_i32_1 = arith.constant 0 : i32
    return %c0_i32, %c0_i32_0 : i32, i32
  }
  func.func @transform_1(%arg0: i32, %arg1: i32) -> (i32, i32, i32) {
    %c0_i32 = arith.constant 0 : i32
    %c0_i32_0 = arith.constant 0 : i32
    %c0_i32_1 = arith.constant 0 : i32
    return %arg0, %c0_i32, %c0_i32_0 : i32, i32, i32
  }
  func.func @transform_2(%arg0: i32, %arg1: i32) -> i32 {
    %c0_i32 = arith.constant 0 : i32
    %c0_i32_0 = arith.constant 0 : i32
    return %c0_i32 : i32
  }
  func.func @transform_3(%arg0: i32, %arg1: i32) -> (i32, i32) {
    %c0_i32 = arith.constant 0 : i32
    %c0_i32_0 = arith.constant 0 : i32
    %c0_i32_1 = arith.constant 0 : i32
    return %c0_i32, %c0_i32_0 : i32, i32
  }
  func.func @transform_4(%arg0: i32, %arg1: i32) -> i32 {
    %c0_i32 = arith.constant 0 : i32
    %c0_i32_0 = arith.constant 0 : i32
    return %c0_i32 : i32
  }
  func.func @transform_5(%arg0: i32, %arg1: i32) -> (i32, i32, i32) {
    %c0_i32 = arith.constant 0 : i32
    %c0_i32_0 = arith.constant 0 : i32
    return %arg0, %arg1, %c0_i32 : i32, i32, i32
  }
  func.func @transform_6(%arg0: i32, %arg1: i32) -> (i32, i32, i32) {
    %c0_i32 = arith.constant 0 : i32
    %c0_i32_0 = arith.constant 0 : i32
    return %arg0, %arg1, %c0_i32 : i32, i32, i32
  }
}

</mosaic_0001>

<bundles_post_ra>
// kernel: spatial_ebam.2
= control target key start
LH: loop header
LB: loop body
LE: loop exit
PB: predicated region body
PF: predicated region fallthrough
CT: control target
= control target key end

     0   :  { %s724_s9 = smov 0   ;;  %s726_s10 = smov 0   ;;  %s1043_s0 = inlined_call_operand.vmem [shape: f32[2,4,16,16], index: 0, kind: input, shape index: {}]   ;;  %s1044_s1 = inlined_call_operand.vmem [shape: f32[2,16,16], index: 1, kind: output, shape index: {0}]   ;;  %s1045_s2 = inlined_call_operand.vmem [shape: f32[2,1,8,128], index: 2, kind: output, shape index: {1}]  }
   0x1   :  { %s728_s11 = smov 0  }
   0x2 LB: > { %s25_s12 = sadd.s32 1, %s703_s10  ;;  %p601_p0 = scmp.ge.s32.totalorder %s707_s11, 1  ;;  %s707_s11 = sphi %s728_s11, %s13_s11   ;;  %s703_s10 = sphi %s726_s10, %s1069_s10   ;;  %s699_s9 = sphi %s724_s9, %s1068_s9  }
   0x3   : > { %p27_p1 = scmp.ge.s32.totalorder %s25_s12, 2  ;;  %p138_p2 = scmp.lt.s32.totalorder %s707_s11, 3 }
   0x5   : > { %s1071_s12 = smov (%p27_p1, %s25_s12), 0  ;;  %p139_p3 = pnand %p601_p0, %p138_p2 }
   0x6   : > { %p176_p4 = scmp.lt.s32.totalorder (!%p139_p3), %s699_s9, 1 }
   0x7   : > { %142 = sbr.rel (%p139_p3) target bundleno = 498 (0x1f2), region = 24 }
   0xc   : > { %s1073_s9 = smov (!%p176_p4, %s699_s9), 1  ;;  %vm210_vm0 = vcmask 130048  }
   0xd   : > { %s609_s13 = sshll.u32 %s1073_s9, 6  ;;  %s610_s17 = sshll.u32 %s1073_s9, 4 }
   0xe   : > { %s183_s16 = scalar_lea.vmem %s1043_s0, %s609_s13  ;;  %s193_s20 = scalar_lea.vmem %s1044_s1, %s610_s17 }
   0xf   : > { %v206_v0 = vld [vmem:[%s183_s16 + $0x20] sm:$0xff]  ;;  %v204_v1 = vld [vmem:[%s183_s16 + $0x10] sm:$0xff]  ;;  %v207_v6 = vld [vmem:[%s183_s16 + $0x28] sm:$0xff]  ;;  %s606_s21 = sshll.u32 %s1073_s9, 3 }
  0x10   : > { %v202_v2 = vld [vmem:[%s183_s16] sm:$0xff]  ;;  %v223_v3 = vsel %vm210_vm0, %v206_v0, -inf  ;;  %v217_v4 = vsel %vm210_vm0, %v204_v1, -inf  ;;  %v205_v7 = vld [vmem:[%s183_s16 + $0x18] sm:$0xff]  ;;  %v203_v8 = vld [vmem:[%s183_s16 + $0x8] sm:$0xff]  ;;  %v226_v9 = vsel %vm210_vm0, %v207_v6, -inf  ;;  %s201_s24 = scalar_lea.vmem %s1045_s2, %s606_s21 }
  0x11   : > { %v211_v5 = vsel %vm210_vm0, %v202_v2, -inf  ;;  %224 = vmax.xlane.f32.xlu2 %v223_v3  ;;  %218 = vmax.xlane.f32.xlu1 %v217_v4  ;;  %v220_v10 = vsel %vm210_vm0, %v205_v7, -inf  ;;  %v214_v11 = vsel %vm210_vm0, %v203_v8, -inf  ;;  %v209_v12 = vld [vmem:[%s183_s16 + $0x38] sm:$0xff]  ;;  %v208_v13 = vld [vmem:[%s183_s16 + $0x30] sm:$0xff] }
  0x12   : > { %212 = vmax.xlane.f32.xlu0 %v211_v5  ;;  %v232_v14 = vsel %vm210_vm0, %v209_v12, -inf  ;;  %v229_v15 = vsel %vm210_vm0, %v208_v13, -inf }
  0x19   : > { %227 = vmax.xlane.f32.xlu2 %v226_v9  ;;  %221 = vmax.xlane.f32.xlu1 %v220_v10 }
  0x1a   : > { %215 = vmax.xlane.f32.xlu0 %v214_v11 }
  0x21   : > { %233 = vmax.xlane.f32.xlu1 %v232_v14 }
  0x22   : > { %230 = vmax.xlane.f32.xlu0 %v229_v15 }
  0x84   : > { %v225_v16 = vpop.xlane.xlu2 %224  ;;  %v219_v17 = vpop.xlane.xlu1 %218 }
  0x85   : > { %v756_v18 = vsub.f32 %v204_v1, %v219_v17  ;;  %v213_v19 = vpop.xlane.xlu0 %212  ;;  %v775_v34 = vsub.f32 %v206_v0, %v225_v16 }
  0x86   : > { %v758_v20 = vsub.f32 %v202_v2, %v213_v19 }
  0x87   : > { %v247_v21 = vmul.f32 1.442695, %v756_v18  ;;  %v251_v38 = vmul.f32 1.442695, %v775_v34 }
  0x88   : > { %v243_v22 = vmul.f32 1.442695, %v758_v20 }
  0x89   : > { %637 = vpow2.f32 %v247_v21 }
  0x8a   : > { %639 = vpow2.f32 %v243_v22 }
  0x8c   : > { %v228_v23 = vpop.xlane.xlu2 %227  ;;  %v222_v24 = vpop.xlane.xlu1 %221 }
  0x8d   : > { %v762_v25 = vsub.f32 %v207_v6, %v228_v23  ;;  %v764_v26 = vsub.f32 %v205_v7, %v222_v24  ;;  %v216_v27 = vpop.xlane.xlu0 %215 }
  0x8e   : > { %v766_v28 = vsub.f32 %v203_v8, %v216_v27 }
  0x8f   : > { %v253_v29 = vmul.f32 1.442695, %v762_v25  ;;  %v249_v30 = vmul.f32 1.442695, %v764_v26  ;;  %v770_v31 = vpop.eup %637 }
  0x90   : > { %v245_v32 = vmul.f32 1.442695, %v766_v28  ;;  %v773_v33 = vpop.eup %639  ;;  %v265_v35 = vsel %vm210_vm0, %v770_v31, 0.0 }
  0x91   : > { %641 = vpow2.f32 %v253_v29  ;;  %266 = vadd.xlane.f32.xlu1 %v265_v35  ;;  %v259_v36 = vsel %vm210_vm0, %v773_v33, 0.0 }
  0x92   : > { %643 = vpow2.f32 %v249_v30  ;;  %260 = vadd.xlane.f32.xlu2 %v259_v36 }
  0x93   : > { %645 = vpow2.f32 %v245_v32 }
  0x94   : > { %v234_v37 = vpop.xlane.xlu1 %233  ;;  %647 = vpow2.f32 %v251_v38 }
  0x95   : > { %v231_v39 = vpop.xlane.xlu0 %230  ;;  %v786_v42 = vsub.f32 %v209_v12, %v234_v37 }
  0x96   : > { %v782_v40 = vsub.f32 %v208_v13, %v231_v39 }
  0x97   : > { %v784_v41 = vpop.eup %641  ;;  %v257_v49 = vmul.f32 1.442695, %v786_v42 }
  0x98   : > { %v788_v43 = vpop.eup %643  ;;  %v255_v44 = vmul.f32 1.442695, %v782_v40  ;;  %v274_v45 = vsel %vm210_vm0, %v784_v41, 0.0 }
  0x99   : > { %v793_v46 = vpop.eup %645  ;;  %v268_v47 = vsel %vm210_vm0, %v788_v43, 0.0  ;;  %275 = vadd.xlane.f32.xlu1 %v274_v45 }
  0x9a   : > { %649 = vpow2.f32 %v255_v44  ;;  %v262_v48 = vsel %vm210_vm0, %v793_v46, 0.0  ;;  %269 = vadd.xlane.f32.xlu2 %v268_v47  ;;  %v800_v50 = vpop.eup %647 }
  0x9b   : > { %263 = vadd.xlane.f32.xlu0 %v262_v48  ;;  %651 = vpow2.f32 %v257_v49  ;;  %v271_v53 = vsel %vm210_vm0, %v800_v50, 0.0 }
  0xa0   : > { %v802_v51 = vpop.eup %649 }
  0xa1   : > { %v277_v52 = vsel %vm210_vm0, %v802_v51, 0.0  ;;  %v808_v54 = vpop.eup %651 }
  0xa2   : > { %278 = vadd.xlane.f32.xlu2 %v277_v52  ;;  %v280_v55 = vsel %vm210_vm0, %v808_v54, 0.0 }
  0xa3   : > { %272 = vadd.xlane.f32.xlu0 %v271_v53 }
  0xab   : > { %281 = vadd.xlane.f32.xlu0 %v280_v55 }
 0x104   : > { %v267_v56 = vpop.xlane.xlu1 %266 }
 0x105   : > { %653 = vrcp.f32 %v267_v56  ;;  %v261_v57 = vpop.xlane.xlu2 %260  ;;  %v322_v59 = vand.u32 2147483647, %v267_v56  ;;  %v324_v61 = vand.u32 2147483648, %v267_v56  ;;  %vm318_vm1 = vweird.f32 %v267_v56 }
 0x106   : > { %655 = vrcp.f32 %v261_v57  ;;  %v292_v0 = vand.u32 2147483647, %v261_v57  ;;  %v294_v1 = vand.u32 2147483648, %v261_v57  ;;  %vm288_vm3 = vweird.f32 %v261_v57 }
 0x107   : > { %657 = vlog2.f32 %v267_v56  ;;  %vm825_vm2 = vcmp.eq.f32.partialorder %v322_v59, 8.507059e+37  ;;  %v325_v9 = vor.u32 1.1754944e-38, %v324_v61 }
 0x108   : > { %659 = vlog2.f32 %v261_v57  ;;  %vm835_vm5 = vcmp.eq.f32.partialorder %v292_v0, 8.507059e+37  ;;  %v295_v14 = vor.u32 1.1754944e-38, %v294_v1 }
 0x10b   : > { %v812_v58 = vpop.eup %653 }
 0x10c   : > { %v314_v60 = vmul.f32 %v812_v58, %v267_v56  ;;  %v815_v62 = vpop.xlane.xlu1 %275  ;;  %v817_v63 = vpop.eup %655  ;;  %vm319_vm4 = vweird.f32 %v812_v58 }
 0x10d   : > { %661 = vrcp.f32 %v815_v62  ;;  %v820_v2 = vpop.xlane.xlu2 %269  ;;  %v658_v4 = vpop.eup %657  ;;  %v284_v6 = vmul.f32 %v817_v63, %v261_v57  ;;  %v369_v17 = vand.u32 2147483648, %v815_v62  ;;  %vm289_vm6 = vweird.f32 %v817_v63  ;;  %vm851_vm8 = vmor %vm318_vm1, %vm319_vm4 }
 0x10e   : > { %v822_v3 = vpop.xlane.xlu0 %263  ;;  %v315_v5 = vsub.f32 1.0, %v314_v60  ;;  %663 = vlog2.f32 %v815_v62  ;;  %v660_v11 = vpop.eup %659  ;;  %v833_v12 = vmul.f32 0.6931472, %v658_v4  ;;  %vm363_vm7 = vweird.f32 %v815_v62  ;;  %vm876_vm10 = vmor %vm288_vm3, %vm289_vm6 }
 0x10f   : > { %v285_v10 = vsub.f32 1.0, %v284_v6  ;;  %665 = vrcp.f32 %v820_v2  ;;  %v367_v21 = vand.u32 2147483647, %v815_v62  ;;  %v339_v22 = vand.u32 2147483648, %v820_v2 }
 0x110   : > { %v316_v8 = vmul.f32 %v812_v58, %v315_v5  ;;  %667 = vrcp.f32 %v822_v3  ;;  %v856_v27 = vmul.f32 0.6931472, %v660_v11  ;;  %v309_v30 = vand.u32 2147483648, %v822_v3 }
 0x111   : > { %v286_v16 = vmul.f32 %v817_v63, %v285_v10  ;;  %669 = vlog2.f32 %v820_v2  ;;  %vm333_vm9 = vweird.f32 %v820_v2  ;;  %v307_v36 = vand.u32 2147483647, %v822_v3 }
 0x112   : > { %v317_v15 = vadd.f32 %v812_v58, %v316_v8  ;;  %671 = vlog2.f32 %v822_v3  ;;  %v880_v47 = vor.u32 1.1754944e-38, %v369_v17  ;;  %v337_v48 = vand.u32 2147483647, %v820_v2 }
 0x113   : > { %v843_v19 = vpop.eup %661  ;;  %v287_v24 = vadd.f32 %v817_v63, %v286_v16  ;;  %v340_v53 = vor.u32 1.1754944e-38, %v339_v22  ;;  %vm303_vm11 = vweird.f32 %v822_v3  ;;  %vm899_vm13 = vcmp.eq.f32.partialorder %v307_v36, 8.507059e+37 }
 0x114   : > { %v359_v29 = vmul.f32 %v843_v19, %v815_v62  ;;  %v664_v32 = vpop.eup %663  ;;  %v321_v35 = vsel %vm851_vm8, %v812_v58, %v317_v15  ;;  %vm364_vm12 = vweird.f32 %v843_v19  ;;  %v310_v58 = vor.u32 1.1754944e-38, %v309_v30 }
 0x115   : > { %v867_v37 = vpop.xlane.xlu2 %278  ;;  %v871_v39 = vpop.eup %665  ;;  %v291_v49 = vsel %vm876_vm10, %v817_v63, %v287_v24  ;;  %v892_v56 = vsel %vm825_vm2, %v325_v9, %v321_v35  ;;  %v896_v60 = vmul.f32 0.6931472, %v664_v32  ;;  %v419_v1 = vsub.f32 %v758_v20, %v856_v27  ;;  %vm934_vm4 = vmor %vm363_vm7, %vm364_vm12 }
 0x116   : > { %v869_v38 = vpop.xlane.xlu0 %272  ;;  %v360_v45 = vsub.f32 1.0, %v359_v29  ;;  %673 = vrcp.f32 %v867_v37  ;;  %v329_v52 = vmul.f32 %v871_v39, %v820_v2  ;;  %v668_v55 = vpop.eup %667  ;;  %v296_v4 = vsel %vm835_vm5, %v295_v14, %v291_v49 }
 0x117   : > { %v670_v59 = vpop.eup %669  ;;  %v299_v63 = vmul.f32 %v668_v55, %v822_v3  ;;  %vm907_vm14 = vcmp.eq.f32.partialorder %v367_v21, 8.507059e+37  ;;  %vm334_vm15 = vweird.f32 %v871_v39  ;;  %vm912_vm1 = vcmp.eq.f32.partialorder %v337_v48, 8.507059e+37 }
 0x118   : > { %v361_v57 = vmul.f32 %v843_v19, %v360_v45  ;;  %v330_v61 = vsub.f32 1.0, %v329_v52  ;;  %v382_v7 = vand.u32 2147483647, %v867_v37  ;;  %675 = vlog2.f32 %v867_v37  ;;  %v672_v8 = vpop.eup %671  ;;  %vm945_vm5 = vmor %vm333_vm9, %vm334_vm15 }
 0x119   : > { %v300_v10 = vsub.f32 1.0, %v299_v63  ;;  %v384_v11 = vand.u32 2147483648, %v867_v37  ;;  %677 = vrcp.f32 %v869_v38  ;;  %v922_v15 = vmul.f32 0.6931472, %v670_v59 }
 0x11a   : > { %v331_v9 = vmul.f32 %v871_v39, %v330_v61  ;;  %v362_v14 = vadd.f32 %v843_v19, %v361_v57  ;;  %vm304_vm2 = vweird.f32 %v668_v55  ;;  %vm378_vm3 = vweird.f32 %v867_v37 }
 0x11b   : > { %v301_v17 = vmul.f32 %v668_v55, %v300_v10  ;;  %679 = vlog2.f32 %v869_v38  ;;  %v406_v24 = vmul.f32 0.6931472, %v672_v8  ;;  %v352_v29 = vand.u32 2147483647, %v869_v38  ;;  %vm305_vm7 = vmor %vm303_vm11, %vm304_vm2 }
 0x11c   : > { %v674_v13 = vpop.eup %673  ;;  %v332_v16 = vadd.f32 %v871_v39, %v331_v9  ;;  %v354_v30 = vand.u32 2147483648, %v869_v38  ;;  %vm949_vm6 = vcmp.eq.f32.partialorder %v382_v7, 8.507059e+37  ;;  %v385_v44 = vor.u32 1.1754944e-38, %v384_v11 }
 0x11d   : > { %v374_v21 = vmul.f32 %v674_v13, %v867_v37  ;;  %v302_v62 = vadd.f32 %v668_v55, %v301_v17  ;;  %vm348_vm8 = vweird.f32 %v869_v38  ;;  %v366_v52 = vsel %vm934_vm4, %v843_v19, %v362_v14 }
 0x11e   : > { %v928_v22 = vpop.xlane.xlu0 %281  ;;  %v676_v45 = vpop.eup %675  ;;  %v336_v48 = vsel %vm945_vm5, %v871_v39, %v332_v16  ;;  %vm379_vm9 = vweird.f32 %v674_v13  ;;  %vm968_vm10 = vcmp.eq.f32.partialorder %v352_v29, 8.507059e+37  ;;  %v355_v63 = vor.u32 1.1754944e-38, %v354_v30 }
 0x11f   : > { %681 = vrcp.f32 %v928_v22  ;;  %v375_v35 = vsub.f32 1.0, %v374_v21  ;;  %v399_v2 = vand.u32 2147483648, %v928_v22  ;;  %v678_v49 = vpop.eup %677  ;;  %v306_v57 = vsel %vm305_vm7, %v668_v55, %v302_v62  ;;  %vm380_vm12 = vmor %vm378_vm3, %vm379_vm9 }
 0x120   : > { %683 = vlog2.f32 %v928_v22  ;;  %v311_v39 = vsel %vm899_vm13, %v310_v58, %v306_v57  ;;  %v344_v3 = vmul.f32 %v678_v49, %v869_v38  ;;  %v397_v7 = vand.u32 2147483647, %v928_v22 }
 0x121   : > { %v376_v59 = vmul.f32 %v674_v13, %v375_v35  ;;  %v680_v8 = vpop.eup %679  ;;  %v341_v9 = vsel %vm912_vm1, %v340_v53, %v336_v48  ;;  %v416_v55 = vmul.f32 0.6931472, %v676_v45  ;;  %vm393_vm11 = vweird.f32 %v928_v22 }
 0x122   : > { %v297_v0 = vmul.f32 %v773_v33, %v296_v4  ;;  %v345_v10 = vsub.f32 1.0, %v344_v3  ;;  %vm349_vm13 = vweird.f32 %v678_v49  ;;  %v400_v11 = vor.u32 1.1754944e-38, %v399_v2 }
 0x123   : > { %v377_v19 = vadd.f32 %v674_v13, %v376_v59  ;;  %v312_v14 = vmul.f32 %v793_v46, %v311_v39  ;;  %v327_v53 = vmul.f32 %v770_v31, %v892_v56  ;;  %v371_v6 = vsel %vm907_vm14, %v880_v47, %v366_v52  ;;  %vm350_vm14 = vmor %vm348_vm8, %vm349_vm13 }
 0x124   : > { %v346_v4 = vmul.f32 %v678_v49, %v345_v10  ;;  %v412_v21 = vmul.f32 0.6931472, %v680_v8  ;;  %v342_v37 = vmul.f32 %v788_v43, %v341_v9  ;;  %v420_v23 = vsub.f32 %v766_v28, %v406_v24 }
 0x125   : > { %v682_v58 = vpop.eup %681  ;;  %v381_v16 = vsel %vm380_vm12, %v674_v13, %v377_v19  ;;  %v421_v29 = vsub.f32 %v756_v18, %v833_v12  ;;  %v372_v56 = vmul.f32 %v784_v41, %v371_v6  ;;  %v422_v47 = vsub.f32 %v764_v26, %v922_v15 }
 0x126   : > { %v389_v17 = vmul.f32 %v682_v58, %v928_v22  ;;  %v684_v33 = vpop.eup %683  ;;  %v386_v46 = vsel %vm949_vm6, %v385_v44, %v381_v16  ;;  %vm394_vm15 = vweird.f32 %v682_v58  ;;  %v347_v31 = vadd.f32 %v678_v49, %v346_v4 }
 0x127   : > { %v427_v43 = vmul.f32 %v419_v1, %v297_v0  ;;  %v418_v5 = vmul.f32 0.6931472, %v684_v33  ;;  %v428_v24 = vmul.f32 %v420_v23, %v312_v14  ;;  %v429_v30 = vmul.f32 %v421_v29, %v327_v53  ;;  %vm395_vm1 = vmor %vm393_vm11, %vm394_vm15 }
 0x128   : > { %v390_v13 = vsub.f32 1.0, %v389_v17  ;;  %v351_v32 = vsel %vm350_vm14, %v678_v49, %v347_v31  ;;  %v387_v18 = vmul.f32 %v802_v51, %v386_v46  ;;  %v423_v41 = vsub.f32 %v775_v34, %v412_v21 }
 0x129   : > { %v430_v12 = vmul.f32 %v422_v47, %v342_v37  ;;  %v356_v26 = vsel %vm968_vm10, %v355_v63, %v351_v32  ;;  %v424_v20 = vsub.f32 %v762_v25, %v896_v60  ;;  %v425_v27 = vsub.f32 %v782_v40, %v416_v55 }
 0x12a   : > { %v391_v28 = vmul.f32 %v682_v58, %v390_v13  ;;  %v357_v38 = vmul.f32 %v800_v50, %v356_v26  ;;  %v435_v51 = vsel %vm210_vm0, %v427_v43, 0.0  ;;  %v436_v34 = vsel %vm210_vm0, %v429_v30, 0.0 }
 0x12b   : > { %v442_v1 = vsel %vm210_vm0, %v428_v24, 0.0  ;;  %vm398_vm2 = vcmp.eq.f32.partialorder %v397_v7, 8.507059e+37  ;;  %v432_v35 = vmul.f32 %v424_v20, %v372_v56  ;;  %v443_v25 = vsel %vm210_vm0, %v430_v12, 0.0 }
 0x12c   : > { %v392_v62 = vadd.f32 %v682_v58, %v391_v28  ;;  %v431_v40 = vmul.f32 %v423_v41, %v357_v38  ;;  %v433_v36 = vmul.f32 %v425_v27, %v387_v18  ;;  %v444_v44 = vadd.f32 %v443_v25, %v442_v1 }
 0x12d   : > { %v426_v50 = vsub.f32 %v786_v42, %v418_v5  ;;  %v437_v45 = vadd.f32 %v436_v34, %v435_v51  ;;  %v445_v52 = vsel %vm210_vm0, %v432_v35, 0.0 }
 0x12e   : > { %v396_v15 = vsel %vm395_vm1, %v682_v58, %v392_v62  ;;  %v438_v48 = vsel %vm210_vm0, %v431_v40, 0.0  ;;  %v440_v57 = vsel %vm210_vm0, %v433_v36, 0.0  ;;  %v446_v59 = vadd.f32 %v445_v52, %v444_v44 }
 0x12f   : > { %v401_v60 = vsel %vm398_vm2, %v400_v11, %v396_v15  ;;  %v439_v49 = vadd.f32 %v438_v48, %v437_v45 }
 0x130   : > { %v402_v22 = vmul.f32 %v808_v54, %v401_v60 }
 0x131   : > { %v441_v39 = vadd.f32 %v440_v57, %v439_v49 }
 0x132   : > { %v434_v2 = vmul.f32 %v426_v50, %v402_v22 }
 0x133   : > { %v449_v63 = vsub.f32 0.0, %v441_v39 }
 0x134   : > { %v447_v3 = vsel %vm210_vm0, %v434_v2, 0.0 }
 0x135   : > { %v448_v61 = vadd.f32 %v447_v3, %v446_v59  ;;  %v451_v54 = vmul.f32 1.442695, %v449_v63 }
 0x137   : > { %v450_v42 = vsub.f32 0.0, %v448_v61  ;;  %453 = vst.msk [vmem:[%s193_s20] sm:$0xff] %vm210_vm0, %v451_v54  ;;  %v455_v8 = vsel %vm210_vm0, %v451_v54, -inf }
 0x139   : > { %v452_v7 = vmul.f32 1.442695, %v450_v42 }
 0x13b   : > { %v456_v9 = vsel %vm210_vm0, %v452_v7, -inf  ;;  %454 = vst.msk [vmem:[%s193_s20 + $0x8] sm:$0xff] %vm210_vm0, %v452_v7 }
 0x13c   : > { %v457_v19 = vmax.f32 %v455_v8, %v456_v9 }
 0x13e   : > { %458 = vmax.xlane.f32.xlu1 %v457_v19 }
 0x1b1   : > { %v459_v55 = vpop.xlane.xlu1 %458 }
 0x1b2   : > { %v460_v0 = vrot.slane %v459_v55, 4 }
 0x1b4   : > { %v461_v58 = vmax.f32 %v459_v55, %v460_v0 }
 0x1b6   : > { %v462_v10 = vrot.slane %v461_v58, 2 }
 0x1b8   : > { %v463_v11 = vmax.f32 %v461_v58, %v462_v10 }
 0x1ba   : > { %v464_v14 = vrot.slane %v463_v11, 1 }
 0x1bc   : > { %v465_v16 = vmax.f32 %v463_v11, %v464_v14 }
 0x1be   : > { %611 = vpush %v465_v16 }
 0x1ef   : > { %s612_s25 = spop %611 }
 0x1f0   : > { %v467_v17 = vstv %s612_s25 }
 0x1f1   : > { %468 = vst [vmem:[%s201_s24] sm:$0xff] %v467_v17 }
 0x1f2 PF: > { %s13_s11 = sadd.s32 1, %s707_s11   ;;  %s1068_s9 = smov %s703_s10 }
 0x1f3   : > { %p10_p5 = scmp.ge.s32.totalorder %s13_s11, 4   ;;  %s1069_s10 = smov %s1071_s12 }
 0x1f5   :  { %12 = sbr.rel (!%p10_p5) target bundleno = 2 (0x2), region = 66 }

// kernel: spatial_ebam.3
= control target key start
LH: loop header
LB: loop body
LE: loop exit
PB: predicated region body
PF: predicated region fallthrough
CT: control target
= control target key end

     0   :  { %s2698_s0 = inlined_call_operand.vmem [shape: s32[1,384], index: 0, kind: input, shape index: {}]   ;;  %s2699_s1 = inlined_call_operand.vmem [shape: f32[2,1,256], index: 1, kind: input, shape index: {}]   ;;  %s2700_s2 = inlined_call_operand.<no memory space> [shape: f32[1], index: 2, kind: input, shape index: {}]   ;;  %s2701_s3 = inlined_call_operand.vmem [shape: f32[7,7], index: 3, kind: input, shape index: {}]   ;;  %s2702_s4 = inlined_call_operand.<no memory space> [shape: f32[1], index: 4, kind: input, shape index: {}]   ;;  %s2703_s5 = inlined_call_operand.vmem [shape: f32[2,4,256], index: 5, kind: input, shape index: {}]   ;;  %s2704_s6 = inlined_call_operand.vmem [shape: f32[2,4,256], index: 6, kind: output, shape index: {}]  }
   0x1   :  { %11 = sst [smem:[#allocation3]] %s2700_s2 }
   0x2   :  { %12 = sst [smem:[#allocation4]] %s2702_s4 }
   0x3   :  { %13 = vsyncpa [#allocation6], 0  ;;  %s1994_s25 = smov 0   ;;  %s1996_s26 = smov 0  }
   0x4   :  { %s1998_s27 = smov 0  }
   0x5 LB: > { %s1707_s2 = sadd.s32 4294967295, %s1901_s27   ;;  %s31_s4 = sadd.s32 1, %s1897_s26  ;;  %s1901_s27 = sphi %s1998_s27, %s19_s27   ;;  %s1897_s26 = sphi %s1996_s26, %s2706_s26   ;;  %s1893_s25 = sphi %s1994_s25, %s2705_s25  }
   0x6   : > { %p33_p0 = scmp.ge.s32.totalorder %s31_s4, 2  ;;  %p1709_p1 = scmp.ge.s32.totalorder %s1901_s27, 1 }
   0x7   : > { %p202_p2 = scmp.lt.s32.totalorder %s1901_s27, 3  ;;  %p1779_p4 = scmp.eq.s32.totalorder %s1707_s2, 0 }
   0x8   : > { %s2708_s4 = smov (%p33_p0, %s31_s4), 0  ;;  %s220_s30 = sshll.u32 %s2701_s3, 4  ;;  %s221_s30 = int_to_ptr.vmem [resolvable:$true] %s220_s30 }
   0x9   : > { %p203_p3 = pnand %p1709_p1, %p202_p2  ;;  %s1903_s7 = smov [#allocation5]  }
   0xb   : > { %p1775_p5 = pneg %p203_p3  ;;  %255 = sbr.rel (%p203_p3) target bundleno = 587 (0x24b), region = 44 }
   0xd   : > { %p1776_p6 = pnand %p1779_p4, %p1775_p5 }
   0xf   : > { %1778 = dma.vmem_to_smem (!%p1776_p6), %s221_s30, 128, %s1903_s7, [#allocation6]  }
  0x10   : > { %1888 = dma.done.wait (%p1779_p4), [#allocation6], 128  }
  0x11   : > { %1890 = vsyncadd (%p1779_p4), [#allocation6], 4294967168 }
  0x12   : > { %262 = sfence }
  0x13   : > { %p299_p7 = scmp.lt.s32.totalorder %s1893_s25, 1  ;;  %v325_v0 = vlaneseq  ;;  %s331_s8 = sld [smem:[#allocation3]]  ;;  %v1904_v1 = vmov 0.0   ;;  %v2106_v29 = vld [vmem:[%s2698_s0] sm:$0x7]  ;;  %vm372_vm4 = vcmask 1040384  }
  0x14   : > { %s1905_s13 = smov 51   ;;  %s1906_s14 = smov 50   ;;  %vm374_vm5 = vcmask 1041408   ;;  %vm366_vm6 = vcmp.ge.s32.totalorder %v2106_v29, 3  ;;  %vm394_vm8 = vcmp.ge.s32.totalorder %v2106_v29, 2  ;;  %vm420_vm9 = vcmp.ge.s32.totalorder %v2106_v29, 1 }
  0x15   : > { %s2710_s25 = smov (!%p299_p7, %s1893_s25), 1  ;;  %vm327_vm0 = vcmp.lt.s32.totalorder %v325_v0, 128  ;;  %vm335_vm1 = vcmp.lt.s32.totalorder %v325_v0, 256  ;;  %s1907_s15 = smov 49   ;;  %v2067_v11 = vand.u32 127, %v325_v0  ;;  %vm470_vm12 = vcmp.lt.s32.totalorder %v2106_v29, 15 }
  0x16   : > { %329 = vst.msk [vmem:[#allocation2 + $0x2] sm:$0x1] %vm327_vm0, %v1904_v1  ;;  %s1714_s9 = sshll.u32 %s2710_s25, 1  ;;  %s1908_s16 = smov 48   ;;  %vm496_vm14 = vcmp.lt.s32.totalorder %v2106_v29, 14  ;;  %vm522_vm0 = vcmp.lt.s32.totalorder %v2106_v29, 13 }
  0x17   : > { %s302_s12 = scalar_lea.vmem %s2699_s1, %s1714_s9  ;;  %s1909_s17 = smov 47   ;;  %vm385_vm2 = vcmp.lt.s32.totalorder %v2067_v11, 50  ;;  %vm357_vm3 = vcmp.lt.s32.totalorder %v2067_v11, 51  ;;  %vm411_vm7 = vcmp.lt.s32.totalorder %v2067_v11, 49  ;;  %vm437_vm10 = vcmp.lt.s32.totalorder %v2067_v11, 48 }
  0x18   : > { %v330_v2 = vld [vmem:[%s302_s12] sm:$0x3]  ;;  %s1910_s18 = smov 46   ;;  %s1911_s19 = smov 45   ;;  %vm461_vm11 = vcmp.lt.s32.totalorder %v2067_v11, 47  ;;  %vm487_vm13 = vcmp.lt.s32.totalorder %v2067_v11, 46 }
  0x19   : > { %v332_v3 = vstv %s331_s8  ;;  %s1912_s20 = smov 35   ;;  %s1913_s21 = smov 34   ;;  %vm513_vm15 = vcmp.lt.s32.totalorder %v2067_v11, 45 }
  0x1a   : > { %v333_v4 = vmul.f32 %v332_v3, %v330_v2  ;;  %s1914_s22 = smov 33   ;;  %s1915_s23 = smov 32  }
  0x1b   : > { %s1916_s24 = smov 31   ;;  %s1917_s2 = smov 30  }
  0x1c   : > { %v334_v5 = vsub.f32 1.0, %v333_v4  ;;  %s1918_s28 = smov 29   ;;  %s1719_s29 = sld [smem:[#allocation5 + $0x1]] }
  0x1d   : > { %s1919_s30 = smov 19   ;;  %s361_s7 = sld [smem:[#allocation5]] }
  0x1e   : > { %337 = vst.msk [vmem:[#allocation2] sm:$0x3] %vm335_vm1, %v334_v5  ;;  %s1920_s8 = smov 18   ;;  %s2088_s9 = sld [smem:[#allocation4]]  ;;  %vm539_vm1 = vcmp.lt.s32.totalorder %v2067_v11, 35 }
  0x1f   : > { %s2090_s10 = sld [smem:[#allocation5 + $0x2]]  ;;  %s1931_s11 = smov 125  }
  0x20   : > { %s1731_s12 = sld [smem:[#allocation5 + $0x86]] }
  0x22   : > { %v390_v19 = vstv %s1719_s29  ;;  %s1928_s29 = smov 1  }
  0x23   : > { %v362_v20 = vstv %s361_s7  ;;  %s1929_s7 = smov 127  }
  0x24   : > { %v341_v40 = vstv %s2088_s9  ;;  %s1930_s9 = smov 126  }
  0x25   : > { %v338_v6 = vld [vmem:[#allocation2] sm:$0x7]  ;;  %v416_v44 = vstv %s2090_s10  ;;  %s1730_s10 = sld [smem:[#allocation5 + $0x85]] }
  0x26   : > { %v2024_v7 = vperm.slane %v338_v6, 2  ;;  %v2026_v8 = vperm.slane %v338_v6, 0  ;;  %v2028_v9 = vperm.slane %v338_v6, 1 }
  0x28   : > { %353 = vrot.lane.b32.xlu1 %v2024_v7, %s1905_s13  ;;  %349 = vrot.lane.b32.xlu0 %v2026_v8, %s1905_s13 }
  0x29   : > { %381 = vrot.lane.b32.xlu2 %v2028_v9, %s1906_s14 }
  0x30   : > { %379 = vrot.lane.b32.xlu1 %v2026_v8, %s1906_s14  ;;  %351 = vrot.lane.b32.xlu0 %v2028_v9, %s1905_s13  ;;  %s1921_s13 = smov 17  }
  0x31   : > { %383 = vrot.lane.b32.xlu2 %v2024_v7, %s1906_s14  ;;  %s1721_s14 = sld [smem:[#allocation5 + $0x3]] }
  0x37   : > { %v442_v62 = vstv %s1721_s14  ;;  %s1732_s14 = sld [smem:[#allocation5 + $0x100]] }
  0x38   : > { %407 = vrot.lane.b32.xlu1 %v2028_v9, %s1907_s15  ;;  %405 = vrot.lane.b32.xlu0 %v2026_v8, %s1907_s15 }
  0x39   : > { %409 = vrot.lane.b32.xlu2 %v2024_v7, %s1907_s15  ;;  %s1922_s15 = smov 16  }
  0x40   : > { %433 = vrot.lane.b32.xlu1 %v2028_v9, %s1908_s16  ;;  %431 = vrot.lane.b32.xlu0 %v2026_v8, %s1908_s16 }
  0x41   : > { %435 = vrot.lane.b32.xlu2 %v2024_v7, %s1908_s16  ;;  %s1722_s16 = sld [smem:[#allocation5 + $0x4]] }
  0x48   : > { %457 = vrot.lane.b32.xlu1 %v2028_v9, %s1909_s17  ;;  %455 = vrot.lane.b32.xlu0 %v2026_v8, %s1909_s17 }
  0x49   : > { %459 = vrot.lane.b32.xlu2 %v2024_v7, %s1909_s17  ;;  %s1923_s17 = smov 15  }
  0x50   : > { %483 = vrot.lane.b32.xlu1 %v2028_v9, %s1910_s18  ;;  %481 = vrot.lane.b32.xlu0 %v2026_v8, %s1910_s18 }
  0x51   : > { %485 = vrot.lane.b32.xlu2 %v2024_v7, %s1910_s18  ;;  %s1723_s18 = sld [smem:[#allocation5 + $0x5]] }
  0x58   : > { %509 = vrot.lane.b32.xlu1 %v2028_v9, %s1911_s19  ;;  %507 = vrot.lane.b32.xlu0 %v2026_v8, %s1911_s19 }
  0x59   : > { %511 = vrot.lane.b32.xlu2 %v2024_v7, %s1911_s19  ;;  %s1924_s19 = smov 14  }
  0x60   : > { %535 = vrot.lane.b32.xlu1 %v2028_v9, %s1912_s20  ;;  %533 = vrot.lane.b32.xlu0 %v2026_v8, %s1912_s20 }
  0x61   : > { %537 = vrot.lane.b32.xlu2 %v2024_v7, %s1912_s20  ;;  %s1724_s20 = sld [smem:[#allocation5 + $0x6]] }
  0x68   : > { %560 = vrot.lane.b32.xlu1 %v2028_v9, %s1913_s21  ;;  %558 = vrot.lane.b32.xlu0 %v2026_v8, %s1913_s21 }
  0x69   : > { %562 = vrot.lane.b32.xlu2 %v2024_v7, %s1913_s21  ;;  %s1925_s21 = smov 13  }
  0x70   : > { %585 = vrot.lane.b32.xlu1 %v2028_v9, %s1914_s22  ;;  %583 = vrot.lane.b32.xlu0 %v2026_v8, %s1914_s22 }
  0x71   : > { %587 = vrot.lane.b32.xlu2 %v2024_v7, %s1914_s22  ;;  %s1725_s22 = sld [smem:[#allocation5 + $0x80]] }
  0x78   : > { %610 = vrot.lane.b32.xlu1 %v2028_v9, %s1915_s23  ;;  %608 = vrot.lane.b32.xlu0 %v2026_v8, %s1915_s23 }
  0x79   : > { %612 = vrot.lane.b32.xlu2 %v2024_v7, %s1915_s23  ;;  %s1926_s23 = smov 3  }
  0x80   : > { %634 = vrot.lane.b32.xlu1 %v2028_v9, %s1916_s24  ;;  %632 = vrot.lane.b32.xlu0 %v2026_v8, %s1916_s24 }
  0x81   : > { %636 = vrot.lane.b32.xlu2 %v2024_v7, %s1916_s24  ;;  %s1726_s24 = sld [smem:[#allocation5 + $0x81]] }
  0x83   : > { %v382_v10 = vpop.permute.xlu2 %381 }
  0x88   : > { %659 = vrot.lane.b32.xlu1 %v2028_v9, %s1917_s2  ;;  %657 = vrot.lane.b32.xlu0 %v2026_v8, %s1917_s2 }
  0x89   : > { %661 = vrot.lane.b32.xlu2 %v2024_v7, %s1917_s2  ;;  %s1927_s2 = smov 2  }
  0x8b   : > { %v384_v12 = vpop.permute.xlu2 %383 }
  0x8c   : > { %v386_v13 = vsel %vm385_vm2, %v382_v10, %v384_v12 }
  0x8d   : > { %v393_v21 = vmul.f32 %v390_v19, %v386_v13 }
  0x8f   : > { %v399_v38 = vrot.slane %v393_v21, 6 }
  0x90   : > { %684 = vrot.lane.b32.xlu1 %v2028_v9, %s1918_s28  ;;  %682 = vrot.lane.b32.xlu0 %v2026_v8, %s1918_s28 }
  0x91   : > { %686 = vrot.lane.b32.xlu2 %v2024_v7, %s1918_s28  ;;  %s1727_s28 = sld [smem:[#allocation5 + $0x82]] }
  0x93   : > { %v410_v14 = vpop.permute.xlu2 %409 }
  0x98   : > { %709 = vrot.lane.b32.xlu1 %v2028_v9, %s1919_s30  ;;  %707 = vrot.lane.b32.xlu0 %v2026_v8, %s1919_s30 }
  0x99   : > { %711 = vrot.lane.b32.xlu2 %v2024_v7, %s1919_s30  ;;  %s1728_s30 = sld [smem:[#allocation5 + $0x83]] }
  0x9a   : > { %v354_v15 = vpop.permute.xlu1 %353  ;;  %v350_v16 = vpop.permute.xlu0 %349 }
  0x9b   : > { %v360_v17 = vsel %vm357_vm3, %v354_v15, %v350_v16  ;;  %v2084_v18 = vpop.permute.xlu2 %435 }
  0x9c   : > { %v363_v33 = vmul.f32 %v362_v20, %v360_v17 }
  0xa0   : > { %734 = vrot.lane.b32.xlu1 %v2028_v9, %s1920_s8  ;;  %732 = vrot.lane.b32.xlu0 %v2026_v8, %s1920_s8 }
  0xa1   : > { %736 = vrot.lane.b32.xlu2 %v2024_v7, %s1920_s8  ;;  %s1729_s8 = sld [smem:[#allocation5 + $0x84]] }
  0xa2   : > { %v380_v22 = vpop.permute.xlu1 %379  ;;  %v352_v23 = vpop.permute.xlu0 %351 }
  0xa3   : > { %v387_v24 = vsel %vm385_vm2, %v380_v22, %v382_v10  ;;  %v388_v25 = vsel %vm385_vm2, %v384_v12, %v380_v22  ;;  %v358_v26 = vsel %vm357_vm3, %v352_v23, %v354_v15  ;;  %v359_v27 = vsel %vm357_vm3, %v350_v16, %v352_v23  ;;  %v2101_v28 = vpop.permute.xlu2 %459 }
  0xa4   : > { %v392_v30 = vmul.f32 %v390_v19, %v387_v24  ;;  %v364_v31 = vmul.f32 %v362_v20, %v359_v27  ;;  %v365_v32 = vmul.f32 %v362_v20, %v358_v26  ;;  %v391_v34 = vmul.f32 %v390_v19, %v388_v25 }
  0xa5   : > { %v466_v20 = vstv %s1722_s16  ;;  %vm564_vm2 = vcmp.lt.s32.totalorder %v2067_v11, 34  ;;  %vm589_vm3 = vcmp.lt.s32.totalorder %v2067_v11, 33  ;;  %s1733_s16 = sld [smem:[#allocation5 + $0x101]] }
  0xa6   : > { %v398_v35 = vrot.slane %v392_v30, 7  ;;  %v370_v36 = vrot.slane %v364_v31, 7  ;;  %v371_v37 = vrot.slane %v365_v32, 6 }
  0xa8   : > { %v400_v39 = vsel %vm372_vm4, %v391_v34, %v398_v35  ;;  %v373_v41 = vsel %vm372_vm4, %v363_v33, %v370_v36  ;;  %759 = vrot.lane.b32.xlu1 %v2028_v9, %s1921_s13  ;;  %757 = vrot.lane.b32.xlu0 %v2026_v8, %s1921_s13  ;;  %v492_v35 = vstv %s1723_s18  ;;  %s1734_s18 = sld [smem:[#allocation5 + $0x102]] }
  0xa9   : > { %v401_v42 = vsel %vm374_vm5, %v400_v39, %v399_v38  ;;  %v375_v43 = vsel %vm374_vm5, %v373_v41, %v371_v37  ;;  %761 = vrot.lane.b32.xlu2 %v2024_v7, %s1921_s13  ;;  %s1932_s13 = smov 115  }
  0xaa   : > { %v377_v45 = vsel %vm366_vm6, %v375_v43, 0.0  ;;  %v408_v46 = vpop.permute.xlu1 %407  ;;  %v406_v47 = vpop.permute.xlu0 %405  ;;  %v403_v53 = vsel %vm394_vm8, %v401_v42, 0.0 }
  0xab   : > { %v378_v48 = vadd.f32 %v377_v45, %v341_v40  ;;  %v412_v49 = vsel %vm411_vm7, %v408_v46, %v410_v14  ;;  %v413_v50 = vsel %vm411_vm7, %v406_v47, %v408_v46  ;;  %v414_v51 = vsel %vm411_vm7, %v410_v14, %v406_v47  ;;  %v2122_v52 = vpop.permute.xlu2 %485 }
  0xac   : > { %v419_v54 = vmul.f32 %v416_v44, %v412_v49  ;;  %v418_v55 = vmul.f32 %v416_v44, %v413_v50  ;;  %v417_v58 = vmul.f32 %v416_v44, %v414_v51  ;;  %v518_v51 = vstv %s1724_s20  ;;  %s1735_s20 = sld [smem:[#allocation5 + $0x103]] }
  0xad   : > { %v404_v56 = vadd.f32 %v403_v53, %v378_v48  ;;  %vm614_vm7 = vcmp.lt.s32.totalorder %v2067_v11, 32 }
  0xae   : > { %v425_v57 = vrot.slane %v419_v54, 6  ;;  %v424_v59 = vrot.slane %v418_v55, 7 }
  0xb0   : > { %v426_v60 = vsel %vm372_vm4, %v417_v58, %v424_v59  ;;  %784 = vrot.lane.b32.xlu1 %v2028_v9, %s1922_s15  ;;  %782 = vrot.lane.b32.xlu0 %v2026_v8, %s1922_s15 }
  0xb1   : > { %v427_v61 = vsel %vm374_vm5, %v426_v60, %v425_v57  ;;  %786 = vrot.lane.b32.xlu2 %v2024_v7, %s1922_s15  ;;  %s1933_s15 = smov 114  }
  0xb2   : > { %v429_v63 = vsel %vm420_vm9, %v427_v61, 0.0  ;;  %v434_v1 = vpop.permute.xlu1 %433  ;;  %v432_v2 = vpop.permute.xlu0 %431 }
  0xb3   : > { %v430_v3 = vadd.f32 %v429_v63, %v404_v56  ;;  %v438_v4 = vsel %vm437_vm10, %v434_v1, %v2084_v18  ;;  %v439_v5 = vsel %vm437_vm10, %v432_v2, %v434_v1  ;;  %v440_v6 = vsel %vm437_vm10, %v2084_v18, %v432_v2  ;;  %v2137_v10 = vpop.permute.xlu2 %511 }
  0xb4   : > { %v445_v12 = vmul.f32 %v442_v62, %v438_v4  ;;  %v444_v13 = vmul.f32 %v442_v62, %v439_v5  ;;  %v443_v15 = vmul.f32 %v442_v62, %v440_v6  ;;  %v544_v4 = vstv %s1725_s22  ;;  %s1736_s22 = sld [smem:[#allocation5 + $0x104]] }
  0xb5   : > { %vm638_vm10 = vcmp.lt.s32.totalorder %v2067_v11, 31 }
  0xb6   : > { %v450_v14 = vrot.slane %v445_v12, 6  ;;  %v449_v16 = vrot.slane %v444_v13, 7 }
  0xb8   : > { %v451_v17 = vsel %vm372_vm4, %v443_v15, %v449_v16  ;;  %808 = vrot.lane.b32.xlu1 %v2028_v9, %s1923_s17  ;;  %806 = vrot.lane.b32.xlu0 %v2026_v8, %s1923_s17 }
  0xb9   : > { %v452_v19 = vsel %vm374_vm5, %v451_v17, %v450_v14  ;;  %810 = vrot.lane.b32.xlu2 %v2024_v7, %s1923_s17  ;;  %s1934_s17 = smov 113  }
  0xba   : > { %v454_v18 = vadd.f32 %v452_v19, %v430_v3  ;;  %v458_v21 = vpop.permute.xlu1 %457  ;;  %v456_v22 = vpop.permute.xlu0 %455 }
  0xbb   : > { %v462_v23 = vsel %vm461_vm11, %v458_v21, %v2101_v28  ;;  %v463_v24 = vsel %vm461_vm11, %v456_v22, %v458_v21  ;;  %v464_v25 = vsel %vm461_vm11, %v2101_v28, %v456_v22  ;;  %v2147_v26 = vpop.permute.xlu2 %537  ;;  %vm663_vm11 = vcmp.lt.s32.totalorder %v2067_v11, 30 }
  0xbc   : > { %v469_v27 = vmul.f32 %v466_v20, %v462_v23  ;;  %v468_v30 = vmul.f32 %v466_v20, %v463_v24  ;;  %v467_v32 = vmul.f32 %v466_v20, %v464_v25  ;;  %v569_v24 = vstv %s1726_s24  ;;  %s1737_s24 = sld [smem:[#allocation5 + $0x105]] }
  0xbe   : > { %v475_v31 = vrot.slane %v469_v27, 6  ;;  %v474_v33 = vrot.slane %v468_v30, 7 }
  0xc0   : > { %v476_v34 = vsel %vm372_vm4, %v467_v32, %v474_v33  ;;  %833 = vrot.lane.b32.xlu1 %v2028_v9, %s1924_s19  ;;  %831 = vrot.lane.b32.xlu0 %v2026_v8, %s1924_s19 }
  0xc1   : > { %v477_v28 = vsel %vm374_vm5, %v476_v34, %v475_v31  ;;  %835 = vrot.lane.b32.xlu2 %v2024_v7, %s1924_s19  ;;  %s1935_s19 = smov 112  }
  0xc2   : > { %v479_v36 = vsel %vm470_vm12, %v477_v28, 0.0  ;;  %v484_v37 = vpop.permute.xlu1 %483  ;;  %v482_v38 = vpop.permute.xlu0 %481 }
  0xc3   : > { %v480_v39 = vadd.f32 %v479_v36, %v454_v18  ;;  %v488_v40 = vsel %vm487_vm13, %v484_v37, %v2122_v52  ;;  %v489_v41 = vsel %vm487_vm13, %v482_v38, %v484_v37  ;;  %v490_v42 = vsel %vm487_vm13, %v2122_v52, %v482_v38  ;;  %v2160_v43 = vpop.permute.xlu2 %562 }
  0xc4   : > { %v495_v44 = vmul.f32 %v492_v35, %v488_v40  ;;  %v494_v45 = vmul.f32 %v492_v35, %v489_v41  ;;  %v493_v47 = vmul.f32 %v492_v35, %v490_v42  ;;  %v594_v41 = vstv %s1727_s28  ;;  %s1738_s28 = sld [smem:[#allocation5 + $0x106]] }
  0xc5   : > { %vm688_vm13 = vcmp.lt.s32.totalorder %v2067_v11, 29 }
  0xc6   : > { %v501_v46 = vrot.slane %v495_v44, 6  ;;  %v500_v48 = vrot.slane %v494_v45, 7 }
  0xc8   : > { %v502_v49 = vsel %vm372_vm4, %v493_v47, %v500_v48  ;;  %858 = vrot.lane.b32.xlu1 %v2028_v9, %s1925_s21  ;;  %856 = vrot.lane.b32.xlu0 %v2026_v8, %s1925_s21 }
  0xc9   : > { %v503_v50 = vsel %vm374_vm5, %v502_v49, %v501_v46  ;;  %860 = vrot.lane.b32.xlu2 %v2024_v7, %s1925_s21  ;;  %s1936_s21 = smov 111  }
  0xca   : > { %v505_v52 = vsel %vm496_vm14, %v503_v50, 0.0  ;;  %v510_v53 = vpop.permute.xlu1 %509  ;;  %v508_v54 = vpop.permute.xlu0 %507 }
  0xcb   : > { %v506_v55 = vadd.f32 %v505_v52, %v480_v39  ;;  %v514_v56 = vsel %vm513_vm15, %v510_v53, %v2137_v10  ;;  %v515_v57 = vsel %vm513_vm15, %v508_v54, %v510_v53  ;;  %v516_v58 = vsel %vm513_vm15, %v2137_v10, %v508_v54  ;;  %v2173_v59 = vpop.permute.xlu2 %587 }
  0xcc   : > { %v521_v60 = vmul.f32 %v518_v51, %v514_v56  ;;  %v520_v61 = vmul.f32 %v518_v51, %v515_v57  ;;  %v519_v63 = vmul.f32 %v518_v51, %v516_v58  ;;  %v619_v57 = vstv %s1728_s30  ;;  %s1739_s30 = sld [smem:[#allocation5 + $0x180]] }
  0xcd   : > { %vm713_vm15 = vcmp.lt.s32.totalorder %v2067_v11, 19 }
  0xce   : > { %v527_v62 = vrot.slane %v521_v60, 6  ;;  %v526_v1 = vrot.slane %v520_v61, 7 }
  0xd0   : > { %v528_v2 = vsel %vm372_vm4, %v519_v63, %v526_v1  ;;  %883 = vrot.lane.b32.xlu1 %v2028_v9, %s1926_s23  ;;  %881 = vrot.lane.b32.xlu0 %v2026_v8, %s1926_s23 }
  0xd1   : > { %v529_v3 = vsel %vm374_vm5, %v528_v2, %v527_v62  ;;  %885 = vrot.lane.b32.xlu2 %v2024_v7, %s1926_s23  ;;  %s1937_s23 = smov 110  }
  0xd2   : > { %v531_v5 = vsel %vm522_vm0, %v529_v3, 0.0  ;;  %v536_v6 = vpop.permute.xlu1 %535  ;;  %v534_v10 = vpop.permute.xlu0 %533 }
  0xd3   : > { %v532_v12 = vadd.f32 %v531_v5, %v506_v55  ;;  %v540_v13 = vsel %vm539_vm1, %v536_v6, %v2147_v26  ;;  %v541_v14 = vsel %vm539_vm1, %v534_v10, %v536_v6  ;;  %v542_v15 = vsel %vm539_vm1, %v2147_v26, %v534_v10  ;;  %v2186_v16 = vpop.permute.xlu2 %612 }
  0xd4   : > { %v547_v17 = vmul.f32 %v544_v4, %v540_v13  ;;  %v546_v19 = vmul.f32 %v544_v4, %v541_v14  ;;  %v545_v18 = vmul.f32 %v544_v4, %v542_v15  ;;  %v643_v14 = vstv %s1729_s8  ;;  %s1740_s8 = sld [smem:[#allocation5 + $0x181]] }
  0xd5   : > { %vm738_vm1 = vcmp.lt.s32.totalorder %v2067_v11, 18 }
  0xd6   : > { %v552_v20 = vrot.slane %v547_v17, 6  ;;  %v551_v21 = vrot.slane %v546_v19, 7 }
  0xd8   : > { %v553_v22 = vsel %vm372_vm4, %v545_v18, %v551_v21  ;;  %908 = vrot.lane.b32.xlu1 %v2028_v9, %s1927_s2  ;;  %906 = vrot.lane.b32.xlu0 %v2026_v8, %s1927_s2 }
  0xd9   : > { %v554_v23 = vsel %vm374_vm5, %v553_v22, %v552_v20  ;;  %910 = vrot.lane.b32.xlu2 %v2024_v7, %s1927_s2  ;;  %s1938_s2 = smov 109  }
  0xda   : > { %v556_v25 = vsel %vm366_vm6, %v554_v23, 0.0  ;;  %v561_v26 = vpop.permute.xlu1 %560  ;;  %v559_v27 = vpop.permute.xlu0 %558 }
  0xdb   : > { %v557_v30 = vadd.f32 %v556_v25, %v532_v12  ;;  %v565_v31 = vsel %vm564_vm2, %v561_v26, %v2160_v43  ;;  %v566_v32 = vsel %vm564_vm2, %v559_v27, %v561_v26  ;;  %v567_v33 = vsel %vm564_vm2, %v2160_v43, %v559_v27  ;;  %v2198_v34 = vpop.permute.xlu2 %636 }
  0xdc   : > { %v572_v28 = vmul.f32 %v569_v24, %v565_v31  ;;  %v571_v35 = vmul.f32 %v569_v24, %v566_v32  ;;  %v570_v37 = vmul.f32 %v569_v24, %v567_v33  ;;  %v668_v31 = vstv %s1730_s10  ;;  %s1741_s10 = sld [smem:[#allocation5 + $0x182]] }
  0xdd   : > { %vm763_vm2 = vcmp.lt.s32.totalorder %v2067_v11, 17 }
  0xde   : > { %v577_v36 = vrot.slane %v572_v28, 6  ;;  %v576_v38 = vrot.slane %v571_v35, 7 }
  0xe0   : > { %v578_v39 = vsel %vm372_vm4, %v570_v37, %v576_v38  ;;  %933 = vrot.lane.b32.xlu1 %v2028_v9, %s1928_s29  ;;  %931 = vrot.lane.b32.xlu0 %v2026_v8, %s1928_s29 }
  0xe1   : > { %v579_v40 = vsel %vm374_vm5, %v578_v39, %v577_v36  ;;  %935 = vrot.lane.b32.xlu2 %v2024_v7, %s1928_s29  ;;  %s1939_s29 = smov 99  }
  0xe2   : > { %v581_v42 = vsel %vm394_vm8, %v579_v40, 0.0  ;;  %v586_v43 = vpop.permute.xlu1 %585  ;;  %v584_v44 = vpop.permute.xlu0 %583 }
  0xe3   : > { %v582_v45 = vadd.f32 %v581_v42, %v557_v30  ;;  %v590_v46 = vsel %vm589_vm3, %v586_v43, %v2173_v59  ;;  %v591_v47 = vsel %vm589_vm3, %v584_v44, %v586_v43  ;;  %v592_v48 = vsel %vm589_vm3, %v2173_v59, %v584_v44  ;;  %v2210_v49 = vpop.permute.xlu2 %661 }
  0xe4   : > { %v597_v50 = vmul.f32 %v594_v41, %v590_v46  ;;  %v596_v51 = vmul.f32 %v594_v41, %v591_v47  ;;  %v595_v53 = vmul.f32 %v594_v41, %v592_v48  ;;  %v693_v46 = vstv %s1731_s12  ;;  %s1743_s12 = sld [smem:[#allocation5 + $0x184]] }
  0xe5   : > { %vm788_vm3 = vcmp.lt.s32.totalorder %v2067_v11, 16 }
  0xe6   : > { %v602_v52 = vrot.slane %v597_v50, 6  ;;  %v601_v54 = vrot.slane %v596_v51, 7 }
  0xe8   : > { %v603_v55 = vsel %vm372_vm4, %v595_v53, %v601_v54  ;;  %962 = vrot.lane.b32.xlu1 %v2028_v9, %s1929_s7  ;;  %960 = vrot.lane.b32.xlu0 %v2026_v8, %s1929_s7 }
  0xe9   : > { %v604_v56 = vsel %vm374_vm5, %v603_v55, %v602_v52  ;;  %964 = vrot.lane.b32.xlu2 %v2024_v7, %s1929_s7  ;;  %s1940_s7 = smov 98  }
  0xea   : > { %v606_v58 = vsel %vm420_vm9, %v604_v56, 0.0  ;;  %v611_v59 = vpop.permute.xlu1 %610  ;;  %v609_v60 = vpop.permute.xlu0 %608 }
  0xeb   : > { %v607_v61 = vadd.f32 %v606_v58, %v582_v45  ;;  %v615_v62 = vsel %vm614_vm7, %v611_v59, %v2186_v16  ;;  %v616_v63 = vsel %vm614_vm7, %v609_v60, %v611_v59  ;;  %v617_v1 = vsel %vm614_vm7, %v2186_v16, %v609_v60  ;;  %v2222_v2 = vpop.permute.xlu2 %686 }
  0xec   : > { %v622_v3 = vmul.f32 %v619_v57, %v615_v62  ;;  %v621_v4 = vmul.f32 %v619_v57, %v616_v63  ;;  %v620_v6 = vmul.f32 %v619_v57, %v617_v1  ;;  %v718_v62 = vstv %s1732_s14  ;;  %s1943_s14 = smov 95  }
  0xed   : > { %vm812_vm7 = vcmp.lt.s32.totalorder %v2067_v11, 15 }
  0xee   : > { %v627_v5 = vrot.slane %v622_v3, 6  ;;  %v626_v10 = vrot.slane %v621_v4, 7 }
  0xf0   : > { %v628_v12 = vsel %vm372_vm4, %v620_v6, %v626_v10  ;;  %987 = vrot.lane.b32.xlu1 %v2028_v9, %s1930_s9  ;;  %985 = vrot.lane.b32.xlu0 %v2026_v8, %s1930_s9 }
  0xf1   : > { %v629_v13 = vsel %vm374_vm5, %v628_v12, %v627_v5  ;;  %989 = vrot.lane.b32.xlu2 %v2024_v7, %s1930_s9  ;;  %s1941_s9 = smov 97  }
  0xf2   : > { %v631_v15 = vadd.f32 %v629_v13, %v607_v61  ;;  %v635_v16 = vpop.permute.xlu1 %634  ;;  %v633_v17 = vpop.permute.xlu0 %632 }
  0xf3   : > { %v639_v19 = vsel %vm638_vm10, %v635_v16, %v2198_v34  ;;  %v640_v20 = vsel %vm638_vm10, %v633_v17, %v635_v16  ;;  %v641_v18 = vsel %vm638_vm10, %v2198_v34, %v633_v17  ;;  %v2232_v21 = vpop.permute.xlu2 %711  ;;  %vm837_vm10 = vcmp.lt.s32.totalorder %v2067_v11, 14 }
  0xf4   : > { %v646_v22 = vmul.f32 %v643_v14, %v639_v19  ;;  %v645_v23 = vmul.f32 %v643_v14, %v640_v20  ;;  %v644_v25 = vmul.f32 %v643_v14, %v641_v18  ;;  %v743_v20 = vstv %s1733_s16  ;;  %s1944_s16 = smov 94  }
  0xf6   : > { %v651_v24 = vrot.slane %v646_v22, 6  ;;  %v650_v26 = vrot.slane %v645_v23, 7 }
  0xf8   : > { %v652_v27 = vsel %vm372_vm4, %v644_v25, %v650_v26  ;;  %1012 = vrot.lane.b32.xlu1 %v2028_v9, %s1931_s11  ;;  %1010 = vrot.lane.b32.xlu0 %v2026_v8, %s1931_s11 }
  0xf9   : > { %v653_v30 = vsel %vm374_vm5, %v652_v27, %v651_v24  ;;  %1014 = vrot.lane.b32.xlu2 %v2024_v7, %s1931_s11  ;;  %s1942_s11 = smov 96  }
  0xfa   : > { %v655_v32 = vsel %vm470_vm12, %v653_v30, 0.0  ;;  %v660_v33 = vpop.permute.xlu1 %659  ;;  %v658_v34 = vpop.permute.xlu0 %657 }
  0xfb   : > { %v656_v28 = vadd.f32 %v655_v32, %v631_v15  ;;  %v664_v35 = vsel %vm663_vm11, %v660_v33, %v2210_v49  ;;  %v665_v36 = vsel %vm663_vm11, %v658_v34, %v660_v33  ;;  %v666_v37 = vsel %vm663_vm11, %v2210_v49, %v658_v34  ;;  %v2244_v38 = vpop.permute.xlu2 %736 }
  0xfc   : > { %v671_v39 = vmul.f32 %v668_v31, %v664_v35  ;;  %v670_v40 = vmul.f32 %v668_v31, %v665_v36  ;;  %v669_v42 = vmul.f32 %v668_v31, %v666_v37  ;;  %v768_v36 = vstv %s1734_s18  ;;  %s1945_s18 = smov 93  }
  0xfd   : > { %vm862_vm11 = vcmp.lt.s32.totalorder %v2067_v11, 13 }
  0xfe   : > { %v676_v41 = vrot.slane %v671_v39, 6  ;;  %v675_v43 = vrot.slane %v670_v40, 7 }
 0x100   : > { %v677_v44 = vsel %vm372_vm4, %v669_v42, %v675_v43  ;;  %1037 = vrot.lane.b32.xlu1 %v2028_v9, %s1932_s13  ;;  %1035 = vrot.lane.b32.xlu0 %v2026_v8, %s1932_s13 }
 0x101   : > { %v678_v45 = vsel %vm374_vm5, %v677_v44, %v676_v41  ;;  %1039 = vrot.lane.b32.xlu2 %v2024_v7, %s1932_s13  ;;  %s2372_s13 = sld [smem:[#allocation5 + $0x183]] }
 0x102   : > { %v680_v47 = vsel %vm496_vm14, %v678_v45, 0.0  ;;  %v685_v48 = vpop.permute.xlu1 %684  ;;  %v683_v49 = vpop.permute.xlu0 %682 }
 0x103   : > { %v681_v50 = vadd.f32 %v680_v47, %v656_v28  ;;  %v689_v51 = vsel %vm688_vm13, %v685_v48, %v2222_v2  ;;  %v690_v52 = vsel %vm688_vm13, %v683_v49, %v685_v48  ;;  %v691_v53 = vsel %vm688_vm13, %v2222_v2, %v683_v49  ;;  %v2256_v54 = vpop.permute.xlu2 %761 }
 0x104   : > { %v696_v55 = vmul.f32 %v693_v46, %v689_v51  ;;  %v695_v56 = vmul.f32 %v693_v46, %v690_v52  ;;  %v694_v58 = vmul.f32 %v693_v46, %v691_v53  ;;  %v793_v52 = vstv %s1735_s20  ;;  %s1946_s20 = smov 83  }
 0x105   : > { %vm887_vm13 = vcmp.lt.s32.totalorder %v2067_v11, 3 }
 0x106   : > { %v701_v57 = vrot.slane %v696_v55, 6  ;;  %v700_v59 = vrot.slane %v695_v56, 7 }
 0x108   : > { %v702_v60 = vsel %vm372_vm4, %v694_v58, %v700_v59  ;;  %1062 = vrot.lane.b32.xlu1 %v2028_v9, %s1933_s15  ;;  %1060 = vrot.lane.b32.xlu0 %v2026_v8, %s1933_s15 }
 0x109   : > { %v703_v61 = vsel %vm374_vm5, %v702_v60, %v701_v57  ;;  %1064 = vrot.lane.b32.xlu2 %v2024_v7, %s1933_s15  ;;  %s1744_s15 = sld [smem:[#allocation5 + $0x185]] }
 0x10a   : > { %v705_v63 = vsel %vm522_vm0, %v703_v61, 0.0  ;;  %v710_v1 = vpop.permute.xlu1 %709  ;;  %v708_v2 = vpop.permute.xlu0 %707 }
 0x10b   : > { %v706_v3 = vadd.f32 %v705_v63, %v681_v50  ;;  %v714_v4 = vsel %vm713_vm15, %v710_v1, %v2232_v21  ;;  %v715_v5 = vsel %vm713_vm15, %v708_v2, %v710_v1  ;;  %v716_v6 = vsel %vm713_vm15, %v2232_v21, %v708_v2  ;;  %v2268_v10 = vpop.permute.xlu2 %786 }
 0x10c   : > { %v721_v12 = vmul.f32 %v718_v62, %v714_v4  ;;  %v720_v13 = vmul.f32 %v718_v62, %v715_v5  ;;  %v719_v15 = vmul.f32 %v718_v62, %v716_v6  ;;  %v817_v5 = vstv %s1736_s22  ;;  %s1947_s22 = smov 82  }
 0x10d   : > { %vm912_vm15 = vcmp.lt.s32.totalorder %v2067_v11, 2 }
 0x10e   : > { %v726_v14 = vrot.slane %v721_v12, 6  ;;  %v725_v16 = vrot.slane %v720_v13, 7 }
 0x110   : > { %v727_v17 = vsel %vm372_vm4, %v719_v15, %v725_v16  ;;  %1087 = vrot.lane.b32.xlu1 %v2028_v9, %s1934_s17  ;;  %1085 = vrot.lane.b32.xlu0 %v2026_v8, %s1934_s17 }
 0x111   : > { %v728_v19 = vsel %vm374_vm5, %v727_v17, %v726_v14  ;;  %1089 = vrot.lane.b32.xlu2 %v2024_v7, %s1934_s17  ;;  %s1745_s17 = sld [smem:[#allocation5 + $0x186]] }
 0x112   : > { %v730_v18 = vsel %vm366_vm6, %v728_v19, 0.0  ;;  %v735_v21 = vpop.permute.xlu1 %734  ;;  %v733_v22 = vpop.permute.xlu0 %732 }
 0x113   : > { %v731_v23 = vadd.f32 %v730_v18, %v706_v3  ;;  %v739_v24 = vsel %vm738_vm1, %v735_v21, %v2244_v38  ;;  %v740_v25 = vsel %vm738_vm1, %v733_v22, %v735_v21  ;;  %v741_v26 = vsel %vm738_vm1, %v2244_v38, %v733_v22  ;;  %v2280_v27 = vpop.permute.xlu2 %810 }
 0x114   : > { %v746_v30 = vmul.f32 %v743_v20, %v739_v24  ;;  %v745_v31 = vmul.f32 %v743_v20, %v740_v25  ;;  %v744_v33 = vmul.f32 %v743_v20, %v741_v26  ;;  %v842_v24 = vstv %s1737_s24  ;;  %s1948_s24 = smov 81  }
 0x115   : > { %vm937_vm1 = vcmp.lt.s32.totalorder %v2067_v11, 1 }
 0x116   : > { %v751_v32 = vrot.slane %v746_v30, 6  ;;  %v750_v34 = vrot.slane %v745_v31, 7 }
 0x118   : > { %v752_v28 = vsel %vm372_vm4, %v744_v33, %v750_v34  ;;  %1112 = vrot.lane.b32.xlu1 %v2028_v9, %s1935_s19  ;;  %1110 = vrot.lane.b32.xlu0 %v2026_v8, %s1935_s19 }
 0x119   : > { %v753_v35 = vsel %vm374_vm5, %v752_v28, %v751_v32  ;;  %1114 = vrot.lane.b32.xlu2 %v2024_v7, %s1935_s19  ;;  %s1746_s19 = sld [smem:[#allocation5 + $0x200]] }
 0x11a   : > { %v755_v37 = vsel %vm394_vm8, %v753_v35, 0.0  ;;  %v760_v38 = vpop.permute.xlu1 %759  ;;  %v758_v39 = vpop.permute.xlu0 %757 }
 0x11b   : > { %v756_v40 = vadd.f32 %v755_v37, %v731_v23  ;;  %v764_v41 = vsel %vm763_vm2, %v760_v38, %v2256_v54  ;;  %v765_v42 = vsel %vm763_vm2, %v758_v39, %v760_v38  ;;  %v766_v43 = vsel %vm763_vm2, %v2256_v54, %v758_v39  ;;  %v2292_v44 = vpop.permute.xlu2 %835 }
 0x11c   : > { %v771_v45 = vmul.f32 %v768_v36, %v764_v41  ;;  %v770_v46 = vmul.f32 %v768_v36, %v765_v42  ;;  %v769_v48 = vmul.f32 %v768_v36, %v766_v43  ;;  %v867_v41 = vstv %s1738_s28  ;;  %s1949_s28 = smov 80  }
 0x11d   : > { %vm966_vm2 = vcmp.lt.s32.totalorder %v2067_v11, 127 }
 0x11e   : > { %v776_v47 = vrot.slane %v771_v45, 6  ;;  %v775_v49 = vrot.slane %v770_v46, 7 }
 0x120   : > { %v777_v50 = vsel %vm372_vm4, %v769_v48, %v775_v49  ;;  %1136 = vrot.lane.b32.xlu1 %v2028_v9, %s1936_s21  ;;  %1134 = vrot.lane.b32.xlu0 %v2026_v8, %s1936_s21 }
 0x121   : > { %v778_v51 = vsel %vm374_vm5, %v777_v50, %v776_v47  ;;  %1138 = vrot.lane.b32.xlu2 %v2024_v7, %s1936_s21  ;;  %s1747_s21 = sld [smem:[#allocation5 + $0x201]] }
 0x122   : > { %v780_v53 = vsel %vm420_vm9, %v778_v51, 0.0  ;;  %v785_v54 = vpop.permute.xlu1 %784  ;;  %v783_v55 = vpop.permute.xlu0 %782 }
 0x123   : > { %v781_v56 = vadd.f32 %v780_v53, %v756_v40  ;;  %v789_v57 = vsel %vm788_vm3, %v785_v54, %v2268_v10  ;;  %v790_v58 = vsel %vm788_vm3, %v783_v55, %v785_v54  ;;  %v791_v59 = vsel %vm788_vm3, %v2268_v10, %v783_v55  ;;  %v2304_v60 = vpop.permute.xlu2 %860 }
 0x124   : > { %v796_v61 = vmul.f32 %v793_v52, %v789_v57  ;;  %v795_v62 = vmul.f32 %v793_v52, %v790_v58  ;;  %v794_v1 = vmul.f32 %v793_v52, %v791_v59  ;;  %v892_v57 = vstv %s1739_s30  ;;  %s1950_s30 = smov 79  }
 0x125   : > { %vm991_vm3 = vcmp.lt.s32.totalorder %v2067_v11, 126 }
 0x126   : > { %v801_v63 = vrot.slane %v796_v61, 6  ;;  %v800_v2 = vrot.slane %v795_v62, 7 }
 0x128   : > { %v802_v3 = vsel %vm372_vm4, %v794_v1, %v800_v2  ;;  %1161 = vrot.lane.b32.xlu1 %v2028_v9, %s1937_s23  ;;  %1159 = vrot.lane.b32.xlu0 %v2026_v8, %s1937_s23 }
 0x129   : > { %v803_v4 = vsel %vm374_vm5, %v802_v3, %v801_v63  ;;  %1163 = vrot.lane.b32.xlu2 %v2024_v7, %s1937_s23  ;;  %s1748_s23 = sld [smem:[#allocation5 + $0x202]] }
 0x12a   : > { %v805_v6 = vadd.f32 %v803_v4, %v781_v56  ;;  %v809_v10 = vpop.permute.xlu1 %808  ;;  %v807_v12 = vpop.permute.xlu0 %806 }
 0x12b   : > { %v813_v13 = vsel %vm812_vm7, %v809_v10, %v2280_v27  ;;  %v814_v14 = vsel %vm812_vm7, %v807_v12, %v809_v10  ;;  %v815_v15 = vsel %vm812_vm7, %v2280_v27, %v807_v12  ;;  %v2314_v16 = vpop.permute.xlu2 %885  ;;  %vm1016_vm7 = vcmp.lt.s32.totalorder %v2067_v11, 125 }
 0x12c   : > { %v820_v17 = vmul.f32 %v817_v5, %v813_v13  ;;  %v819_v19 = vmul.f32 %v817_v5, %v814_v14  ;;  %v818_v18 = vmul.f32 %v817_v5, %v815_v15  ;;  %v917_v14 = vstv %s1740_s8  ;;  %s1951_s8 = smov 78  }
 0x12e   : > { %v825_v20 = vrot.slane %v820_v17, 6  ;;  %v824_v21 = vrot.slane %v819_v19, 7 }
 0x130   : > { %v826_v22 = vsel %vm372_vm4, %v818_v18, %v824_v21  ;;  %1186 = vrot.lane.b32.xlu1 %v2028_v9, %s1938_s2  ;;  %1184 = vrot.lane.b32.xlu0 %v2026_v8, %s1938_s2 }
 0x131   : > { %v827_v23 = vsel %vm374_vm5, %v826_v22, %v825_v20  ;;  %1188 = vrot.lane.b32.xlu2 %v2024_v7, %s1938_s2  ;;  %s1749_s2 = sld [smem:[#allocation5 + $0x203]] }
 0x132   : > { %v829_v25 = vsel %vm470_vm12, %v827_v23, 0.0  ;;  %v834_v26 = vpop.permute.xlu1 %833  ;;  %v832_v27 = vpop.permute.xlu0 %831 }
 0x133   : > { %v830_v30 = vadd.f32 %v829_v25, %v805_v6  ;;  %v838_v31 = vsel %vm837_vm10, %v834_v26, %v2292_v44  ;;  %v839_v32 = vsel %vm837_vm10, %v832_v27, %v834_v26  ;;  %v840_v33 = vsel %vm837_vm10, %v2292_v44, %v832_v27  ;;  %v2326_v34 = vpop.permute.xlu2 %910 }
 0x134   : > { %v845_v28 = vmul.f32 %v842_v24, %v838_v31  ;;  %v844_v35 = vmul.f32 %v842_v24, %v839_v32  ;;  %v843_v37 = vmul.f32 %v842_v24, %v840_v33  ;;  %v942_v32 = vstv %s1741_s10  ;;  %s1952_s10 = smov 77  }
 0x135   : > { %vm1041_vm10 = vcmp.lt.s32.totalorder %v2067_v11, 115 }
 0x136   : > { %v850_v36 = vrot.slane %v845_v28, 6  ;;  %v849_v38 = vrot.slane %v844_v35, 7 }
 0x138   : > { %v851_v39 = vsel %vm372_vm4, %v843_v37, %v849_v38  ;;  %1211 = vrot.lane.b32.xlu1 %v2028_v9, %s1939_s29  ;;  %1209 = vrot.lane.b32.xlu0 %v2026_v8, %s1939_s29 }
 0x139   : > { %v852_v40 = vsel %vm374_vm5, %v851_v39, %v850_v36  ;;  %1213 = vrot.lane.b32.xlu2 %v2024_v7, %s1939_s29  ;;  %s1750_s29 = sld [smem:[#allocation5 + $0x204]] }
 0x13a   : > { %v854_v42 = vsel %vm496_vm14, %v852_v40, 0.0  ;;  %v859_v43 = vpop.permute.xlu1 %858  ;;  %v857_v44 = vpop.permute.xlu0 %856 }
 0x13b   : > { %v855_v45 = vadd.f32 %v854_v42, %v830_v30  ;;  %v863_v46 = vsel %vm862_vm11, %v859_v43, %v2304_v60  ;;  %v864_v47 = vsel %vm862_vm11, %v857_v44, %v859_v43  ;;  %v865_v48 = vsel %vm862_vm11, %v2304_v60, %v857_v44  ;;  %v2338_v49 = vpop.permute.xlu2 %935 }
 0x13c   : > { %v870_v50 = vmul.f32 %v867_v41, %v863_v46  ;;  %v869_v51 = vmul.f32 %v867_v41, %v864_v47  ;;  %v868_v53 = vmul.f32 %v867_v41, %v865_v48  ;;  %v971_v47 = vstv %s1743_s12  ;;  %s1754_s12 = sld [smem:[#allocation5 + $0x281]] }
 0x13d   : > { %vm1066_vm11 = vcmp.lt.s32.totalorder %v2067_v11, 114 }
 0x13e   : > { %v875_v52 = vrot.slane %v870_v50, 6  ;;  %v874_v54 = vrot.slane %v869_v51, 7  ;;  %v957_v50 = vstv %s2372_s13  ;;  %s1755_s13 = sld [smem:[#allocation5 + $0x282]] }
 0x140   : > { %v876_v55 = vsel %vm372_vm4, %v868_v53, %v874_v54  ;;  %1238 = vrot.lane.b32.xlu1 %v2024_v7, %s1940_s7  ;;  %1236 = vrot.lane.b32.xlu0 %v2028_v9, %s1940_s7 }
 0x141   : > { %v877_v56 = vsel %vm374_vm5, %v876_v55, %v875_v52  ;;  %1234 = vrot.lane.b32.xlu2 %v2026_v8, %s1940_s7  ;;  %s1751_s7 = sld [smem:[#allocation5 + $0x205]] }
 0x142   : > { %v879_v58 = vsel %vm522_vm0, %v877_v56, 0.0  ;;  %v884_v59 = vpop.permute.xlu1 %883  ;;  %v882_v60 = vpop.permute.xlu0 %881 }
 0x143   : > { %v880_v61 = vadd.f32 %v879_v58, %v855_v45  ;;  %v888_v62 = vsel %vm887_vm13, %v884_v59, %v2314_v16  ;;  %v889_v63 = vsel %vm887_vm13, %v882_v60, %v884_v59  ;;  %v890_v1 = vsel %vm887_vm13, %v2314_v16, %v882_v60  ;;  %v2350_v2 = vpop.permute.xlu2 %964  ;;  %v1859_v59 = vld [vmem:[#allocation2] sm:$0x7] }
 0x144   : > { %v895_v3 = vmul.f32 %v892_v57, %v888_v62  ;;  %v894_v4 = vmul.f32 %v892_v57, %v889_v63  ;;  %v893_v6 = vmul.f32 %v892_v57, %v890_v1  ;;  %v958_v60 = vmul.f32 %v1859_v59, %v957_v50 }
 0x145   : > { %vm1091_vm13 = vcmp.lt.s32.totalorder %v2067_v11, 113 }
 0x146   : > { %v900_v5 = vrot.slane %v895_v3, 6  ;;  %v899_v10 = vrot.slane %v894_v4, 7  ;;  %v996_v4 = vstv %s1744_s15  ;;  %s1757_s15 = sld [smem:[#allocation5 + $0x284]] }
 0x148   : > { %v901_v12 = vsel %vm372_vm4, %v893_v6, %v899_v10  ;;  %1263 = vrot.lane.b32.xlu1 %v2024_v7, %s1941_s9  ;;  %1261 = vrot.lane.b32.xlu0 %v2028_v9, %s1941_s9 }
 0x149   : > { %v902_v13 = vsel %vm374_vm5, %v901_v12, %v900_v5  ;;  %1259 = vrot.lane.b32.xlu2 %v2026_v8, %s1941_s9  ;;  %s1752_s9 = sld [smem:[#allocation5 + $0x206]] }
 0x14a   : > { %v904_v15 = vsel %vm366_vm6, %v902_v13, 0.0  ;;  %v909_v16 = vpop.permute.xlu1 %908  ;;  %v907_v17 = vpop.permute.xlu0 %906 }
 0x14b   : > { %v905_v19 = vadd.f32 %v904_v15, %v880_v61  ;;  %v913_v20 = vsel %vm912_vm15, %v909_v16, %v2326_v34  ;;  %v914_v18 = vsel %vm912_vm15, %v907_v17, %v909_v16  ;;  %v915_v21 = vsel %vm912_vm15, %v2326_v34, %v907_v17  ;;  %v2362_v22 = vpop.permute.xlu2 %989 }
 0x14c   : > { %v920_v23 = vmul.f32 %v917_v14, %v913_v20  ;;  %v919_v24 = vmul.f32 %v917_v14, %v914_v18  ;;  %v918_v26 = vmul.f32 %v917_v14, %v915_v21  ;;  %vm1116_vm15 = vcmp.lt.s32.totalorder %v2067_v11, 112 }
 0x14e   : > { %v925_v25 = vrot.slane %v920_v23, 6  ;;  %v924_v27 = vrot.slane %v919_v24, 7 }
 0x150   : > { %v926_v30 = vsel %vm372_vm4, %v918_v26, %v924_v27  ;;  %1288 = vrot.lane.b32.xlu1 %v2024_v7, %s1942_s11  ;;  %1286 = vrot.lane.b32.xlu0 %v2028_v9, %s1942_s11 }
 0x151   : > { %v927_v31 = vsel %vm374_vm5, %v926_v30, %v925_v25  ;;  %1284 = vrot.lane.b32.xlu2 %v2026_v8, %s1942_s11  ;;  %v1021_v25 = vstv %s1745_s17  ;;  %s1753_s11 = sld [smem:[#allocation5 + $0x280]] }
 0x152   : > { %v929_v33 = vsel %vm394_vm8, %v927_v31, 0.0  ;;  %v934_v34 = vpop.permute.xlu1 %933  ;;  %v932_v28 = vpop.permute.xlu0 %931  ;;  %s1759_s17 = sld [smem:[#allocation5 + $0x286]] }
 0x153   : > { %v930_v35 = vadd.f32 %v929_v33, %v905_v19  ;;  %v938_v36 = vsel %vm937_vm1, %v934_v34, %v2338_v49  ;;  %v939_v37 = vsel %vm937_vm1, %v932_v28, %v934_v34  ;;  %v940_v38 = vsel %vm937_vm1, %v2338_v49, %v932_v28  ;;  %v2376_v39 = vpop.permute.xlu2 %1014 }
 0x154   : > { %v945_v40 = vmul.f32 %v942_v32, %v938_v36  ;;  %v944_v41 = vmul.f32 %v942_v32, %v939_v37  ;;  %v943_v43 = vmul.f32 %v942_v32, %v940_v38  ;;  %vm1140_vm1 = vcmp.lt.s32.totalorder %v2067_v11, 111 }
 0x156   : > { %v950_v42 = vrot.slane %v945_v40, 6  ;;  %v949_v44 = vrot.slane %v944_v41, 7 }
 0x158   : > { %v951_v45 = vsel %vm372_vm4, %v943_v43, %v949_v44  ;;  %1312 = vrot.lane.b32.xlu1 %v2024_v7, %s1943_s14  ;;  %1310 = vrot.lane.b32.xlu0 %v2028_v9, %s1943_s14 }
 0x159   : > { %v952_v46 = vsel %vm374_vm5, %v951_v45, %v950_v42  ;;  %1308 = vrot.lane.b32.xlu2 %v2026_v8, %s1943_s14  ;;  %v1046_v42 = vstv %s1746_s19  ;;  %s1756_s14 = sld [smem:[#allocation5 + $0x283]] }
 0x15a   : > { %v954_v48 = vsel %vm420_vm9, %v952_v46, 0.0  ;;  %v963_v49 = vpop.permute.xlu1 %962  ;;  %v961_v51 = vpop.permute.xlu0 %960  ;;  %s1761_s19 = sld [smem:[#allocation5 + $0x301]] }
 0x15b   : > { %v955_v52 = vadd.f32 %v954_v48, %v930_v35  ;;  %v967_v53 = vsel %vm966_vm2, %v963_v49, %v2350_v2  ;;  %v968_v54 = vsel %vm966_vm2, %v961_v51, %v963_v49  ;;  %v969_v55 = vsel %vm966_vm2, %v2350_v2, %v961_v51  ;;  %v2389_v56 = vpop.permute.xlu2 %1039 }
 0x15c   : > { %v973_v57 = vmul.f32 %v971_v47, %v967_v53  ;;  %v974_v58 = vmul.f32 %v971_v47, %v969_v55  ;;  %v972_v62 = vmul.f32 %v971_v47, %v968_v54  ;;  %vm1165_vm2 = vcmp.lt.s32.totalorder %v2067_v11, 110 }
 0x15d   : > { %v959_v3 = vadd.f32 %v958_v60, %v955_v52 }
 0x15e   : > { %v978_v61 = vrot.slane %v973_v57, 7  ;;  %v979_v63 = vrot.slane %v974_v58, 6  ;;  %v1071_v58 = vstv %s1747_s21  ;;  %s2586_s21 = sld [smem:[#allocation5 + $0x304]] }
 0x160   : > { %v980_v1 = vsel %vm372_vm4, %v972_v62, %v978_v61  ;;  %1337 = vrot.lane.b32.xlu1 %v2024_v7, %s1944_s16  ;;  %1335 = vrot.lane.b32.xlu0 %v2028_v9, %s1944_s16 }
 0x161   : > { %v981_v2 = vsel %vm374_vm5, %v980_v1, %v979_v63  ;;  %1333 = vrot.lane.b32.xlu2 %v2026_v8, %s1944_s16  ;;  %s1758_s16 = sld [smem:[#allocation5 + $0x285]] }
 0x162   : > { %v983_v5 = vsel %vm470_vm12, %v981_v2, 0.0  ;;  %v988_v6 = vpop.permute.xlu1 %987  ;;  %v986_v10 = vpop.permute.xlu0 %985 }
 0x163   : > { %v984_v12 = vadd.f32 %v983_v5, %v959_v3  ;;  %v992_v13 = vsel %vm991_vm3, %v988_v6, %v2362_v22  ;;  %v993_v14 = vsel %vm991_vm3, %v986_v10, %v988_v6  ;;  %v994_v15 = vsel %vm991_vm3, %v2362_v22, %v986_v10  ;;  %v2401_v16 = vpop.permute.xlu2 %1064 }
 0x164   : > { %v998_v17 = vmul.f32 %v996_v4, %v992_v13  ;;  %v999_v19 = vmul.f32 %v996_v4, %v994_v15  ;;  %v997_v18 = vmul.f32 %v996_v4, %v993_v14  ;;  %v1096_v14 = vstv %s1748_s23  ;;  %s2616_s23 = sld [smem:[#allocation5 + $0x305]] }
 0x165   : > { %vm1190_vm3 = vcmp.lt.s32.totalorder %v2067_v11, 109 }
 0x166   : > { %v1003_v20 = vrot.slane %v998_v17, 7  ;;  %v1004_v21 = vrot.slane %v999_v19, 6 }
 0x168   : > { %v1005_v23 = vsel %vm372_vm4, %v997_v18, %v1003_v20  ;;  %1362 = vrot.lane.b32.xlu1 %v2024_v7, %s1945_s18  ;;  %1360 = vrot.lane.b32.xlu0 %v2028_v9, %s1945_s18 }
 0x169   : > { %v1006_v24 = vsel %vm374_vm5, %v1005_v23, %v1004_v21  ;;  %1358 = vrot.lane.b32.xlu2 %v2026_v8, %s1945_s18  ;;  %s1760_s18 = sld [smem:[#allocation5 + $0x300]] }
 0x16a   : > { %v1008_v22 = vsel %vm496_vm14, %v1006_v24, 0.0  ;;  %v1013_v26 = vpop.permute.xlu1 %1012  ;;  %v1011_v27 = vpop.permute.xlu0 %1010 }
 0x16b   : > { %v1009_v30 = vadd.f32 %v1008_v22, %v984_v12  ;;  %v1017_v31 = vsel %vm1016_vm7, %v1013_v26, %v2376_v39  ;;  %v1018_v32 = vsel %vm1016_vm7, %v1011_v27, %v1013_v26  ;;  %v1019_v33 = vsel %vm1016_vm7, %v2376_v39, %v1011_v27  ;;  %v2413_v34 = vpop.permute.xlu2 %1089 }
 0x16c   : > { %v1023_v28 = vmul.f32 %v1021_v25, %v1017_v31  ;;  %v1024_v35 = vmul.f32 %v1021_v25, %v1019_v33  ;;  %v1022_v37 = vmul.f32 %v1021_v25, %v1018_v32  ;;  %v1121_v32 = vstv %s1749_s2  ;;  %s1769_s2 = sshll.u32 %s2710_s25, 3 }
 0x16d   : > { %vm1215_vm7 = vcmp.lt.s32.totalorder %v2067_v11, 99 }
 0x16e   : > { %v1028_v36 = vrot.slane %v1023_v28, 7  ;;  %v1029_v38 = vrot.slane %v1024_v35, 6 }
 0x170   : > { %v1030_v40 = vsel %vm372_vm4, %v1022_v37, %v1028_v36  ;;  %1387 = vrot.lane.b32.xlu1 %v2024_v7, %s1946_s20  ;;  %1385 = vrot.lane.b32.xlu0 %v2028_v9, %s1946_s20 }
 0x171   : > { %v1031_v41 = vsel %vm374_vm5, %v1030_v40, %v1029_v38  ;;  %1383 = vrot.lane.b32.xlu2 %v2026_v8, %s1946_s20  ;;  %s2562_s20 = sld [smem:[#allocation5 + $0x302]] }
 0x172   : > { %v1033_v39 = vsel %vm522_vm0, %v1031_v41, 0.0  ;;  %v1038_v43 = vpop.permute.xlu1 %1037  ;;  %v1036_v44 = vpop.permute.xlu0 %1035 }
 0x173   : > { %v1034_v45 = vadd.f32 %v1033_v39, %v1009_v30  ;;  %v1042_v46 = vsel %vm1041_vm10, %v1038_v43, %v2389_v56  ;;  %v1043_v47 = vsel %vm1041_vm10, %v1036_v44, %v1038_v43  ;;  %v1044_v48 = vsel %vm1041_vm10, %v2389_v56, %v1036_v44  ;;  %v2425_v49 = vpop.permute.xlu2 %1114 }
 0x174   : > { %v1048_v50 = vmul.f32 %v1046_v42, %v1042_v46  ;;  %v1049_v51 = vmul.f32 %v1046_v42, %v1044_v48  ;;  %v1047_v53 = vmul.f32 %v1046_v42, %v1043_v47  ;;  %v1145_v47 = vstv %s1750_s29 }
 0x175   : > { %vm1240_vm10 = vcmp.lt.s32.totalorder %v2067_v11, 98 }
 0x176   : > { %v1053_v52 = vrot.slane %v1048_v50, 7  ;;  %v1054_v54 = vrot.slane %v1049_v51, 6 }
 0x178   : > { %v1055_v55 = vsel %vm372_vm4, %v1047_v53, %v1053_v52  ;;  %1412 = vrot.lane.b32.xlu1 %v2024_v7, %s1947_s22  ;;  %1410 = vrot.lane.b32.xlu0 %v2028_v9, %s1947_s22 }
 0x179   : > { %v1056_v57 = vsel %vm374_vm5, %v1055_v55, %v1054_v54  ;;  %1408 = vrot.lane.b32.xlu2 %v2026_v8, %s1947_s22  ;;  %s2594_s22 = sld [smem:[#allocation5 + $0x303]] }
 0x17a   : > { %v1058_v56 = vsel %vm366_vm6, %v1056_v57, 0.0  ;;  %v1063_v59 = vpop.permute.xlu1 %1062  ;;  %v1061_v60 = vpop.permute.xlu0 %1060 }
 0x17b   : > { %v1059_v61 = vadd.f32 %v1058_v56, %v1034_v45  ;;  %v1067_v62 = vsel %vm1066_vm11, %v1063_v59, %v2401_v16  ;;  %v1068_v63 = vsel %vm1066_vm11, %v1061_v60, %v1063_v59  ;;  %v1069_v1 = vsel %vm1066_vm11, %v2401_v16, %v1061_v60  ;;  %v2437_v3 = vpop.permute.xlu2 %1138 }
 0x17c   : > { %v1073_v2 = vmul.f32 %v1071_v58, %v1067_v62  ;;  %v1074_v4 = vmul.f32 %v1071_v58, %v1069_v1  ;;  %v1072_v6 = vmul.f32 %v1071_v58, %v1068_v63  ;;  %v1170_v62 = vstv %s1751_s7 }
 0x17d   : > { %vm1265_vm11 = vcmp.lt.s32.totalorder %v2067_v11, 97 }
 0x17e   : > { %v1078_v5 = vrot.slane %v1073_v2, 7  ;;  %v1079_v10 = vrot.slane %v1074_v4, 6 }
 0x180   : > { %v1080_v12 = vsel %vm372_vm4, %v1072_v6, %v1078_v5  ;;  %1437 = vrot.lane.b32.xlu1 %v2024_v7, %s1948_s24  ;;  %1435 = vrot.lane.b32.xlu0 %v2028_v9, %s1948_s24 }
 0x181   : > { %v1081_v13 = vsel %vm374_vm5, %v1080_v12, %v1079_v10  ;;  %1433 = vrot.lane.b32.xlu2 %v2026_v8, %s1948_s24  ;;  %s2653_s24 = sld [smem:[#allocation5 + $0x306]] }
 0x182   : > { %v1083_v15 = vsel %vm394_vm8, %v1081_v13, 0.0  ;;  %v1088_v16 = vpop.permute.xlu1 %1087  ;;  %v1086_v17 = vpop.permute.xlu0 %1085 }
 0x183   : > { %v1084_v19 = vadd.f32 %v1083_v15, %v1059_v61  ;;  %v1092_v20 = vsel %vm1091_vm13, %v1088_v16, %v2413_v34  ;;  %v1093_v18 = vsel %vm1091_vm13, %v1086_v17, %v1088_v16  ;;  %v1094_v21 = vsel %vm1091_vm13, %v2413_v34, %v1086_v17  ;;  %v2449_v23 = vpop.permute.xlu2 %1163 }
 0x184   : > { %v1098_v24 = vmul.f32 %v1096_v14, %v1092_v20  ;;  %v1099_v25 = vmul.f32 %v1096_v14, %v1094_v21  ;;  %v1097_v26 = vmul.f32 %v1096_v14, %v1093_v18  ;;  %v1195_v20 = vstv %s1752_s9  ;;  %s320_s9 = scalar_lea.vmem %s2704_s6, %s1769_s2 }
 0x185   : > { %vm1290_vm13 = vcmp.lt.s32.totalorder %v2067_v11, 96 }
 0x186   : > { %v1103_v22 = vrot.slane %v1098_v24, 7  ;;  %v1104_v27 = vrot.slane %v1099_v25, 6 }
 0x188   : > { %v1105_v30 = vsel %vm372_vm4, %v1097_v26, %v1103_v22  ;;  %1462 = vrot.lane.b32.xlu1 %v2024_v7, %s1949_s28  ;;  %1460 = vrot.lane.b32.xlu0 %v2028_v9, %s1949_s28 }
 0x189   : > { %v1106_v31 = vsel %vm374_vm5, %v1105_v30, %v1104_v27  ;;  %1458 = vrot.lane.b32.xlu2 %v2026_v8, %s1949_s28 }
 0x18a   : > { %v1108_v33 = vsel %vm420_vm9, %v1106_v31, 0.0  ;;  %v1113_v34 = vpop.permute.xlu1 %1112  ;;  %v1111_v28 = vpop.permute.xlu0 %1110 }
 0x18b   : > { %v1109_v35 = vadd.f32 %v1108_v33, %v1084_v19  ;;  %v1117_v36 = vsel %vm1116_vm15, %v1113_v34, %v2425_v49  ;;  %v1118_v37 = vsel %vm1116_vm15, %v1111_v28, %v1113_v34  ;;  %v1119_v38 = vsel %vm1116_vm15, %v2425_v49, %v1111_v28  ;;  %v2461_v40 = vpop.permute.xlu2 %1188 }
 0x18c   : > { %v1123_v41 = vmul.f32 %v1121_v32, %v1117_v36  ;;  %v1124_v42 = vmul.f32 %v1121_v32, %v1119_v38  ;;  %v1122_v43 = vmul.f32 %v1121_v32, %v1118_v37  ;;  %v1220_v34 = vstv %s1753_s11 }
 0x18d   : > { %vm1314_vm15 = vcmp.lt.s32.totalorder %v2067_v11, 95 }
 0x18e   : > { %v1128_v39 = vrot.slane %v1123_v41, 7  ;;  %v1129_v44 = vrot.slane %v1124_v42, 6 }
 0x190   : > { %v1130_v45 = vsel %vm372_vm4, %v1122_v43, %v1128_v39  ;;  %1486 = vrot.lane.b32.xlu1 %v2024_v7, %s1950_s30  ;;  %1484 = vrot.lane.b32.xlu0 %v2028_v9, %s1950_s30 }
 0x191   : > { %v1131_v46 = vsel %vm374_vm5, %v1130_v45, %v1129_v44  ;;  %1482 = vrot.lane.b32.xlu2 %v2026_v8, %s1950_s30  ;;  %s311_s30 = scalar_lea.vmem %s2703_s5, %s1769_s2 }
 0x192   : > { %v1133_v48 = vadd.f32 %v1131_v46, %v1109_v35  ;;  %v1137_v49 = vpop.permute.xlu1 %1136  ;;  %v1135_v50 = vpop.permute.xlu0 %1134 }
 0x193   : > { %v1141_v51 = vsel %vm1140_vm1, %v1137_v49, %v2437_v3  ;;  %v1142_v52 = vsel %vm1140_vm1, %v1135_v50, %v1137_v49  ;;  %v1143_v53 = vsel %vm1140_vm1, %v2437_v3, %v1135_v50  ;;  %v1214_v54 = vpop.permute.xlu2 %1213  ;;  %v1245_v49 = vstv %s1754_s12 }
 0x194   : > { %v1147_v55 = vmul.f32 %v1145_v47, %v1141_v51  ;;  %v1148_v57 = vmul.f32 %v1145_v47, %v1143_v53  ;;  %v1146_v56 = vmul.f32 %v1145_v47, %v1142_v52  ;;  %vm1339_vm1 = vcmp.lt.s32.totalorder %v2067_v11, 94 }
 0x196   : > { %v1152_v58 = vrot.slane %v1147_v55, 7  ;;  %v1153_v59 = vrot.slane %v1148_v57, 6 }
 0x198   : > { %v1154_v60 = vsel %vm372_vm4, %v1146_v56, %v1152_v58  ;;  %1511 = vrot.lane.b32.xlu1 %v2024_v7, %s1951_s8  ;;  %1509 = vrot.lane.b32.xlu0 %v2028_v9, %s1951_s8 }
 0x199   : > { %v1155_v61 = vsel %vm374_vm5, %v1154_v60, %v1153_v59  ;;  %1507 = vrot.lane.b32.xlu2 %v2026_v8, %s1951_s8 }
 0x19a   : > { %v1157_v63 = vsel %vm470_vm12, %v1155_v61, 0.0  ;;  %v1162_v1 = vpop.permute.xlu1 %1161  ;;  %v1160_v3 = vpop.permute.xlu0 %1159 }
 0x19b   : > { %v1158_v2 = vadd.f32 %v1157_v63, %v1133_v48  ;;  %v1166_v4 = vsel %vm1165_vm2, %v1162_v1, %v2449_v23  ;;  %v1167_v5 = vsel %vm1165_vm2, %v1160_v3, %v1162_v1  ;;  %v1168_v6 = vsel %vm1165_vm2, %v2449_v23, %v1160_v3  ;;  %v1235_v10 = vpop.permute.xlu2 %1234 }
 0x19c   : > { %v1172_v12 = vmul.f32 %v1170_v62, %v1166_v4  ;;  %v1173_v13 = vmul.f32 %v1170_v62, %v1168_v6  ;;  %v1171_v15 = vmul.f32 %v1170_v62, %v1167_v5  ;;  %v1270_v3 = vstv %s1755_s13 }
 0x19d   : > { %vm1364_vm2 = vcmp.lt.s32.totalorder %v2067_v11, 93 }
 0x19e   : > { %v1177_v14 = vrot.slane %v1172_v12, 7  ;;  %v1178_v16 = vrot.slane %v1173_v13, 6 }
 0x1a0   : > { %v1179_v17 = vsel %vm372_vm4, %v1171_v15, %v1177_v14  ;;  %1536 = vrot.lane.b32.xlu1 %v2024_v7, %s1952_s10  ;;  %1534 = vrot.lane.b32.xlu0 %v2028_v9, %s1952_s10 }
 0x1a1   : > { %v1180_v19 = vsel %vm374_vm5, %v1179_v17, %v1178_v16  ;;  %1532 = vrot.lane.b32.xlu2 %v2026_v8, %s1952_s10 }
 0x1a2   : > { %v1182_v18 = vsel %vm496_vm14, %v1180_v19, 0.0  ;;  %v1187_v21 = vpop.permute.xlu1 %1186  ;;  %v1185_v23 = vpop.permute.xlu0 %1184 }
 0x1a3   : > { %v1183_v24 = vadd.f32 %v1182_v18, %v1158_v2  ;;  %v1191_v25 = vsel %vm1190_vm3, %v1187_v21, %v2461_v40  ;;  %v1192_v22 = vsel %vm1190_vm3, %v1185_v23, %v1187_v21  ;;  %v1193_v7 = vsel %vm1190_vm3, %v2461_v40, %v1185_v23  ;;  %v1260_v9 = vpop.permute.xlu2 %1259 }
 0x1a4   : > { %v1197_v26 = vmul.f32 %v1195_v20, %v1191_v25  ;;  %v1198_v27 = vmul.f32 %v1195_v20, %v1193_v7  ;;  %v1196_v31 = vmul.f32 %v1195_v20, %v1192_v22  ;;  %vm1389_vm3 = vcmp.lt.s32.totalorder %v2067_v11, 83 }
 0x1a6   : > { %v1202_v30 = vrot.slane %v1197_v26, 7  ;;  %v1203_v32 = vrot.slane %v1198_v27, 6 }
 0x1a8   : > { %v1204_v33 = vsel %vm372_vm4, %v1196_v31, %v1202_v30 }
 0x1a9   : > { %v1205_v8 = vsel %vm374_vm5, %v1204_v33, %v1203_v32 }
 0x1aa   : > { %v1207_v28 = vsel %vm522_vm0, %v1205_v8, 0.0  ;;  %v1212_v35 = vpop.permute.xlu1 %1211  ;;  %v1210_v36 = vpop.permute.xlu0 %1209 }
 0x1ab   : > { %v1208_v37 = vadd.f32 %v1207_v28, %v1183_v24  ;;  %v1216_v38 = vsel %vm1215_vm7, %v1212_v35, %v1214_v54  ;;  %v1217_v40 = vsel %vm1215_vm7, %v1210_v36, %v1212_v35  ;;  %v1218_v41 = vsel %vm1215_vm7, %v1214_v54, %v1210_v36  ;;  %v2496_v42 = vpop.permute.xlu2 %1284 }
 0x1ac   : > { %v1222_v39 = vmul.f32 %v1220_v34, %v1216_v38  ;;  %v1223_v43 = vmul.f32 %v1220_v34, %v1218_v41  ;;  %v1221_v45 = vmul.f32 %v1220_v34, %v1217_v40  ;;  %v1295_v36 = vstv %s1756_s14 }
 0x1ad   : > { %v1319_v41 = vstv %s1757_s15  ;;  %vm1414_vm7 = vcmp.lt.s32.totalorder %v2067_v11, 82 }
 0x1ae   : > { %v1227_v44 = vrot.slane %v1222_v39, 7  ;;  %v1228_v46 = vrot.slane %v1223_v43, 6 }
 0x1b0   : > { %v1229_v47 = vsel %vm372_vm4, %v1221_v45, %v1227_v44 }
 0x1b1   : > { %v1230_v48 = vsel %vm374_vm5, %v1229_v47, %v1228_v46 }
 0x1b2   : > { %v1232_v50 = vsel %vm366_vm6, %v1230_v48, 0.0  ;;  %v1239_v51 = vpop.permute.xlu1 %1238  ;;  %v1237_v52 = vpop.permute.xlu0 %1236 }
 0x1b3   : > { %v1233_v53 = vadd.f32 %v1232_v50, %v1208_v37  ;;  %v1243_v54 = vsel %vm1240_vm10, %v1239_v51, %v1235_v10  ;;  %v1241_v55 = vsel %vm1240_vm10, %v1237_v52, %v1239_v51  ;;  %v1242_v57 = vsel %vm1240_vm10, %v1235_v10, %v1237_v52  ;;  %v1309_v59 = vpop.permute.xlu2 %1308 }
 0x1b4   : > { %v1248_v58 = vmul.f32 %v1245_v49, %v1243_v54  ;;  %v1247_v56 = vmul.f32 %v1245_v49, %v1241_v55  ;;  %v1246_v61 = vmul.f32 %v1245_v49, %v1242_v57  ;;  %v1344_v54 = vstv %s1758_s16 }
 0x1b5   : > { %vm1439_vm10 = vcmp.lt.s32.totalorder %v2067_v11, 81 }
 0x1b6   : > { %v1253_v60 = vrot.slane %v1248_v58, 6  ;;  %v1252_v62 = vrot.slane %v1247_v56, 7 }
 0x1b8   : > { %v1254_v63 = vsel %vm372_vm4, %v1246_v61, %v1252_v62 }
 0x1b9   : > { %v1255_v1 = vsel %vm374_vm5, %v1254_v63, %v1253_v60  ;;  %v1369_v60 = vstv %s1759_s17 }
 0x1ba   : > { %v1257_v2 = vsel %vm394_vm8, %v1255_v1, 0.0  ;;  %v1264_v4 = vpop.permute.xlu1 %1263  ;;  %v1262_v5 = vpop.permute.xlu0 %1261 }
 0x1bb   : > { %v1258_v6 = vadd.f32 %v1257_v2, %v1233_v53  ;;  %v1268_v10 = vsel %vm1265_vm11, %v1264_v4, %v1260_v9  ;;  %v1266_v12 = vsel %vm1265_vm11, %v1262_v5, %v1264_v4  ;;  %v1267_v13 = vsel %vm1265_vm11, %v1260_v9, %v1262_v5  ;;  %v2508_v20 = vpop.permute.xlu2 %1333 }
 0x1bc   : > { %v1273_v14 = vmul.f32 %v1270_v3, %v1268_v10  ;;  %v1272_v15 = vmul.f32 %v1270_v3, %v1266_v12  ;;  %v1271_v17 = vmul.f32 %v1270_v3, %v1267_v13  ;;  %vm1488_vm11 = vcmp.lt.s32.totalorder %v2067_v11, 79 }
 0x1be   : > { %v1278_v16 = vrot.slane %v1273_v14, 6  ;;  %v1277_v19 = vrot.slane %v1272_v15, 7 }
 0x1c0   : > { %v1279_v18 = vsel %vm372_vm4, %v1271_v17, %v1277_v19 }
 0x1c1   : > { %v1280_v21 = vsel %vm374_vm5, %v1279_v18, %v1278_v16 }
 0x1c2   : > { %v1282_v23 = vsel %vm420_vm9, %v1280_v21, 0.0  ;;  %v1289_v24 = vpop.permute.xlu1 %1288  ;;  %v1287_v25 = vpop.permute.xlu0 %1286 }
 0x1c3   : > { %v2514_v22 = vadd.f32 %v1282_v23, %v1258_v6  ;;  %v2516_v7 = vpop.permute.xlu2 %1358  ;;  %v1291_v37 = vsel %vm1290_vm13, %v1287_v25, %v1289_v24  ;;  %v1293_v43 = vsel %vm1290_vm13, %v1289_v24, %v2496_v42  ;;  %v1292_v48 = vsel %vm1290_vm13, %v2496_v42, %v1287_v25 }
 0x1c4   : > { %v1297_v44 = vmul.f32 %v1295_v36, %v1291_v37  ;;  %v1298_v47 = vmul.f32 %v1295_v36, %v1293_v43  ;;  %v1296_v56 = vmul.f32 %v1295_v36, %v1292_v48  ;;  %v1394_v6 = vstv %s1760_s18 }
 0x1c5   : > { %vm1464_vm13 = vcmp.lt.s32.totalorder %v2067_v11, 80 }
 0x1c6   : > { %v1302_v49 = vrot.slane %v1297_v44, 7  ;;  %v1303_v42 = vrot.slane %v1298_v47, 6 }
 0x1ca   : > { %v1313_v9 = vpop.permute.xlu1 %1312  ;;  %v1311_v26 = vpop.permute.xlu0 %1310 }
 0x1cb   : > { %v2518_v31 = vpop.permute.xlu2 %1383  ;;  %v1315_v39 = vsel %vm1314_vm15, %v1311_v26, %v1313_v9  ;;  %v1317_v45 = vsel %vm1314_vm15, %v1313_v9, %v1309_v59  ;;  %v1316_v51 = vsel %vm1314_vm15, %v1309_v59, %v1311_v26  ;;  %v1304_v59 = vsel %vm372_vm4, %v1296_v56, %v1302_v49 }
 0x1cc   : > { %v1321_v46 = vmul.f32 %v1319_v41, %v1315_v39  ;;  %v1322_v50 = vmul.f32 %v1319_v41, %v1317_v45  ;;  %v1320_v61 = vmul.f32 %v1319_v41, %v1316_v51  ;;  %v1305_v12 = vsel %vm374_vm5, %v1304_v59, %v1303_v42 }
 0x1cd   : > { %v1444_v39 = vstv %s2562_s20  ;;  %v1493_v42 = vstv %s2586_s21  ;;  %vm1513_vm15 = vcmp.lt.s32.totalorder %v2067_v11, 78 }
 0x1ce   : > { %v1326_v53 = vrot.slane %v1321_v46, 7  ;;  %v1327_v63 = vrot.slane %v1322_v50, 6 }
 0x1d0   : > { %v1328_v2 = vsel %vm372_vm4, %v1320_v61, %v1326_v53 }
 0x1d1   : > { %v1329_v15 = vsel %vm374_vm5, %v1328_v2, %v1327_v63  ;;  %v1469_v63 = vstv %s2594_s22 }
 0x1d2   : > { %v1338_v27 = vpop.permute.xlu1 %1337  ;;  %v1336_v30 = vpop.permute.xlu0 %1335 }
 0x1d3   : > { %v2520_v8 = vpop.permute.xlu2 %1408  ;;  %v1340_v55 = vsel %vm1339_vm1, %v1336_v30, %v1338_v27  ;;  %v1342_v1 = vsel %vm1339_vm1, %v1338_v27, %v2508_v20  ;;  %v1341_v14 = vsel %vm1339_vm1, %v2508_v20, %v1336_v30  ;;  %v1307_v20 = vadd.f32 %v1305_v12, %v2514_v22 }
 0x1d4   : > { %v1346_v3 = vmul.f32 %v1344_v54, %v1340_v55  ;;  %v1347_v13 = vmul.f32 %v1344_v54, %v1342_v1  ;;  %v1345_v25 = vmul.f32 %v1344_v54, %v1341_v14  ;;  %v1419_v27 = vstv %s1761_s19 }
 0x1d6   : > { %v1351_v16 = vrot.slane %v1346_v3, 7  ;;  %v1352_v26 = vrot.slane %v1347_v13, 6 }
 0x1da   : > { %v1363_v32 = vpop.permute.xlu1 %1362  ;;  %v1361_v33 = vpop.permute.xlu0 %1360 }
 0x1db   : > { %v2525_v35 = vpop.permute.xlu2 %1433  ;;  %v1365_v62 = vsel %vm1364_vm2, %v1361_v33, %v1363_v32  ;;  %v1367_v4 = vsel %vm1364_vm2, %v1363_v32, %v2516_v7  ;;  %v1366_v19 = vsel %vm1364_vm2, %v2516_v7, %v1361_v33  ;;  %v1331_v7 = vsel %vm470_vm12, %v1329_v15, 0.0 }
 0x1dc   : > { %v1371_v5 = vmul.f32 %v1369_v60, %v1365_v62  ;;  %v1372_v17 = vmul.f32 %v1369_v60, %v1367_v4  ;;  %v1353_v32 = vsel %vm372_vm4, %v1345_v25, %v1351_v16  ;;  %v1370_v33 = vmul.f32 %v1369_v60, %v1366_v19 }
 0x1dd   : > { %v1332_v47 = vadd.f32 %v1331_v7, %v1307_v20  ;;  %v1354_v48 = vsel %vm374_vm5, %v1353_v32, %v1352_v26  ;;  %v1518_v20 = vstv %s2616_s23 }
 0x1de   : > { %v1376_v9 = vrot.slane %v1371_v5, 7  ;;  %v1377_v37 = vrot.slane %v1372_v17, 6 }
 0x1e0   : > { %v1378_v44 = vsel %vm372_vm4, %v1370_v33, %v1376_v9 }
 0x1e2   : > { %v1388_v34 = vpop.permute.xlu1 %1387  ;;  %v2522_v28 = vpop.permute.xlu0 %1385 }
 0x1e3   : > { %v2548_v52 = vpop.permute.xlu2 %1458  ;;  %v1390_v10 = vsel %vm1389_vm3, %v2522_v28, %v1388_v34  ;;  %v1392_v18 = vsel %vm1389_vm3, %v1388_v34, %v2518_v31  ;;  %v1391_v36 = vsel %vm1389_vm3, %v2518_v31, %v2522_v28 }
 0x1e4   : > { %v1396_v21 = vmul.f32 %v1394_v6, %v1390_v10  ;;  %v1397_v34 = vmul.f32 %v1394_v6, %v1392_v18  ;;  %v1395_v31 = vmul.f32 %v1394_v6, %v1391_v36 }
 0x1e6   : > { %v1401_v41 = vrot.slane %v1396_v21, 7  ;;  %v1402_v28 = vrot.slane %v1397_v34, 6 }
 0x1e8   : > { %v1403_v51 = vsel %vm372_vm4, %v1395_v31, %v1401_v41 }
 0x1e9   : > { %v1404_v1 = vsel %vm374_vm5, %v1403_v51, %v1402_v28 }
 0x1ea   : > { %v2530_v38 = vpop.permute.xlu1 %1412  ;;  %v2532_v40 = vpop.permute.xlu0 %1410  ;;  %v1406_v16 = vsel %vm366_vm6, %v1404_v1, 0.0  ;;  %vm1538_vm6 = vcmp.lt.s32.totalorder %v2067_v11, 77 }
 0x1eb   : > { %v1415_v30 = vsel %vm1414_vm7, %v2532_v40, %v2530_v38  ;;  %v1483_v22 = vpop.permute.xlu2 %1482  ;;  %v1417_v45 = vsel %vm1414_vm7, %v2530_v38, %v2520_v8  ;;  %v1379_v38 = vsel %vm374_vm5, %v1378_v44, %v1377_v37  ;;  %v1416_v54 = vsel %vm1414_vm7, %v2520_v8, %v2532_v40 }
 0x1ec   : > { %v1421_v46 = vmul.f32 %v1419_v27, %v1415_v30  ;;  %v1422_v53 = vmul.f32 %v1419_v27, %v1417_v45  ;;  %v1381_v40 = vsel %vm522_vm0, %v1379_v38, 0.0  ;;  %v1420_v3 = vmul.f32 %v1419_v27, %v1416_v54 }
 0x1ee   : > { %v1426_v60 = vrot.slane %v1421_v46, 7  ;;  %v1427_v5 = vrot.slane %v1422_v53, 6  ;;  %v1543_v53 = vstv %s2653_s24 }
 0x1f2   : > { %v1438_v57 = vpop.permute.xlu1 %1437  ;;  %v2552_v58 = vpop.permute.xlu0 %1435 }
 0x1f3   : > { %v1440_v43 = vsel %vm1439_vm10, %v2552_v58, %v1438_v57  ;;  %v1442_v49 = vsel %vm1439_vm10, %v1438_v57, %v2525_v35  ;;  %v1356_v57 = vsel %vm496_vm14, %v1354_v48, 0.0  ;;  %v1441_v59 = vsel %vm1439_vm10, %v2525_v35, %v2552_v58  ;;  %v1508_v35 = vpop.permute.xlu2 %1507 }
 0x1f4   : > { %v1446_v50 = vmul.f32 %v1444_v39, %v1440_v43  ;;  %v1447_v62 = vmul.f32 %v1444_v39, %v1442_v49  ;;  %v1357_v4 = vadd.f32 %v1356_v57, %v1332_v47  ;;  %v1428_v58 = vsel %vm372_vm4, %v1420_v3, %v1426_v60 }
 0x1f5   : > { %v1445_v12 = vmul.f32 %v1444_v39, %v1441_v59  ;;  %v1429_v25 = vsel %vm374_vm5, %v1428_v58, %v1427_v5 }
 0x1f6   : > { %v1451_v2 = vrot.slane %v1446_v50, 7  ;;  %v1382_v15 = vadd.f32 %v1381_v40, %v1357_v4  ;;  %v1452_v17 = vrot.slane %v1447_v62, 6  ;;  %v1431_v43 = vsel %vm394_vm8, %v1429_v25, 0.0 }
 0x1f7   : > { %vm1576_vm8 = vcmp.lt.s32.totalorder %v325_v0, 384 }
 0x1f8   : > { %v1453_v19 = vsel %vm372_vm4, %v1445_v12, %v1451_v2  ;;  %v1407_v39 = vadd.f32 %v1406_v16, %v1382_v15 }
 0x1fa   : > { %v1463_v23 = vpop.permute.xlu1 %1462  ;;  %v2582_v24 = vpop.permute.xlu0 %1460  ;;  %v1432_v49 = vadd.f32 %v1431_v43, %v1407_v39 }
 0x1fb   : > { %v1465_v8 = vsel %vm1464_vm13, %v2582_v24, %v1463_v23  ;;  %v1467_v13 = vsel %vm1464_vm13, %v1463_v23, %v2548_v52  ;;  %v1466_v9 = vsel %vm1464_vm13, %v2548_v52, %v2582_v24  ;;  %v1533_v38 = vpop.permute.xlu2 %1532 }
 0x1fc   : > { %v1471_v14 = vmul.f32 %v1469_v63, %v1465_v8  ;;  %v1472_v23 = vmul.f32 %v1469_v63, %v1467_v13  ;;  %v1470_v44 = vmul.f32 %v1469_v63, %v1466_v9 }
 0x1fe   : > { %v1476_v30 = vrot.slane %v1471_v14, 7  ;;  %v1477_v52 = vrot.slane %v1472_v23, 6 }
 0x200   : > { %v1478_v31 = vsel %vm372_vm4, %v1470_v44, %v1476_v30 }
 0x202   : > { %v1487_v55 = vpop.permute.xlu1 %1486  ;;  %v1485_v56 = vpop.permute.xlu0 %1484 }
 0x203   : > { %v1489_v61 = vsel %vm1488_vm11, %v1485_v56, %v1487_v55  ;;  %v1491_v6 = vsel %vm1488_vm11, %v1487_v55, %v1483_v22  ;;  %v1490_v21 = vsel %vm1488_vm11, %v1483_v22, %v1485_v56  ;;  %v1454_v22 = vsel %vm374_vm5, %v1453_v19, %v1452_v17 }
 0x204   : > { %v1495_v10 = vmul.f32 %v1493_v42, %v1489_v61  ;;  %v1496_v18 = vmul.f32 %v1493_v42, %v1491_v6  ;;  %v1494_v36 = vmul.f32 %v1493_v42, %v1490_v21  ;;  %v1456_v48 = vsel %vm420_vm9, %v1454_v22, 0.0 }
 0x205   : > { %v1457_v54 = vadd.f32 %v1456_v48, %v1432_v49  ;;  %v1479_v55 = vsel %vm374_vm5, %v1478_v31, %v1477_v52 }
 0x206   : > { %v1500_v7 = vrot.slane %v1495_v10, 7  ;;  %v1501_v45 = vrot.slane %v1496_v18, 6 }
 0x207   : > { %v1481_v40 = vadd.f32 %v1479_v55, %v1457_v54 }
 0x208   : > { %v1502_v24 = vsel %vm372_vm4, %v1494_v36, %v1500_v7 }
 0x209   : > { %v1503_v51 = vsel %vm374_vm5, %v1502_v24, %v1501_v45 }
 0x20a   : > { %v1512_v26 = vpop.permute.xlu1 %1511  ;;  %v1510_v27 = vpop.permute.xlu0 %1509  ;;  %v1505_v59 = vsel %vm470_vm12, %v1503_v51, 0.0 }
 0x20b   : > { %v1516_v32 = vsel %vm1513_vm15, %v1512_v26, %v1508_v35  ;;  %v1514_v33 = vsel %vm1513_vm15, %v1510_v27, %v1512_v26  ;;  %v1515_v34 = vsel %vm1513_vm15, %v1508_v35, %v1510_v27  ;;  %v1506_v4 = vadd.f32 %v1505_v59, %v1481_v40  ;;  %v1580_v27 = vld [vmem:[%s311_s30] sm:$0xff] }
 0x20c   : > { %v1521_v37 = vmul.f32 %v1518_v20, %v1516_v32  ;;  %v1520_v41 = vmul.f32 %v1518_v20, %v1514_v33  ;;  %v1519_v46 = vmul.f32 %v1518_v20, %v1515_v34 }
 0x20e   : > { %v1525_v47 = vrot.slane %v1520_v41, 7  ;;  %v1526_v28 = vrot.slane %v1521_v37, 6 }
 0x210   : > { %v1527_v50 = vsel %vm372_vm4, %v1519_v46, %v1525_v47 }
 0x211   : > { %v1528_v60 = vsel %vm374_vm5, %v1527_v50, %v1526_v28 }
 0x212   : > { %v1537_v56 = vpop.permute.xlu1 %1536  ;;  %v1535_v57 = vpop.permute.xlu0 %1534  ;;  %v1530_v11 = vsel %vm496_vm14, %v1528_v60, 0.0  ;;  %vm1585_vm14 = vcmask 1043456  }
 0x213   : > { %v1541_v42 = vsel %vm1538_vm6, %v1537_v56, %v1533_v38  ;;  %v1539_v61 = vsel %vm1538_vm6, %v1535_v57, %v1537_v56  ;;  %v1540_v62 = vsel %vm1538_vm6, %v1533_v38, %v1535_v57  ;;  %v1531_v6 = vadd.f32 %v1530_v11, %v1506_v4 }
 0x214   : > { %v1546_v63 = vmul.f32 %v1543_v53, %v1541_v42  ;;  %v1545_v8 = vmul.f32 %v1543_v53, %v1539_v61  ;;  %v1544_v3 = vmul.f32 %v1543_v53, %v1540_v62 }
 0x216   : > { %v1551_v1 = vrot.slane %v1546_v63, 6  ;;  %v1550_v2 = vrot.slane %v1545_v8, 7 }
 0x218   : > { %v1552_v5 = vsel %vm372_vm4, %v1544_v3, %v1550_v2 }
 0x219   : > { %v1553_v10 = vsel %vm374_vm5, %v1552_v5, %v1551_v1 }
 0x21a   : > { %v1555_v35 = vsel %vm522_vm0, %v1553_v10, 0.0 }
 0x21b   : > { %v1556_v58 = vadd.f32 %v1555_v35, %v1531_v6 }
 0x21d   : > { %v1557_v12 = vsub.f32 0.0, %v1556_v58 }
 0x21f   : > { %v1558_v13 = vmul.f32 1.442695, %v1557_v12 }
 0x221   : > { %1855 = vpow2.f32 %v1558_v13 }
 0x227   : > { %v1856_v14 = vpop.eup %1855 }
 0x228   : > { %v1560_v15 = vadd.f32 1.0, %v1856_v14 }
 0x22a   : > { %1857 = vrcp.f32 %v1560_v15  ;;  %v1572_v18 = vand.u32 2147483648, %v1560_v15  ;;  %v1570_v20 = vand.u32 2147483647, %v1560_v15  ;;  %vm1566_vm5 = vweird.f32 %v1560_v15 }
 0x22c   : > { %v1573_v29 = vor.u32 1.1754944e-38, %v1572_v18  ;;  %vm1571_vm12 = vcmp.eq.f32.partialorder %v1570_v20, 8.507059e+37 }
 0x230   : > { %v1858_v16 = vpop.eup %1857 }
 0x231   : > { %v1562_v17 = vmul.f32 %v1858_v16, %v1560_v15  ;;  %vm1567_vm4 = vweird.f32 %v1858_v16 }
 0x232   : > { %vm1568_vm9 = vmor %vm1566_vm5, %vm1567_vm4 }
 0x233   : > { %v1563_v19 = vsub.f32 1.0, %v1562_v17 }
 0x235   : > { %v1564_v21 = vmul.f32 %v1858_v16, %v1563_v19 }
 0x237   : > { %v1565_v25 = vadd.f32 %v1858_v16, %v1564_v21 }
 0x239   : > { %v1569_v23 = vsel %vm1568_vm9, %v1858_v16, %v1565_v25 }
 0x23a   : > { %v1574_v9 = vsel %vm1571_vm12, %v1573_v29, %v1569_v23 }
 0x23b   : > { %1578 = vst.msk [vmem:[#allocation2] sm:$0x7] %vm1576_vm8, %v1574_v9 }
 0x242   : > { %v1579_v7 = vld [vmem:[#allocation2] sm:$0x3] }
 0x243   : > { %v1583_v26 = vperm.slane %v1579_v7, 1  ;;  %v1582_v30 = vperm.slane %v1579_v7, 0 }
 0x245   : > { %v1584_v32 = vrot.slane %v1583_v26, 4 }
 0x247   : > { %v1586_v0 = vsel %vm1585_vm14, %v1582_v30, %v1584_v32 }
 0x248   : > { %v1588_v33 = vmul.f32 %v1586_v0, %v1580_v27 }
 0x24a   : > { %1589 = vst [vmem:[%s320_s9] sm:$0xff] %v1588_v33 }
 0x24b PF: > { %s19_s27 = sadd.s32 1, %s1901_s27   ;;  %s2705_s25 = smov %s1897_s26 }
 0x24c   : > { %p16_p8 = scmp.ge.s32.totalorder %s19_s27, 4   ;;  %s2706_s26 = smov %s2708_s4 }
 0x24e   :  { %18 = sbr.rel (!%p16_p8) target bundleno = 5 (0x5), region = 86 }
 0x253   :  { %1619 = vsyncpa [#allocation6], 1 }
 0x254   :  { %1621 = vsyncpa [#allocation6 + $0x1], 1 }

</bundles_post_ra>
